<compile_context>
chip_gen: v5e
topology: v5e:2x2
jax: 0.10.0
libtpu: 0.0.40
codegen_flags: <defaults>
</compile_context>

<pallas_src>
import numpy as np

import jax
import jax.numpy as jnp
from jax.experimental import pallas as pl
from jax.experimental.pallas import tpu as pltpu


# ---------------------------------------------------------------------------
# Static geometry / sizes
# ---------------------------------------------------------------------------
H0, W0 = 8, 3          # input spatial size (fc expects 2*3 after two (2,1) pools)
C_IN, C_OUT = 180, 64
CAM_HID = 24           # 64 // 3 = 21, zero-padded to 24 (padding is numerically exact)
TAP = 128              # lane stride of one conv tap inside the fused weight matrix
EPS = 1e-5             # torch BatchNorm2d default


# ---------------------------------------------------------------------------
# Trace-time constant builders (numpy, run once outside jit)
# ---------------------------------------------------------------------------
def _conv_shift_matrices(B, H, W, k):
    """(k*k, M, M) 0/1 matrices: S[t] @ x == x shifted by tap t with zero pad."""
    pad, M = k // 2, B * H * W
    S = np.zeros((k * k, M, M), np.float32)
    for b in range(B):
        for h in range(H):
            for w in range(W):
                r = b * H * W + h * W + w
                for kh in range(k):
                    for kw in range(k):
                        hh, ww = h + kh - pad, w + kw - pad
                        if 0 <= hh < H and 0 <= ww < W:
                            S[kh * k + kw, r, b * H * W + hh * W + ww] = 1.0
    return S


def _pool_matrix(B, H, W):
    """(2*Mo, M) stacked row selectors for MaxPool2d((2,1)); top half even-h rows."""
    M, Mo = B * H * W, B * (H // 2) * W
    P = np.zeros((2 * Mo, M), np.float32)
    for b in range(B):
        for h2 in range(H // 2):
            for w in range(W):
                i = b * (H // 2) * W + h2 * W + w
                P[i, b * H * W + (2 * h2) * W + w] = 1.0
                P[Mo + i, b * H * W + (2 * h2 + 1) * W + w] = 1.0
    return P


def _tap_masks(B, H, W):
    """(9, M, 1) conv-tap validity masks (1 where the 3x3 tap stays in the image)."""
    M = B * H * W
    mask = np.zeros((9, M, 1), np.float32)
    for b in range(B):
        for h in range(H):
            for w in range(W):
                r = b * H * W + h * W + w
                for kh in range(3):
                    for kw in range(3):
                        if 0 <= h + kh - 1 < H and 0 <= w + kw - 1 < W:
                            mask[kh * 3 + kw, r, 0] = 1.0
    return mask


# ---------------------------------------------------------------------------
# Pack logical params into the kernel layout (run ONCE, outside jit)
# ---------------------------------------------------------------------------
def pack_params(params, B):
    geom = ((H0, W0), (H0 // 2, W0), (H0 // 4, W0))
    P3 = geom[2][0] * geom[2][1]        # 6
    M3 = B * P3

    blocks = []
    for i, (h, w) in enumerate(geom):
        p = params[f"b{i + 1}"]
        cin = p["conv_w"].shape[1]
        # Fused conv weights: w_cat[ci, k*TAP + co] = conv_w[k, ci, co] (64 -> 128 lanes).
        wc = jnp.pad(p["conv_w"], ((0, 0), (0, 0), (0, TAP - C_OUT)))
        w_cat = jnp.transpose(wc, (1, 0, 2)).reshape(cin, 9 * TAP)
        # SAM 7x7 conv absorbed into one (M, 2M) operator acting on [cmax ; cmean].
        s7 = _conv_shift_matrices(B, h, w, 7)
        sam_op = np.einsum("kc,kmn->cmn", np.asarray(p["sam_w"]), s7)        # (2, M, M)
        blk = dict(
            w_cat=w_cat,
            mask=jnp.asarray(_tap_masks(B, h, w)),
            cam_w1=p["cam_w1"], cam_w2=p["cam_w2"],
            sam_op=jnp.asarray(np.concatenate([sam_op[0], sam_op[1]], axis=1)),
        )
        if i < 2:
            blk["pool"] = jnp.asarray(_pool_matrix(B, h, w))
        blocks.append(blk)

    # fc: NCHW-flatten permutation folded into one lane-padded weight matrix:
    #   fc_wall[c, p*TAP + o] = torch_fc_W[o, c*6 + p]
    fcw = jnp.pad(params["fc_w"], ((0, 0), (0, 0), (0, TAP - 20)))
    fc_wall = jnp.transpose(fcw, (1, 0, 2)).reshape(C_OUT, P3 * TAP)
    selmask = np.zeros((M3, P3 * TAP), np.float32)
    for r in range(M3):
        selmask[r, (r % P3) * TAP:((r % P3) + 1) * TAP] = 1.0

    # All per-channel vectors packed into one (16,128) table (one DMA instead of 16).
    hid = params["l1_b"].shape[-1]
    vt = np.zeros((16, 128), np.float32)
    for i in range(3):
        p = params[f"b{i + 1}"]
        vt[i, :C_OUT] = np.asarray(p["bn_g"]).reshape(-1)
        vt[3 + i, :C_OUT] = np.asarray(p["bn_b"]).reshape(-1)
        vt[6 + i, :CAM_HID] = np.asarray(p["cam_b1"]).reshape(-1)
        vt[9 + i, :C_OUT] = np.asarray(p["cam_b2"]).reshape(-1)
    vt[12, :20] = np.asarray(params["fc_b"]).reshape(-1)
    vt[13, :hid] = np.asarray(params["l1_b"]).reshape(-1)
    vt[14, :hid] = np.asarray(params["l2_b"]).reshape(-1)
    vt[15, :1] = np.asarray(params["l3_b"]).reshape(-1)

    return dict(
        blk=tuple(blocks), fc_wall=fc_wall, selmask=jnp.asarray(selmask),
        vec=jnp.asarray(vt),
        head=dict(w1a=params["l1_wa"], w1b=params["l1_wb"],
                  w2=params["l2_w"], w3=params["l3_w"]),
    )


# ---------------------------------------------------------------------------
# Fully fused forward pass (one pallas_call)
# ---------------------------------------------------------------------------
def actor_forward(s, s_a, packed):
    B, C, H, W = s.shape
    geom = ((H, W), (H // 2, W), (H // 4, W))
    P3 = geom[2][0] * geom[2][1]
    M3 = B * P3
    hid_dim = packed["head"]["w2"].shape[-1]

    # Layout plumbing only: NCHW -> rows ordered (b, h, w), channels on lanes.
    x0 = jnp.transpose(s, (0, 2, 3, 1)).reshape(B * H * W, C)

    inputs = dict(x0=x0, sa=s_a, **packed)
    flat, treedef = jax.tree_util.tree_flatten(inputs)
    n_in = len(flat)

    def shift_rows(t, d):
        """out[r] = t[r + d] for 0 <= r + d < rows, else 0 (static d, no MXU)."""
        if d == 0:
            return t
        z = jnp.zeros((abs(d), t.shape[1]), t.dtype)
        return (jnp.concatenate([t[d:, :], z], axis=0) if d > 0
                else jnp.concatenate([z, t[:d, :]], axis=0))

    def tree_sum(ts):
        """Balanced-tree sum (shortens the add dependency chain)."""
        while len(ts) > 1:
            nxt = [ts[j] + ts[j + 1] for j in range(0, len(ts) - 1, 2)]
            if len(ts) % 2:
                nxt.append(ts[-1])
            ts = nxt
        return ts[0]

    def kernel(*refs):
        d = jax.tree_util.tree_unflatten(treedef, refs[:n_in])
        o_ref = refs[n_in]
        tab = d["vec"][...]                                   # (16, 128) vector table

        def vrow(r, n):
            return tab[r:r + 1, :n]

        x = d["x0"][...]                                      # (B*H*W, Cin)
        for i, blk in enumerate(d["blk"]):
            h, w = geom[i]
            M, P = B * h * w, h * w

            # --- Conv2d 3x3, pad=1: ONE fused matmul, then per-tap row shift
            #     (slice + zero pad) and boundary mask on the VPU. ---
            t_all = jnp.dot(x, blk["w_cat"][...], preferred_element_type=jnp.float32)
            terms = []
            for k in range(9):
                dh, dw = k // 3 - 1, k % 3 - 1
                t = shift_rows(t_all[:, k * TAP:(k + 1) * TAP], dh * w + dw)
                terms.append(blk["mask"][k] * t)
            y = tree_sum(terms)[:, :C_OUT]

            # --- BatchNorm2d (train-mode batch stats, biased variance) + ReLU ---
            mu = jnp.mean(y, axis=0, keepdims=True)
            var = jnp.mean(jnp.square(y - mu), axis=0, keepdims=True)
            y = (y - mu) * jax.lax.rsqrt(var + EPS) * vrow(i, C_OUT) + vrow(3 + i, C_OUT)
            y = jnp.maximum(y, 0.0)

            # --- CAM: per-batch global max/avg pool, shared MLP run ONCE on the
            #     stacked (2B, C) matrix, sigmoid gate scattered back via masks. ---
            rid = jax.lax.broadcasted_iota(jnp.int32, (M, 1), 0)
            mfs = [jnp.logical_and(rid >= b * P, rid < (b + 1) * P).astype(jnp.float32)
                   for b in range(B)]
            pooled = ([jnp.max(y * mfs[b], axis=0, keepdims=True) for b in range(B)]  # y >= 0
                      + [jnp.sum(y * mfs[b], axis=0, keepdims=True) * (1.0 / P)
                         for b in range(B)])
            stacked = jnp.concatenate(pooled, axis=0)                        # (2B, C)
            hidc = jnp.maximum(
                jnp.dot(stacked, blk["cam_w1"][...], preferred_element_type=jnp.float32)
                + vrow(6 + i, CAM_HID), 0.0)
            camo = (jnp.dot(hidc, blk["cam_w2"][...], preferred_element_type=jnp.float32)
                    + vrow(9 + i, C_OUT))
            gate = jax.nn.sigmoid(camo[:B, :] + camo[B:, :])                 # (B, C)
            grows = tree_sum([mfs[b] * gate[b:b + 1, :] for b in range(B)])  # (M, C)
            y = y * grows

            # --- SAM: channel max/mean per pixel, 7x7 conv as ONE (M, 2M) operator ---
            cmx = jnp.max(y, axis=1, keepdims=True)                          # (M, 1)
            cav = jnp.mean(y, axis=1, keepdims=True)                         # (M, 1)
            att = jnp.dot(blk["sam_op"][...], jnp.concatenate([cmx, cav], axis=0),
                          preferred_element_type=jnp.float32)                # (M, 1)
            x = att * y                                  # (no sigmoid, per reference SAM)

            # --- MaxPool2d((2,1)) via one stacked row-selection matmul + max ---
            if "pool" in blk:
                Mo = B * (h // 2) * w
                tp = jnp.dot(blk["pool"][...], x, preferred_element_type=jnp.float32)
                x = jnp.maximum(tp[:Mo, :], tp[Mo:, :])

        # --- fc: the NCHW flatten permutation folded into one lane-padded matmul ---
        T = jnp.dot(x, d["fc_wall"][...], preferred_element_type=jnp.float32)  # (M3, 6*TAP)
        T = T * d["selmask"][...]
        R = tree_sum([T[:, p * TAP:(p + 1) * TAP] for p in range(P3)])         # (M3, TAP)
        rid3 = jax.lax.broadcasted_iota(jnp.int32, (M3, 1), 0)
        rows = [jnp.sum(R * jnp.logical_and(rid3 >= b * P3, rid3 < (b + 1) * P3)
                        .astype(jnp.float32), axis=0, keepdims=True)
                for b in range(B)]
        feat = jnp.concatenate(rows, axis=0)[:, :20] + vrow(12, 20)            # (B, 20)

        # --- actor head: concat(feat, s_a) -> l1 ReLU -> l2 ReLU -> l3 tanh ---
        hd = d["head"]
        sa = d["sa"][...]
        h1 = jnp.maximum(
            jnp.dot(feat, hd["w1a"][...], preferred_element_type=jnp.float32)
            + jnp.dot(sa, hd["w1b"][...], preferred_element_type=jnp.float32)
            + vrow(13, hid_dim), 0.0)
        h2 = jnp.maximum(
            jnp.dot(h1, hd["w2"][...], preferred_element_type=jnp.float32)
            + vrow(14, hid_dim), 0.0)
        o_ref[...] = jnp.tanh(
            jnp.dot(h2, hd["w3"][...], preferred_element_type=jnp.float32) + vrow(15, 1))

    return pl.pallas_call(
        kernel,
        out_shape=jax.ShapeDtypeStruct((B, 1), jnp.float32),
        in_specs=[pl.BlockSpec(memory_space=pltpu.MemorySpace.VMEM)] * n_in,
        out_specs=pl.BlockSpec(memory_space=pltpu.MemorySpace.VMEM),
    )(*flat)


# ---------------------------------------------------------------------------
# Deterministic synthetic parameters in the logical (torch-derived) layout.
#  torch Conv2d (Cout,Cin,3,3)  -> conv_w[kh*3+kw, ci, co] = W[co, ci, kh, kw]
#  torch SAM  (1,2,7,7)         -> sam_w[kh*7+kw, c]       = W[0, c, kh, kw]
#  torch fc   (20, 64*2*3)      -> fc_w[p, c, o]           = W[o, c*6 + p]
#  torch layer_1 (hid, sd+20)   -> l1_wa = W[:, :20].T, l1_wb = W[:, 20:].T
# ---------------------------------------------------------------------------
def init_params(key, state_dim, hidden_dim):
    keys = iter(jax.random.split(key, 64))

    def nrm(shape, scale=0.05):
        return scale * jax.random.normal(next(keys), shape, dtype=jnp.float32)

    def block(cin, cout, r=3):
        cr = cout // r                       # 21
        pad = CAM_HID - cr                   # zero-pad CAM hidden dim 21 -> 24 (exact)
        return dict(
            conv_w=nrm((9, cin, cout)),      # conv bias omitted: cancelled by BN mean
            bn_g=jnp.ones((1, cout), jnp.float32),
            bn_b=jnp.zeros((1, cout), jnp.float32),
            cam_w1=jnp.pad(nrm((cout, cr)), ((0, 0), (0, pad))),
            cam_b1=jnp.pad(nrm((1, cr)), ((0, 0), (0, pad))),
            cam_w2=jnp.pad(nrm((cr, cout)), ((0, pad), (0, 0))),
            cam_b2=nrm((1, cout)),
            sam_w=nrm((49, 2)),              # SAM conv has no bias
        )

    return dict(
        b1=block(C_IN, C_OUT), b2=block(C_OUT, C_OUT), b3=block(C_OUT, C_OUT),
        fc_w=nrm((6, C_OUT, 20)), fc_b=nrm((1, 20)),
        l1_wa=nrm((20, hidden_dim)), l1_wb=nrm((state_dim, hidden_dim)),
        l1_b=nrm((1, hidden_dim)),
        l2_w=nrm((hidden_dim, hidden_dim)), l2_b=nrm((1, hidden_dim)),
        l3_w=nrm((hidden_dim, 1)), l3_b=nrm((1, 1)),
    )


if __name__ == "__main__":
    B, state_dim, hidden_dim = 2, 12, 32
    key = jax.random.PRNGKey(0)
    kp, ks, ka = jax.random.split(key, 3)

    params = init_params(kp, state_dim, hidden_dim)
    packed = pack_params(params, B)        # one-time repack, outside jit

    # Input spatial size must be (8, 3): two (2,1) max-pools -> (2, 3) for the fc.
    s = jax.random.normal(ks, (B, C_IN, H0, W0), dtype=jnp.float32)   # NCHW like PyTorch
    s_a = jax.random.normal(ka, (B, state_dim), dtype=jnp.float32)

    out = jax.jit(actor_forward)(s, s_a, packed)
    out = jax.block_until_ready(out)
    assert out.shape == (B, 1) and out.dtype == jnp.float32
    assert bool(jnp.all(jnp.isfinite(out)))
    print("KERNEL_OK")
</pallas_src>

<mosaic_0001>
module attributes {stable_mosaic.version = 11 : i64} {
  func.func @kernel(%arg0: memref<64x24xf32, #tpu.memory_space<vmem>>, %arg1: memref<24x64xf32, #tpu.memory_space<vmem>>, %arg2: memref<9x48x1xf32, #tpu.memory_space<vmem>>, %arg3: memref<48x48xf32, #tpu.memory_space<vmem>>, %arg4: memref<48x96xf32, #tpu.memory_space<vmem>>, %arg5: memref<180x1152xf32, #tpu.memory_space<vmem>>, %arg6: memref<64x24xf32, #tpu.memory_space<vmem>>, %arg7: memref<24x64xf32, #tpu.memory_space<vmem>>, %arg8: memref<9x24x1xf32, #tpu.memory_space<vmem>>, %arg9: memref<24x24xf32, #tpu.memory_space<vmem>>, %arg10: memref<24x48xf32, #tpu.memory_space<vmem>>, %arg11: memref<64x1152xf32, #tpu.memory_space<vmem>>, %arg12: memref<64x24xf32, #tpu.memory_space<vmem>>, %arg13: memref<24x64xf32, #tpu.memory_space<vmem>>, %arg14: memref<9x12x1xf32, #tpu.memory_space<vmem>>, %arg15: memref<12x24xf32, #tpu.memory_space<vmem>>, %arg16: memref<64x1152xf32, #tpu.memory_space<vmem>>, %arg17: memref<64x768xf32, #tpu.memory_space<vmem>>, %arg18: memref<20x32xf32, #tpu.memory_space<vmem>>, %arg19: memref<12x32xf32, #tpu.memory_space<vmem>>, %arg20: memref<32x32xf32, #tpu.memory_space<vmem>>, %arg21: memref<32x1xf32, #tpu.memory_space<vmem>>, %arg22: memref<2x12xf32, #tpu.memory_space<vmem>>, %arg23: memref<12x768xf32, #tpu.memory_space<vmem>>, %arg24: memref<16x128xf32, #tpu.memory_space<vmem>>, %arg25: memref<48x180xf32, #tpu.memory_space<vmem>>, %arg26: memref<2x1xf32, #tpu.memory_space<vmem>>) attributes {dimension_semantics = [], scalar_prefetch = 0 : i64, scratch_operands = 0 : i64, tpu.core_type = #tpu.core_type<tc>} {
    %c0 = arith.constant 0 : index
    %c0_0 = arith.constant 0 : index
    %0 = vector.load %arg24[%c0, %c0_0] : memref<16x128xf32, #tpu.memory_space<vmem>>, vector<16x128xf32>
    %c0_1 = arith.constant 0 : index
    %c0_2 = arith.constant 0 : index
    %1 = vector.load %arg25[%c0_1, %c0_2] : memref<48x180xf32, #tpu.memory_space<vmem>>, vector<48x180xf32>
    %c0_3 = arith.constant 0 : index
    %c0_4 = arith.constant 0 : index
    %2 = vector.load %arg5[%c0_3, %c0_4] : memref<180x1152xf32, #tpu.memory_space<vmem>>, vector<180x1152xf32>
    %cst = arith.constant dense<0.000000e+00> : vector<48x1152xf32>
    %3 = tpu.matmul %1, %2, %cst {dimension_numbers = #tpu.dot_dimension_numbers<[1], [0], [0], [1], [0, 0, 1, 1], [], []>} : vector<48x180xf32>, vector<180x1152xf32>, vector<48x1152xf32> -> vector<48x1152xf32>
    %4 = vector.extract_strided_slice %3 {offsets = [0, 0], sizes = [48, 128], strides = [1, 1]} : vector<48x1152xf32> to vector<48x128xf32>
    %cst_5 = arith.constant 0.000000e+00 : f32
    %5 = vector.broadcast %cst_5 : f32 to vector<4x128xf32>
    %6 = vector.extract_strided_slice %4 {offsets = [0, 0], sizes = [44, 128], strides = [1, 1]} : vector<48x128xf32> to vector<44x128xf32>
    %7 = tpu.concatenate %5, %6 in 0 : vector<4x128xf32>, vector<44x128xf32> -> vector<48x128xf32>
    %c0_6 = arith.constant 0 : index
    %c0_7 = arith.constant 0 : index
    %c0_8 = arith.constant 0 : index
    %8 = vector.load %arg2[%c0_6, %c0_7, %c0_8] : memref<9x48x1xf32, #tpu.memory_space<vmem>>, vector<1x48x1xf32>
    %9 = vector.shape_cast %8 : vector<1x48x1xf32> to vector<48x1xf32>
    %10 = vector.broadcast %9 : vector<48x1xf32> to vector<48x128xf32>
    %11 = arith.mulf %10, %7 : vector<48x128xf32>
    %12 = vector.extract_strided_slice %3 {offsets = [0, 128], sizes = [48, 128], strides = [1, 1]} : vector<48x1152xf32> to vector<48x128xf32>
    %cst_9 = arith.constant 0.000000e+00 : f32
    %13 = vector.broadcast %cst_9 : f32 to vector<3x128xf32>
    %14 = vector.extract_strided_slice %12 {offsets = [0, 0], sizes = [45, 128], strides = [1, 1]} : vector<48x128xf32> to vector<45x128xf32>
    %15 = tpu.concatenate %13, %14 in 0 : vector<3x128xf32>, vector<45x128xf32> -> vector<48x128xf32>
    %c1 = arith.constant 1 : index
    %c0_10 = arith.constant 0 : index
    %c0_11 = arith.constant 0 : index
    %16 = vector.load %arg2[%c1, %c0_10, %c0_11] : memref<9x48x1xf32, #tpu.memory_space<vmem>>, vector<1x48x1xf32>
    %17 = vector.shape_cast %16 : vector<1x48x1xf32> to vector<48x1xf32>
    %18 = vector.broadcast %17 : vector<48x1xf32> to vector<48x128xf32>
    %19 = arith.mulf %18, %15 : vector<48x128xf32>
    %20 = vector.extract_strided_slice %3 {offsets = [0, 256], sizes = [48, 128], strides = [1, 1]} : vector<48x1152xf32> to vector<48x128xf32>
    %cst_12 = arith.constant 0.000000e+00 : f32
    %21 = vector.broadcast %cst_12 : f32 to vector<2x128xf32>
    %22 = vector.extract_strided_slice %20 {offsets = [0, 0], sizes = [46, 128], strides = [1, 1]} : vector<48x128xf32> to vector<46x128xf32>
    %23 = tpu.concatenate %21, %22 in 0 : vector<2x128xf32>, vector<46x128xf32> -> vector<48x128xf32>
    %c2 = arith.constant 2 : index
    %c0_13 = arith.constant 0 : index
    %c0_14 = arith.constant 0 : index
    %24 = vector.load %arg2[%c2, %c0_13, %c0_14] : memref<9x48x1xf32, #tpu.memory_space<vmem>>, vector<1x48x1xf32>
    %25 = vector.shape_cast %24 : vector<1x48x1xf32> to vector<48x1xf32>
    %26 = vector.broadcast %25 : vector<48x1xf32> to vector<48x128xf32>
    %27 = arith.mulf %26, %23 : vector<48x128xf32>
    %28 = vector.extract_strided_slice %3 {offsets = [0, 384], sizes = [48, 128], strides = [1, 1]} : vector<48x1152xf32> to vector<48x128xf32>
    %cst_15 = arith.constant 0.000000e+00 : f32
    %29 = vector.broadcast %cst_15 : f32 to vector<1x128xf32>
    %30 = vector.extract_strided_slice %28 {offsets = [0, 0], sizes = [47, 128], strides = [1, 1]} : vector<48x128xf32> to vector<47x128xf32>
    %31 = tpu.concatenate %29, %30 in 0 : vector<1x128xf32>, vector<47x128xf32> -> vector<48x128xf32>
    %c3 = arith.constant 3 : index
    %c0_16 = arith.constant 0 : index
    %c0_17 = arith.constant 0 : index
    %32 = vector.load %arg2[%c3, %c0_16, %c0_17] : memref<9x48x1xf32, #tpu.memory_space<vmem>>, vector<1x48x1xf32>
    %33 = vector.shape_cast %32 : vector<1x48x1xf32> to vector<48x1xf32>
    %34 = vector.broadcast %33 : vector<48x1xf32> to vector<48x128xf32>
    %35 = arith.mulf %34, %31 : vector<48x128xf32>
    %36 = vector.extract_strided_slice %3 {offsets = [0, 512], sizes = [48, 128], strides = [1, 1]} : vector<48x1152xf32> to vector<48x128xf32>
    %c4 = arith.constant 4 : index
    %c0_18 = arith.constant 0 : index
    %c0_19 = arith.constant 0 : index
    %37 = vector.load %arg2[%c4, %c0_18, %c0_19] : memref<9x48x1xf32, #tpu.memory_space<vmem>>, vector<1x48x1xf32>
    %38 = vector.shape_cast %37 : vector<1x48x1xf32> to vector<48x1xf32>
    %39 = vector.broadcast %38 : vector<48x1xf32> to vector<48x128xf32>
    %40 = arith.mulf %39, %36 : vector<48x128xf32>
    %41 = vector.extract_strided_slice %3 {offsets = [0, 640], sizes = [48, 128], strides = [1, 1]} : vector<48x1152xf32> to vector<48x128xf32>
    %cst_20 = arith.constant 0.000000e+00 : f32
    %42 = vector.broadcast %cst_20 : f32 to vector<1x128xf32>
    %43 = vector.extract_strided_slice %41 {offsets = [1, 0], sizes = [47, 128], strides = [1, 1]} : vector<48x128xf32> to vector<47x128xf32>
    %44 = tpu.concatenate %43, %42 in 0 : vector<47x128xf32>, vector<1x128xf32> -> vector<48x128xf32>
    %c5 = arith.constant 5 : index
    %c0_21 = arith.constant 0 : index
    %c0_22 = arith.constant 0 : index
    %45 = vector.load %arg2[%c5, %c0_21, %c0_22] : memref<9x48x1xf32, #tpu.memory_space<vmem>>, vector<1x48x1xf32>
    %46 = vector.shape_cast %45 : vector<1x48x1xf32> to vector<48x1xf32>
    %47 = vector.broadcast %46 : vector<48x1xf32> to vector<48x128xf32>
    %48 = arith.mulf %47, %44 : vector<48x128xf32>
    %49 = vector.extract_strided_slice %3 {offsets = [0, 768], sizes = [48, 128], strides = [1, 1]} : vector<48x1152xf32> to vector<48x128xf32>
    %cst_23 = arith.constant 0.000000e+00 : f32
    %50 = vector.broadcast %cst_23 : f32 to vector<2x128xf32>
    %51 = vector.extract_strided_slice %49 {offsets = [2, 0], sizes = [46, 128], strides = [1, 1]} : vector<48x128xf32> to vector<46x128xf32>
    %52 = tpu.concatenate %51, %50 in 0 : vector<46x128xf32>, vector<2x128xf32> -> vector<48x128xf32>
    %c6 = arith.constant 6 : index
    %c0_24 = arith.constant 0 : index
    %c0_25 = arith.constant 0 : index
    %53 = vector.load %arg2[%c6, %c0_24, %c0_25] : memref<9x48x1xf32, #tpu.memory_space<vmem>>, vector<1x48x1xf32>
    %54 = vector.shape_cast %53 : vector<1x48x1xf32> to vector<48x1xf32>
    %55 = vector.broadcast %54 : vector<48x1xf32> to vector<48x128xf32>
    %56 = arith.mulf %55, %52 : vector<48x128xf32>
    %57 = vector.extract_strided_slice %3 {offsets = [0, 896], sizes = [48, 128], strides = [1, 1]} : vector<48x1152xf32> to vector<48x128xf32>
    %cst_26 = arith.constant 0.000000e+00 : f32
    %58 = vector.broadcast %cst_26 : f32 to vector<3x128xf32>
    %59 = vector.extract_strided_slice %57 {offsets = [3, 0], sizes = [45, 128], strides = [1, 1]} : vector<48x128xf32> to vector<45x128xf32>
    %60 = tpu.concatenate %59, %58 in 0 : vector<45x128xf32>, vector<3x128xf32> -> vector<48x128xf32>
    %c7 = arith.constant 7 : index
    %c0_27 = arith.constant 0 : index
    %c0_28 = arith.constant 0 : index
    %61 = vector.load %arg2[%c7, %c0_27, %c0_28] : memref<9x48x1xf32, #tpu.memory_space<vmem>>, vector<1x48x1xf32>
    %62 = vector.shape_cast %61 : vector<1x48x1xf32> to vector<48x1xf32>
    %63 = vector.broadcast %62 : vector<48x1xf32> to vector<48x128xf32>
    %64 = arith.mulf %63, %60 : vector<48x128xf32>
    %65 = vector.extract_strided_slice %3 {offsets = [0, 1024], sizes = [48, 128], strides = [1, 1]} : vector<48x1152xf32> to vector<48x128xf32>
    %cst_29 = arith.constant 0.000000e+00 : f32
    %66 = vector.broadcast %cst_29 : f32 to vector<4x128xf32>
    %67 = vector.extract_strided_slice %65 {offsets = [4, 0], sizes = [44, 128], strides = [1, 1]} : vector<48x128xf32> to vector<44x128xf32>
    %68 = tpu.concatenate %67, %66 in 0 : vector<44x128xf32>, vector<4x128xf32> -> vector<48x128xf32>
    %c8 = arith.constant 8 : index
    %c0_30 = arith.constant 0 : index
    %c0_31 = arith.constant 0 : index
    %69 = vector.load %arg2[%c8, %c0_30, %c0_31] : memref<9x48x1xf32, #tpu.memory_space<vmem>>, vector<1x48x1xf32>
    %70 = vector.shape_cast %69 : vector<1x48x1xf32> to vector<48x1xf32>
    %71 = vector.broadcast %70 : vector<48x1xf32> to vector<48x128xf32>
    %72 = arith.mulf %71, %68 : vector<48x128xf32>
    %73 = arith.addf %11, %19 : vector<48x128xf32>
    %74 = arith.addf %27, %35 : vector<48x128xf32>
    %75 = arith.addf %40, %48 : vector<48x128xf32>
    %76 = arith.addf %56, %64 : vector<48x128xf32>
    %77 = arith.addf %73, %74 : vector<48x128xf32>
    %78 = arith.addf %75, %76 : vector<48x128xf32>
    %79 = arith.addf %77, %78 : vector<48x128xf32>
    %80 = arith.addf %79, %72 : vector<48x128xf32>
    %81 = vector.extract_strided_slice %80 {offsets = [0, 0], sizes = [48, 64], strides = [1, 1]} : vector<48x128xf32> to vector<48x64xf32>
    %cst_32 = arith.constant dense<0.000000e+00> : vector<64xf32>
    %82 = vector.multi_reduction <add>, %81, %cst_32 [0] : vector<48x64xf32> to vector<64xf32>
    %83 = vector.shape_cast %82 : vector<64xf32> to vector<1x64xf32>
    %cst_33 = arith.constant 4.800000e+01 : f32
    %84 = vector.broadcast %cst_33 : f32 to vector<1x64xf32>
    %85 = arith.divf %83, %84 : vector<1x64xf32>
    %86 = vector.broadcast %85 : vector<1x64xf32> to vector<48x64xf32>
    %87 = arith.subf %81, %86 : vector<48x64xf32>
    %88 = arith.mulf %87, %87 : vector<48x64xf32>
    %cst_34 = arith.constant dense<0.000000e+00> : vector<64xf32>
    %89 = vector.multi_reduction <add>, %88, %cst_34 [0] : vector<48x64xf32> to vector<64xf32>
    %90 = vector.shape_cast %89 : vector<64xf32> to vector<1x64xf32>
    %cst_35 = arith.constant 4.800000e+01 : f32
    %91 = vector.broadcast %cst_35 : f32 to vector<1x64xf32>
    %92 = arith.divf %90, %91 : vector<1x64xf32>
    %93 = vector.broadcast %85 : vector<1x64xf32> to vector<48x64xf32>
    %94 = arith.subf %81, %93 : vector<48x64xf32>
    %cst_36 = arith.constant 9.99999974E-6 : f32
    %95 = vector.broadcast %cst_36 : f32 to vector<1x64xf32>
    %96 = arith.addf %92, %95 : vector<1x64xf32>
    %97 = math.rsqrt %96 : vector<1x64xf32>
    %98 = vector.broadcast %97 : vector<1x64xf32> to vector<48x64xf32>
    %99 = arith.mulf %94, %98 : vector<48x64xf32>
    %100 = vector.extract_strided_slice %0 {offsets = [0, 0], sizes = [1, 64], strides = [1, 1]} : vector<16x128xf32> to vector<1x64xf32>
    %101 = vector.broadcast %100 : vector<1x64xf32> to vector<48x64xf32>
    %102 = arith.mulf %99, %101 : vector<48x64xf32>
    %103 = vector.extract_strided_slice %0 {offsets = [3, 0], sizes = [1, 64], strides = [1, 1]} : vector<16x128xf32> to vector<1x64xf32>
    %104 = vector.broadcast %103 : vector<1x64xf32> to vector<48x64xf32>
    %105 = arith.addf %102, %104 : vector<48x64xf32>
    %cst_37 = arith.constant 0.000000e+00 : f32
    %106 = vector.broadcast %cst_37 : f32 to vector<48x64xf32>
    %107 = arith.maximumf %105, %106 : vector<48x64xf32>
    %108 = tpu.iota {dimensions = array<i32: 0>} : vector<48x1xi32>
    %c0_i32 = arith.constant 0 : i32
    %109 = vector.broadcast %c0_i32 : i32 to vector<48x1xi32>
    %110 = arith.cmpi sge, %108, %109 : vector<48x1xi32>
    %c24_i32 = arith.constant 24 : i32
    %111 = vector.broadcast %c24_i32 : i32 to vector<48x1xi32>
    %112 = arith.cmpi slt, %108, %111 : vector<48x1xi32>
    %113 = arith.andi %110, %112 : vector<48x1xi1>
    %114 = arith.extui %113 : vector<48x1xi1> to vector<48x1xi32>
    %115 = arith.sitofp %114 : vector<48x1xi32> to vector<48x1xf32>
    %c24_i32_38 = arith.constant 24 : i32
    %116 = vector.broadcast %c24_i32_38 : i32 to vector<48x1xi32>
    %117 = arith.cmpi sge, %108, %116 : vector<48x1xi32>
    %c48_i32 = arith.constant 48 : i32
    %118 = vector.broadcast %c48_i32 : i32 to vector<48x1xi32>
    %119 = arith.cmpi slt, %108, %118 : vector<48x1xi32>
    %120 = arith.andi %117, %119 : vector<48x1xi1>
    %121 = arith.extui %120 : vector<48x1xi1> to vector<48x1xi32>
    %122 = arith.sitofp %121 : vector<48x1xi32> to vector<48x1xf32>
    %123 = vector.broadcast %115 : vector<48x1xf32> to vector<48x64xf32>
    %124 = arith.mulf %107, %123 : vector<48x64xf32>
    %cst_39 = arith.constant dense<0xFF800000> : vector<64xf32>
    %125 = vector.multi_reduction <maximumf>, %124, %cst_39 [0] : vector<48x64xf32> to vector<64xf32>
    %126 = vector.shape_cast %125 : vector<64xf32> to vector<1x64xf32>
    %127 = vector.broadcast %122 : vector<48x1xf32> to vector<48x64xf32>
    %128 = arith.mulf %107, %127 : vector<48x64xf32>
    %cst_40 = arith.constant dense<0xFF800000> : vector<64xf32>
    %129 = vector.multi_reduction <maximumf>, %128, %cst_40 [0] : vector<48x64xf32> to vector<64xf32>
    %130 = vector.shape_cast %129 : vector<64xf32> to vector<1x64xf32>
    %131 = vector.broadcast %115 : vector<48x1xf32> to vector<48x64xf32>
    %132 = arith.mulf %107, %131 : vector<48x64xf32>
    %cst_41 = arith.constant dense<0.000000e+00> : vector<64xf32>
    %133 = vector.multi_reduction <add>, %132, %cst_41 [0] : vector<48x64xf32> to vector<64xf32>
    %134 = vector.shape_cast %133 : vector<64xf32> to vector<1x64xf32>
    %cst_42 = arith.constant 0.0416666679 : f32
    %135 = vector.broadcast %cst_42 : f32 to vector<1x64xf32>
    %136 = arith.mulf %134, %135 : vector<1x64xf32>
    %137 = vector.broadcast %122 : vector<48x1xf32> to vector<48x64xf32>
    %138 = arith.mulf %107, %137 : vector<48x64xf32>
    %cst_43 = arith.constant dense<0.000000e+00> : vector<64xf32>
    %139 = vector.multi_reduction <add>, %138, %cst_43 [0] : vector<48x64xf32> to vector<64xf32>
    %140 = vector.shape_cast %139 : vector<64xf32> to vector<1x64xf32>
    %cst_44 = arith.constant 0.0416666679 : f32
    %141 = vector.broadcast %cst_44 : f32 to vector<1x64xf32>
    %142 = arith.mulf %140, %141 : vector<1x64xf32>
    %143 = tpu.concatenate %126, %130, %136, %142 in 0 : vector<1x64xf32>, vector<1x64xf32>, vector<1x64xf32>, vector<1x64xf32> -> vector<4x64xf32>
    %c0_45 = arith.constant 0 : index
    %c0_46 = arith.constant 0 : index
    %144 = vector.load %arg0[%c0_45, %c0_46] : memref<64x24xf32, #tpu.memory_space<vmem>>, vector<64x24xf32>
    %cst_47 = arith.constant dense<0.000000e+00> : vector<4x24xf32>
    %145 = tpu.matmul %143, %144, %cst_47 {dimension_numbers = #tpu.dot_dimension_numbers<[1], [0], [0], [1], [0, 0, 1, 1], [], []>} : vector<4x64xf32>, vector<64x24xf32>, vector<4x24xf32> -> vector<4x24xf32>
    %146 = vector.extract_strided_slice %0 {offsets = [6, 0], sizes = [1, 24], strides = [1, 1]} : vector<16x128xf32> to vector<1x24xf32>
    %147 = vector.broadcast %146 : vector<1x24xf32> to vector<4x24xf32>
    %148 = arith.addf %145, %147 : vector<4x24xf32>
    %cst_48 = arith.constant 0.000000e+00 : f32
    %149 = vector.broadcast %cst_48 : f32 to vector<4x24xf32>
    %150 = arith.maximumf %148, %149 : vector<4x24xf32>
    %c0_49 = arith.constant 0 : index
    %c0_50 = arith.constant 0 : index
    %151 = vector.load %arg1[%c0_49, %c0_50] : memref<24x64xf32, #tpu.memory_space<vmem>>, vector<24x64xf32>
    %cst_51 = arith.constant dense<0.000000e+00> : vector<4x64xf32>
    %152 = tpu.matmul %150, %151, %cst_51 {dimension_numbers = #tpu.dot_dimension_numbers<[1], [0], [0], [1], [0, 0, 1, 1], [], []>} : vector<4x24xf32>, vector<24x64xf32>, vector<4x64xf32> -> vector<4x64xf32>
    %153 = vector.extract_strided_slice %0 {offsets = [9, 0], sizes = [1, 64], strides = [1, 1]} : vector<16x128xf32> to vector<1x64xf32>
    %154 = vector.broadcast %153 : vector<1x64xf32> to vector<4x64xf32>
    %155 = arith.addf %152, %154 : vector<4x64xf32>
    %156 = vector.extract_strided_slice %155 {offsets = [0, 0], sizes = [2, 64], strides = [1, 1]} : vector<4x64xf32> to vector<2x64xf32>
    %157 = vector.extract_strided_slice %155 {offsets = [2, 0], sizes = [2, 64], strides = [1, 1]} : vector<4x64xf32> to vector<2x64xf32>
    %158 = arith.addf %156, %157 : vector<2x64xf32>
    %159 = arith.negf %158 : vector<2x64xf32>
    %160 = math.exp %159 : vector<2x64xf32>
    %cst_52 = arith.constant 1.000000e+00 : f32
    %161 = vector.broadcast %cst_52 : f32 to vector<2x64xf32>
    %162 = arith.addf %161, %160 : vector<2x64xf32>
    %163 = arith.divf %161, %162 : vector<2x64xf32>
    %164 = vector.extract_strided_slice %163 {offsets = [0, 0], sizes = [1, 64], strides = [1, 1]} : vector<2x64xf32> to vector<1x64xf32>
    %165 = vector.broadcast %115 : vector<48x1xf32> to vector<48x64xf32>
    %166 = vector.broadcast %164 : vector<1x64xf32> to vector<48x64xf32>
    %167 = arith.mulf %165, %166 : vector<48x64xf32>
    %168 = vector.extract_strided_slice %163 {offsets = [1, 0], sizes = [1, 64], strides = [1, 1]} : vector<2x64xf32> to vector<1x64xf32>
    %169 = vector.broadcast %122 : vector<48x1xf32> to vector<48x64xf32>
    %170 = vector.broadcast %168 : vector<1x64xf32> to vector<48x64xf32>
    %171 = arith.mulf %169, %170 : vector<48x64xf32>
    %172 = arith.addf %167, %171 : vector<48x64xf32>
    %173 = arith.mulf %107, %172 : vector<48x64xf32>
    %cst_53 = arith.constant dense<0xFF800000> : vector<48xf32>
    %174 = vector.multi_reduction <maximumf>, %173, %cst_53 [1] : vector<48x64xf32> to vector<48xf32>
    %175 = vector.shape_cast %174 : vector<48xf32> to vector<48x1xf32>
    %cst_54 = arith.constant dense<0.000000e+00> : vector<48xf32>
    %176 = vector.multi_reduction <add>, %173, %cst_54 [1] : vector<48x64xf32> to vector<48xf32>
    %177 = vector.shape_cast %176 : vector<48xf32> to vector<48x1xf32>
    %cst_55 = arith.constant 6.400000e+01 : f32
    %178 = vector.broadcast %cst_55 : f32 to vector<48x1xf32>
    %179 = arith.divf %177, %178 : vector<48x1xf32>
    %c0_56 = arith.constant 0 : index
    %c0_57 = arith.constant 0 : index
    %180 = vector.load %arg4[%c0_56, %c0_57] : memref<48x96xf32, #tpu.memory_space<vmem>>, vector<48x96xf32>
    %181 = tpu.concatenate %175, %179 in 0 : vector<48x1xf32>, vector<48x1xf32> -> vector<96x1xf32>
    %cst_58 = arith.constant dense<0.000000e+00> : vector<48x1xf32>
    %182 = tpu.matmul %180, %181, %cst_58 {dimension_numbers = #tpu.dot_dimension_numbers<[1], [0], [0], [1], [0, 0, 1, 1], [], []>} : vector<48x96xf32>, vector<96x1xf32>, vector<48x1xf32> -> vector<48x1xf32>
    %183 = vector.broadcast %182 : vector<48x1xf32> to vector<48x64xf32>
    %184 = arith.mulf %183, %173 : vector<48x64xf32>
    %c0_59 = arith.constant 0 : index
    %c0_60 = arith.constant 0 : index
    %185 = vector.load %arg3[%c0_59, %c0_60] : memref<48x48xf32, #tpu.memory_space<vmem>>, vector<48x48xf32>
    %cst_61 = arith.constant dense<0.000000e+00> : vector<48x64xf32>
    %186 = tpu.matmul %185, %184, %cst_61 {dimension_numbers = #tpu.dot_dimension_numbers<[1], [0], [0], [1], [0, 0, 1, 1], [], []>} : vector<48x48xf32>, vector<48x64xf32>, vector<48x64xf32> -> vector<48x64xf32>
    %187 = vector.extract_strided_slice %186 {offsets = [0, 0], sizes = [24, 64], strides = [1, 1]} : vector<48x64xf32> to vector<24x64xf32>
    %188 = vector.extract_strided_slice %186 {offsets = [24, 0], sizes = [24, 64], strides = [1, 1]} : vector<48x64xf32> to vector<24x64xf32>
    %189 = arith.maximumf %187, %188 : vector<24x64xf32>
    %c0_62 = arith.constant 0 : index
    %c0_63 = arith.constant 0 : index
    %190 = vector.load %arg11[%c0_62, %c0_63] : memref<64x1152xf32, #tpu.memory_space<vmem>>, vector<64x1152xf32>
    %cst_64 = arith.constant dense<0.000000e+00> : vector<24x1152xf32>
    %191 = tpu.matmul %189, %190, %cst_64 {dimension_numbers = #tpu.dot_dimension_numbers<[1], [0], [0], [1], [0, 0, 1, 1], [], []>} : vector<24x64xf32>, vector<64x1152xf32>, vector<24x1152xf32> -> vector<24x1152xf32>
    %192 = vector.extract_strided_slice %191 {offsets = [0, 0], sizes = [24, 128], strides = [1, 1]} : vector<24x1152xf32> to vector<24x128xf32>
    %cst_65 = arith.constant 0.000000e+00 : f32
    %193 = vector.broadcast %cst_65 : f32 to vector<4x128xf32>
    %194 = vector.extract_strided_slice %192 {offsets = [0, 0], sizes = [20, 128], strides = [1, 1]} : vector<24x128xf32> to vector<20x128xf32>
    %195 = tpu.concatenate %193, %194 in 0 : vector<4x128xf32>, vector<20x128xf32> -> vector<24x128xf32>
    %c0_66 = arith.constant 0 : index
    %c0_67 = arith.constant 0 : index
    %c0_68 = arith.constant 0 : index
    %196 = vector.load %arg8[%c0_66, %c0_67, %c0_68] : memref<9x24x1xf32, #tpu.memory_space<vmem>>, vector<1x24x1xf32>
    %197 = vector.shape_cast %196 : vector<1x24x1xf32> to vector<24x1xf32>
    %198 = vector.broadcast %197 : vector<24x1xf32> to vector<24x128xf32>
    %199 = arith.mulf %198, %195 : vector<24x128xf32>
    %200 = vector.extract_strided_slice %191 {offsets = [0, 128], sizes = [24, 128], strides = [1, 1]} : vector<24x1152xf32> to vector<24x128xf32>
    %cst_69 = arith.constant 0.000000e+00 : f32
    %201 = vector.broadcast %cst_69 : f32 to vector<3x128xf32>
    %202 = vector.extract_strided_slice %200 {offsets = [0, 0], sizes = [21, 128], strides = [1, 1]} : vector<24x128xf32> to vector<21x128xf32>
    %203 = tpu.concatenate %201, %202 in 0 : vector<3x128xf32>, vector<21x128xf32> -> vector<24x128xf32>
    %c1_70 = arith.constant 1 : index
    %c0_71 = arith.constant 0 : index
    %c0_72 = arith.constant 0 : index
    %204 = vector.load %arg8[%c1_70, %c0_71, %c0_72] : memref<9x24x1xf32, #tpu.memory_space<vmem>>, vector<1x24x1xf32>
    %205 = vector.shape_cast %204 : vector<1x24x1xf32> to vector<24x1xf32>
    %206 = vector.broadcast %205 : vector<24x1xf32> to vector<24x128xf32>
    %207 = arith.mulf %206, %203 : vector<24x128xf32>
    %208 = vector.extract_strided_slice %191 {offsets = [0, 256], sizes = [24, 128], strides = [1, 1]} : vector<24x1152xf32> to vector<24x128xf32>
    %cst_73 = arith.constant 0.000000e+00 : f32
    %209 = vector.broadcast %cst_73 : f32 to vector<2x128xf32>
    %210 = vector.extract_strided_slice %208 {offsets = [0, 0], sizes = [22, 128], strides = [1, 1]} : vector<24x128xf32> to vector<22x128xf32>
    %211 = tpu.concatenate %209, %210 in 0 : vector<2x128xf32>, vector<22x128xf32> -> vector<24x128xf32>
    %c2_74 = arith.constant 2 : index
    %c0_75 = arith.constant 0 : index
    %c0_76 = arith.constant 0 : index
    %212 = vector.load %arg8[%c2_74, %c0_75, %c0_76] : memref<9x24x1xf32, #tpu.memory_space<vmem>>, vector<1x24x1xf32>
    %213 = vector.shape_cast %212 : vector<1x24x1xf32> to vector<24x1xf32>
    %214 = vector.broadcast %213 : vector<24x1xf32> to vector<24x128xf32>
    %215 = arith.mulf %214, %211 : vector<24x128xf32>
    %216 = vector.extract_strided_slice %191 {offsets = [0, 384], sizes = [24, 128], strides = [1, 1]} : vector<24x1152xf32> to vector<24x128xf32>
    %cst_77 = arith.constant 0.000000e+00 : f32
    %217 = vector.broadcast %cst_77 : f32 to vector<1x128xf32>
    %218 = vector.extract_strided_slice %216 {offsets = [0, 0], sizes = [23, 128], strides = [1, 1]} : vector<24x128xf32> to vector<23x128xf32>
    %219 = tpu.concatenate %217, %218 in 0 : vector<1x128xf32>, vector<23x128xf32> -> vector<24x128xf32>
    %c3_78 = arith.constant 3 : index
    %c0_79 = arith.constant 0 : index
    %c0_80 = arith.constant 0 : index
    %220 = vector.load %arg8[%c3_78, %c0_79, %c0_80] : memref<9x24x1xf32, #tpu.memory_space<vmem>>, vector<1x24x1xf32>
    %221 = vector.shape_cast %220 : vector<1x24x1xf32> to vector<24x1xf32>
    %222 = vector.broadcast %221 : vector<24x1xf32> to vector<24x128xf32>
    %223 = arith.mulf %222, %219 : vector<24x128xf32>
    %224 = vector.extract_strided_slice %191 {offsets = [0, 512], sizes = [24, 128], strides = [1, 1]} : vector<24x1152xf32> to vector<24x128xf32>
    %c4_81 = arith.constant 4 : index
    %c0_82 = arith.constant 0 : index
    %c0_83 = arith.constant 0 : index
    %225 = vector.load %arg8[%c4_81, %c0_82, %c0_83] : memref<9x24x1xf32, #tpu.memory_space<vmem>>, vector<1x24x1xf32>
    %226 = vector.shape_cast %225 : vector<1x24x1xf32> to vector<24x1xf32>
    %227 = vector.broadcast %226 : vector<24x1xf32> to vector<24x128xf32>
    %228 = arith.mulf %227, %224 : vector<24x128xf32>
    %229 = vector.extract_strided_slice %191 {offsets = [0, 640], sizes = [24, 128], strides = [1, 1]} : vector<24x1152xf32> to vector<24x128xf32>
    %cst_84 = arith.constant 0.000000e+00 : f32
    %230 = vector.broadcast %cst_84 : f32 to vector<1x128xf32>
    %231 = vector.extract_strided_slice %229 {offsets = [1, 0], sizes = [23, 128], strides = [1, 1]} : vector<24x128xf32> to vector<23x128xf32>
    %232 = tpu.concatenate %231, %230 in 0 : vector<23x128xf32>, vector<1x128xf32> -> vector<24x128xf32>
    %c5_85 = arith.constant 5 : index
    %c0_86 = arith.constant 0 : index
    %c0_87 = arith.constant 0 : index
    %233 = vector.load %arg8[%c5_85, %c0_86, %c0_87] : memref<9x24x1xf32, #tpu.memory_space<vmem>>, vector<1x24x1xf32>
    %234 = vector.shape_cast %233 : vector<1x24x1xf32> to vector<24x1xf32>
    %235 = vector.broadcast %234 : vector<24x1xf32> to vector<24x128xf32>
    %236 = arith.mulf %235, %232 : vector<24x128xf32>
    %237 = vector.extract_strided_slice %191 {offsets = [0, 768], sizes = [24, 128], strides = [1, 1]} : vector<24x1152xf32> to vector<24x128xf32>
    %cst_88 = arith.constant 0.000000e+00 : f32
    %238 = vector.broadcast %cst_88 : f32 to vector<2x128xf32>
    %239 = vector.extract_strided_slice %237 {offsets = [2, 0], sizes = [22, 128], strides = [1, 1]} : vector<24x128xf32> to vector<22x128xf32>
    %240 = tpu.concatenate %239, %238 in 0 : vector<22x128xf32>, vector<2x128xf32> -> vector<24x128xf32>
    %c6_89 = arith.constant 6 : index
    %c0_90 = arith.constant 0 : index
    %c0_91 = arith.constant 0 : index
    %241 = vector.load %arg8[%c6_89, %c0_90, %c0_91] : memref<9x24x1xf32, #tpu.memory_space<vmem>>, vector<1x24x1xf32>
    %242 = vector.shape_cast %241 : vector<1x24x1xf32> to vector<24x1xf32>
    %243 = vector.broadcast %242 : vector<24x1xf32> to vector<24x128xf32>
    %244 = arith.mulf %243, %240 : vector<24x128xf32>
    %245 = vector.extract_strided_slice %191 {offsets = [0, 896], sizes = [24, 128], strides = [1, 1]} : vector<24x1152xf32> to vector<24x128xf32>
    %cst_92 = arith.constant 0.000000e+00 : f32
    %246 = vector.broadcast %cst_92 : f32 to vector<3x128xf32>
    %247 = vector.extract_strided_slice %245 {offsets = [3, 0], sizes = [21, 128], strides = [1, 1]} : vector<24x128xf32> to vector<21x128xf32>
    %248 = tpu.concatenate %247, %246 in 0 : vector<21x128xf32>, vector<3x128xf32> -> vector<24x128xf32>
    %c7_93 = arith.constant 7 : index
    %c0_94 = arith.constant 0 : index
    %c0_95 = arith.constant 0 : index
    %249 = vector.load %arg8[%c7_93, %c0_94, %c0_95] : memref<9x24x1xf32, #tpu.memory_space<vmem>>, vector<1x24x1xf32>
    %250 = vector.shape_cast %249 : vector<1x24x1xf32> to vector<24x1xf32>
    %251 = vector.broadcast %250 : vector<24x1xf32> to vector<24x128xf32>
    %252 = arith.mulf %251, %248 : vector<24x128xf32>
    %253 = vector.extract_strided_slice %191 {offsets = [0, 1024], sizes = [24, 128], strides = [1, 1]} : vector<24x1152xf32> to vector<24x128xf32>
    %cst_96 = arith.constant 0.000000e+00 : f32
    %254 = vector.broadcast %cst_96 : f32 to vector<4x128xf32>
    %255 = vector.extract_strided_slice %253 {offsets = [4, 0], sizes = [20, 128], strides = [1, 1]} : vector<24x128xf32> to vector<20x128xf32>
    %256 = tpu.concatenate %255, %254 in 0 : vector<20x128xf32>, vector<4x128xf32> -> vector<24x128xf32>
    %c8_97 = arith.constant 8 : index
    %c0_98 = arith.constant 0 : index
    %c0_99 = arith.constant 0 : index
    %257 = vector.load %arg8[%c8_97, %c0_98, %c0_99] : memref<9x24x1xf32, #tpu.memory_space<vmem>>, vector<1x24x1xf32>
    %258 = vector.shape_cast %257 : vector<1x24x1xf32> to vector<24x1xf32>
    %259 = vector.broadcast %258 : vector<24x1xf32> to vector<24x128xf32>
    %260 = arith.mulf %259, %256 : vector<24x128xf32>
    %261 = arith.addf %199, %207 : vector<24x128xf32>
    %262 = arith.addf %215, %223 : vector<24x128xf32>
    %263 = arith.addf %228, %236 : vector<24x128xf32>
    %264 = arith.addf %244, %252 : vector<24x128xf32>
    %265 = arith.addf %261, %262 : vector<24x128xf32>
    %266 = arith.addf %263, %264 : vector<24x128xf32>
    %267 = arith.addf %265, %266 : vector<24x128xf32>
    %268 = arith.addf %267, %260 : vector<24x128xf32>
    %269 = vector.extract_strided_slice %268 {offsets = [0, 0], sizes = [24, 64], strides = [1, 1]} : vector<24x128xf32> to vector<24x64xf32>
    %cst_100 = arith.constant dense<0.000000e+00> : vector<64xf32>
    %270 = vector.multi_reduction <add>, %269, %cst_100 [0] : vector<24x64xf32> to vector<64xf32>
    %271 = vector.shape_cast %270 : vector<64xf32> to vector<1x64xf32>
    %cst_101 = arith.constant 2.400000e+01 : f32
    %272 = vector.broadcast %cst_101 : f32 to vector<1x64xf32>
    %273 = arith.divf %271, %272 : vector<1x64xf32>
    %274 = vector.broadcast %273 : vector<1x64xf32> to vector<24x64xf32>
    %275 = arith.subf %269, %274 : vector<24x64xf32>
    %276 = arith.mulf %275, %275 : vector<24x64xf32>
    %cst_102 = arith.constant dense<0.000000e+00> : vector<64xf32>
    %277 = vector.multi_reduction <add>, %276, %cst_102 [0] : vector<24x64xf32> to vector<64xf32>
    %278 = vector.shape_cast %277 : vector<64xf32> to vector<1x64xf32>
    %cst_103 = arith.constant 2.400000e+01 : f32
    %279 = vector.broadcast %cst_103 : f32 to vector<1x64xf32>
    %280 = arith.divf %278, %279 : vector<1x64xf32>
    %281 = vector.broadcast %273 : vector<1x64xf32> to vector<24x64xf32>
    %282 = arith.subf %269, %281 : vector<24x64xf32>
    %cst_104 = arith.constant 9.99999974E-6 : f32
    %283 = vector.broadcast %cst_104 : f32 to vector<1x64xf32>
    %284 = arith.addf %280, %283 : vector<1x64xf32>
    %285 = math.rsqrt %284 : vector<1x64xf32>
    %286 = vector.broadcast %285 : vector<1x64xf32> to vector<24x64xf32>
    %287 = arith.mulf %282, %286 : vector<24x64xf32>
    %288 = vector.extract_strided_slice %0 {offsets = [1, 0], sizes = [1, 64], strides = [1, 1]} : vector<16x128xf32> to vector<1x64xf32>
    %289 = vector.broadcast %288 : vector<1x64xf32> to vector<24x64xf32>
    %290 = arith.mulf %287, %289 : vector<24x64xf32>
    %291 = vector.extract_strided_slice %0 {offsets = [4, 0], sizes = [1, 64], strides = [1, 1]} : vector<16x128xf32> to vector<1x64xf32>
    %292 = vector.broadcast %291 : vector<1x64xf32> to vector<24x64xf32>
    %293 = arith.addf %290, %292 : vector<24x64xf32>
    %cst_105 = arith.constant 0.000000e+00 : f32
    %294 = vector.broadcast %cst_105 : f32 to vector<24x64xf32>
    %295 = arith.maximumf %293, %294 : vector<24x64xf32>
    %296 = tpu.iota {dimensions = array<i32: 0>} : vector<24x1xi32>
    %c0_i32_106 = arith.constant 0 : i32
    %297 = vector.broadcast %c0_i32_106 : i32 to vector<24x1xi32>
    %298 = arith.cmpi sge, %296, %297 : vector<24x1xi32>
    %c12_i32 = arith.constant 12 : i32
    %299 = vector.broadcast %c12_i32 : i32 to vector<24x1xi32>
    %300 = arith.cmpi slt, %296, %299 : vector<24x1xi32>
    %301 = arith.andi %298, %300 : vector<24x1xi1>
    %302 = arith.extui %301 : vector<24x1xi1> to vector<24x1xi32>
    %303 = arith.sitofp %302 : vector<24x1xi32> to vector<24x1xf32>
    %c12_i32_107 = arith.constant 12 : i32
    %304 = vector.broadcast %c12_i32_107 : i32 to vector<24x1xi32>
    %305 = arith.cmpi sge, %296, %304 : vector<24x1xi32>
    %c24_i32_108 = arith.constant 24 : i32
    %306 = vector.broadcast %c24_i32_108 : i32 to vector<24x1xi32>
    %307 = arith.cmpi slt, %296, %306 : vector<24x1xi32>
    %308 = arith.andi %305, %307 : vector<24x1xi1>
    %309 = arith.extui %308 : vector<24x1xi1> to vector<24x1xi32>
    %310 = arith.sitofp %309 : vector<24x1xi32> to vector<24x1xf32>
    %311 = vector.broadcast %303 : vector<24x1xf32> to vector<24x64xf32>
    %312 = arith.mulf %295, %311 : vector<24x64xf32>
    %cst_109 = arith.constant dense<0xFF800000> : vector<64xf32>
    %313 = vector.multi_reduction <maximumf>, %312, %cst_109 [0] : vector<24x64xf32> to vector<64xf32>
    %314 = vector.shape_cast %313 : vector<64xf32> to vector<1x64xf32>
    %315 = vector.broadcast %310 : vector<24x1xf32> to vector<24x64xf32>
    %316 = arith.mulf %295, %315 : vector<24x64xf32>
    %cst_110 = arith.constant dense<0xFF800000> : vector<64xf32>
    %317 = vector.multi_reduction <maximumf>, %316, %cst_110 [0] : vector<24x64xf32> to vector<64xf32>
    %318 = vector.shape_cast %317 : vector<64xf32> to vector<1x64xf32>
    %319 = vector.broadcast %303 : vector<24x1xf32> to vector<24x64xf32>
    %320 = arith.mulf %295, %319 : vector<24x64xf32>
    %cst_111 = arith.constant dense<0.000000e+00> : vector<64xf32>
    %321 = vector.multi_reduction <add>, %320, %cst_111 [0] : vector<24x64xf32> to vector<64xf32>
    %322 = vector.shape_cast %321 : vector<64xf32> to vector<1x64xf32>
    %cst_112 = arith.constant 0.0833333358 : f32
    %323 = vector.broadcast %cst_112 : f32 to vector<1x64xf32>
    %324 = arith.mulf %322, %323 : vector<1x64xf32>
    %325 = vector.broadcast %310 : vector<24x1xf32> to vector<24x64xf32>
    %326 = arith.mulf %295, %325 : vector<24x64xf32>
    %cst_113 = arith.constant dense<0.000000e+00> : vector<64xf32>
    %327 = vector.multi_reduction <add>, %326, %cst_113 [0] : vector<24x64xf32> to vector<64xf32>
    %328 = vector.shape_cast %327 : vector<64xf32> to vector<1x64xf32>
    %cst_114 = arith.constant 0.0833333358 : f32
    %329 = vector.broadcast %cst_114 : f32 to vector<1x64xf32>
    %330 = arith.mulf %328, %329 : vector<1x64xf32>
    %331 = tpu.concatenate %314, %318, %324, %330 in 0 : vector<1x64xf32>, vector<1x64xf32>, vector<1x64xf32>, vector<1x64xf32> -> vector<4x64xf32>
    %c0_115 = arith.constant 0 : index
    %c0_116 = arith.constant 0 : index
    %332 = vector.load %arg6[%c0_115, %c0_116] : memref<64x24xf32, #tpu.memory_space<vmem>>, vector<64x24xf32>
    %cst_117 = arith.constant dense<0.000000e+00> : vector<4x24xf32>
    %333 = tpu.matmul %331, %332, %cst_117 {dimension_numbers = #tpu.dot_dimension_numbers<[1], [0], [0], [1], [0, 0, 1, 1], [], []>} : vector<4x64xf32>, vector<64x24xf32>, vector<4x24xf32> -> vector<4x24xf32>
    %334 = vector.extract_strided_slice %0 {offsets = [7, 0], sizes = [1, 24], strides = [1, 1]} : vector<16x128xf32> to vector<1x24xf32>
    %335 = vector.broadcast %334 : vector<1x24xf32> to vector<4x24xf32>
    %336 = arith.addf %333, %335 : vector<4x24xf32>
    %cst_118 = arith.constant 0.000000e+00 : f32
    %337 = vector.broadcast %cst_118 : f32 to vector<4x24xf32>
    %338 = arith.maximumf %336, %337 : vector<4x24xf32>
    %c0_119 = arith.constant 0 : index
    %c0_120 = arith.constant 0 : index
    %339 = vector.load %arg7[%c0_119, %c0_120] : memref<24x64xf32, #tpu.memory_space<vmem>>, vector<24x64xf32>
    %cst_121 = arith.constant dense<0.000000e+00> : vector<4x64xf32>
    %340 = tpu.matmul %338, %339, %cst_121 {dimension_numbers = #tpu.dot_dimension_numbers<[1], [0], [0], [1], [0, 0, 1, 1], [], []>} : vector<4x24xf32>, vector<24x64xf32>, vector<4x64xf32> -> vector<4x64xf32>
    %341 = vector.extract_strided_slice %0 {offsets = [10, 0], sizes = [1, 64], strides = [1, 1]} : vector<16x128xf32> to vector<1x64xf32>
    %342 = vector.broadcast %341 : vector<1x64xf32> to vector<4x64xf32>
    %343 = arith.addf %340, %342 : vector<4x64xf32>
    %344 = vector.extract_strided_slice %343 {offsets = [0, 0], sizes = [2, 64], strides = [1, 1]} : vector<4x64xf32> to vector<2x64xf32>
    %345 = vector.extract_strided_slice %343 {offsets = [2, 0], sizes = [2, 64], strides = [1, 1]} : vector<4x64xf32> to vector<2x64xf32>
    %346 = arith.addf %344, %345 : vector<2x64xf32>
    %347 = arith.negf %346 : vector<2x64xf32>
    %348 = math.exp %347 : vector<2x64xf32>
    %cst_122 = arith.constant 1.000000e+00 : f32
    %349 = vector.broadcast %cst_122 : f32 to vector<2x64xf32>
    %350 = arith.addf %349, %348 : vector<2x64xf32>
    %351 = arith.divf %349, %350 : vector<2x64xf32>
    %352 = vector.extract_strided_slice %351 {offsets = [0, 0], sizes = [1, 64], strides = [1, 1]} : vector<2x64xf32> to vector<1x64xf32>
    %353 = vector.broadcast %303 : vector<24x1xf32> to vector<24x64xf32>
    %354 = vector.broadcast %352 : vector<1x64xf32> to vector<24x64xf32>
    %355 = arith.mulf %353, %354 : vector<24x64xf32>
    %356 = vector.extract_strided_slice %351 {offsets = [1, 0], sizes = [1, 64], strides = [1, 1]} : vector<2x64xf32> to vector<1x64xf32>
    %357 = vector.broadcast %310 : vector<24x1xf32> to vector<24x64xf32>
    %358 = vector.broadcast %356 : vector<1x64xf32> to vector<24x64xf32>
    %359 = arith.mulf %357, %358 : vector<24x64xf32>
    %360 = arith.addf %355, %359 : vector<24x64xf32>
    %361 = arith.mulf %295, %360 : vector<24x64xf32>
    %cst_123 = arith.constant dense<0xFF800000> : vector<24xf32>
    %362 = vector.multi_reduction <maximumf>, %361, %cst_123 [1] : vector<24x64xf32> to vector<24xf32>
    %363 = vector.shape_cast %362 : vector<24xf32> to vector<24x1xf32>
    %cst_124 = arith.constant dense<0.000000e+00> : vector<24xf32>
    %364 = vector.multi_reduction <add>, %361, %cst_124 [1] : vector<24x64xf32> to vector<24xf32>
    %365 = vector.shape_cast %364 : vector<24xf32> to vector<24x1xf32>
    %cst_125 = arith.constant 6.400000e+01 : f32
    %366 = vector.broadcast %cst_125 : f32 to vector<24x1xf32>
    %367 = arith.divf %365, %366 : vector<24x1xf32>
    %c0_126 = arith.constant 0 : index
    %c0_127 = arith.constant 0 : index
    %368 = vector.load %arg10[%c0_126, %c0_127] : memref<24x48xf32, #tpu.memory_space<vmem>>, vector<24x48xf32>
    %369 = tpu.concatenate %363, %367 in 0 : vector<24x1xf32>, vector<24x1xf32> -> vector<48x1xf32>
    %cst_128 = arith.constant dense<0.000000e+00> : vector<24x1xf32>
    %370 = tpu.matmul %368, %369, %cst_128 {dimension_numbers = #tpu.dot_dimension_numbers<[1], [0], [0], [1], [0, 0, 1, 1], [], []>} : vector<24x48xf32>, vector<48x1xf32>, vector<24x1xf32> -> vector<24x1xf32>
    %371 = vector.broadcast %370 : vector<24x1xf32> to vector<24x64xf32>
    %372 = arith.mulf %371, %361 : vector<24x64xf32>
    %c0_129 = arith.constant 0 : index
    %c0_130 = arith.constant 0 : index
    %373 = vector.load %arg9[%c0_129, %c0_130] : memref<24x24xf32, #tpu.memory_space<vmem>>, vector<24x24xf32>
    %cst_131 = arith.constant dense<0.000000e+00> : vector<24x64xf32>
    %374 = tpu.matmul %373, %372, %cst_131 {dimension_numbers = #tpu.dot_dimension_numbers<[1], [0], [0], [1], [0, 0, 1, 1], [], []>} : vector<24x24xf32>, vector<24x64xf32>, vector<24x64xf32> -> vector<24x64xf32>
    %375 = vector.extract_strided_slice %374 {offsets = [0, 0], sizes = [12, 64], strides = [1, 1]} : vector<24x64xf32> to vector<12x64xf32>
    %376 = vector.extract_strided_slice %374 {offsets = [12, 0], sizes = [12, 64], strides = [1, 1]} : vector<24x64xf32> to vector<12x64xf32>
    %377 = arith.maximumf %375, %376 : vector<12x64xf32>
    %c0_132 = arith.constant 0 : index
    %c0_133 = arith.constant 0 : index
    %378 = vector.load %arg16[%c0_132, %c0_133] : memref<64x1152xf32, #tpu.memory_space<vmem>>, vector<64x1152xf32>
    %cst_134 = arith.constant dense<0.000000e+00> : vector<12x1152xf32>
    %379 = tpu.matmul %377, %378, %cst_134 {dimension_numbers = #tpu.dot_dimension_numbers<[1], [0], [0], [1], [0, 0, 1, 1], [], []>} : vector<12x64xf32>, vector<64x1152xf32>, vector<12x1152xf32> -> vector<12x1152xf32>
    %380 = vector.extract_strided_slice %379 {offsets = [0, 0], sizes = [12, 128], strides = [1, 1]} : vector<12x1152xf32> to vector<12x128xf32>
    %cst_135 = arith.constant 0.000000e+00 : f32
    %381 = vector.broadcast %cst_135 : f32 to vector<4x128xf32>
    %382 = vector.extract_strided_slice %380 {offsets = [0, 0], sizes = [8, 128], strides = [1, 1]} : vector<12x128xf32> to vector<8x128xf32>
    %383 = tpu.concatenate %381, %382 in 0 : vector<4x128xf32>, vector<8x128xf32> -> vector<12x128xf32>
    %c0_136 = arith.constant 0 : index
    %c0_137 = arith.constant 0 : index
    %c0_138 = arith.constant 0 : index
    %384 = vector.load %arg14[%c0_136, %c0_137, %c0_138] : memref<9x12x1xf32, #tpu.memory_space<vmem>>, vector<1x12x1xf32>
    %385 = vector.shape_cast %384 : vector<1x12x1xf32> to vector<12x1xf32>
    %386 = vector.broadcast %385 : vector<12x1xf32> to vector<12x128xf32>
    %387 = arith.mulf %386, %383 : vector<12x128xf32>
    %388 = vector.extract_strided_slice %379 {offsets = [0, 128], sizes = [12, 128], strides = [1, 1]} : vector<12x1152xf32> to vector<12x128xf32>
    %cst_139 = arith.constant 0.000000e+00 : f32
    %389 = vector.broadcast %cst_139 : f32 to vector<3x128xf32>
    %390 = vector.extract_strided_slice %388 {offsets = [0, 0], sizes = [9, 128], strides = [1, 1]} : vector<12x128xf32> to vector<9x128xf32>
    %391 = tpu.concatenate %389, %390 in 0 : vector<3x128xf32>, vector<9x128xf32> -> vector<12x128xf32>
    %c1_140 = arith.constant 1 : index
    %c0_141 = arith.constant 0 : index
    %c0_142 = arith.constant 0 : index
    %392 = vector.load %arg14[%c1_140, %c0_141, %c0_142] : memref<9x12x1xf32, #tpu.memory_space<vmem>>, vector<1x12x1xf32>
    %393 = vector.shape_cast %392 : vector<1x12x1xf32> to vector<12x1xf32>
    %394 = vector.broadcast %393 : vector<12x1xf32> to vector<12x128xf32>
    %395 = arith.mulf %394, %391 : vector<12x128xf32>
    %396 = vector.extract_strided_slice %379 {offsets = [0, 256], sizes = [12, 128], strides = [1, 1]} : vector<12x1152xf32> to vector<12x128xf32>
    %cst_143 = arith.constant 0.000000e+00 : f32
    %397 = vector.broadcast %cst_143 : f32 to vector<2x128xf32>
    %398 = vector.extract_strided_slice %396 {offsets = [0, 0], sizes = [10, 128], strides = [1, 1]} : vector<12x128xf32> to vector<10x128xf32>
    %399 = tpu.concatenate %397, %398 in 0 : vector<2x128xf32>, vector<10x128xf32> -> vector<12x128xf32>
    %c2_144 = arith.constant 2 : index
    %c0_145 = arith.constant 0 : index
    %c0_146 = arith.constant 0 : index
    %400 = vector.load %arg14[%c2_144, %c0_145, %c0_146] : memref<9x12x1xf32, #tpu.memory_space<vmem>>, vector<1x12x1xf32>
    %401 = vector.shape_cast %400 : vector<1x12x1xf32> to vector<12x1xf32>
    %402 = vector.broadcast %401 : vector<12x1xf32> to vector<12x128xf32>
    %403 = arith.mulf %402, %399 : vector<12x128xf32>
    %404 = vector.extract_strided_slice %379 {offsets = [0, 384], sizes = [12, 128], strides = [1, 1]} : vector<12x1152xf32> to vector<12x128xf32>
    %cst_147 = arith.constant 0.000000e+00 : f32
    %405 = vector.broadcast %cst_147 : f32 to vector<1x128xf32>
    %406 = vector.extract_strided_slice %404 {offsets = [0, 0], sizes = [11, 128], strides = [1, 1]} : vector<12x128xf32> to vector<11x128xf32>
    %407 = tpu.concatenate %405, %406 in 0 : vector<1x128xf32>, vector<11x128xf32> -> vector<12x128xf32>
    %c3_148 = arith.constant 3 : index
    %c0_149 = arith.constant 0 : index
    %c0_150 = arith.constant 0 : index
    %408 = vector.load %arg14[%c3_148, %c0_149, %c0_150] : memref<9x12x1xf32, #tpu.memory_space<vmem>>, vector<1x12x1xf32>
    %409 = vector.shape_cast %408 : vector<1x12x1xf32> to vector<12x1xf32>
    %410 = vector.broadcast %409 : vector<12x1xf32> to vector<12x128xf32>
    %411 = arith.mulf %410, %407 : vector<12x128xf32>
    %412 = vector.extract_strided_slice %379 {offsets = [0, 512], sizes = [12, 128], strides = [1, 1]} : vector<12x1152xf32> to vector<12x128xf32>
    %c4_151 = arith.constant 4 : index
    %c0_152 = arith.constant 0 : index
    %c0_153 = arith.constant 0 : index
    %413 = vector.load %arg14[%c4_151, %c0_152, %c0_153] : memref<9x12x1xf32, #tpu.memory_space<vmem>>, vector<1x12x1xf32>
    %414 = vector.shape_cast %413 : vector<1x12x1xf32> to vector<12x1xf32>
    %415 = vector.broadcast %414 : vector<12x1xf32> to vector<12x128xf32>
    %416 = arith.mulf %415, %412 : vector<12x128xf32>
    %417 = vector.extract_strided_slice %379 {offsets = [0, 640], sizes = [12, 128], strides = [1, 1]} : vector<12x1152xf32> to vector<12x128xf32>
    %cst_154 = arith.constant 0.000000e+00 : f32
    %418 = vector.broadcast %cst_154 : f32 to vector<1x128xf32>
    %419 = vector.extract_strided_slice %417 {offsets = [1, 0], sizes = [11, 128], strides = [1, 1]} : vector<12x128xf32> to vector<11x128xf32>
    %420 = tpu.concatenate %419, %418 in 0 : vector<11x128xf32>, vector<1x128xf32> -> vector<12x128xf32>
    %c5_155 = arith.constant 5 : index
    %c0_156 = arith.constant 0 : index
    %c0_157 = arith.constant 0 : index
    %421 = vector.load %arg14[%c5_155, %c0_156, %c0_157] : memref<9x12x1xf32, #tpu.memory_space<vmem>>, vector<1x12x1xf32>
    %422 = vector.shape_cast %421 : vector<1x12x1xf32> to vector<12x1xf32>
    %423 = vector.broadcast %422 : vector<12x1xf32> to vector<12x128xf32>
    %424 = arith.mulf %423, %420 : vector<12x128xf32>
    %425 = vector.extract_strided_slice %379 {offsets = [0, 768], sizes = [12, 128], strides = [1, 1]} : vector<12x1152xf32> to vector<12x128xf32>
    %cst_158 = arith.constant 0.000000e+00 : f32
    %426 = vector.broadcast %cst_158 : f32 to vector<2x128xf32>
    %427 = vector.extract_strided_slice %425 {offsets = [2, 0], sizes = [10, 128], strides = [1, 1]} : vector<12x128xf32> to vector<10x128xf32>
    %428 = tpu.concatenate %427, %426 in 0 : vector<10x128xf32>, vector<2x128xf32> -> vector<12x128xf32>
    %c6_159 = arith.constant 6 : index
    %c0_160 = arith.constant 0 : index
    %c0_161 = arith.constant 0 : index
    %429 = vector.load %arg14[%c6_159, %c0_160, %c0_161] : memref<9x12x1xf32, #tpu.memory_space<vmem>>, vector<1x12x1xf32>
    %430 = vector.shape_cast %429 : vector<1x12x1xf32> to vector<12x1xf32>
    %431 = vector.broadcast %430 : vector<12x1xf32> to vector<12x128xf32>
    %432 = arith.mulf %431, %428 : vector<12x128xf32>
    %433 = vector.extract_strided_slice %379 {offsets = [0, 896], sizes = [12, 128], strides = [1, 1]} : vector<12x1152xf32> to vector<12x128xf32>
    %cst_162 = arith.constant 0.000000e+00 : f32
    %434 = vector.broadcast %cst_162 : f32 to vector<3x128xf32>
    %435 = vector.extract_strided_slice %433 {offsets = [3, 0], sizes = [9, 128], strides = [1, 1]} : vector<12x128xf32> to vector<9x128xf32>
    %436 = tpu.concatenate %435, %434 in 0 : vector<9x128xf32>, vector<3x128xf32> -> vector<12x128xf32>
    %c7_163 = arith.constant 7 : index
    %c0_164 = arith.constant 0 : index
    %c0_165 = arith.constant 0 : index
    %437 = vector.load %arg14[%c7_163, %c0_164, %c0_165] : memref<9x12x1xf32, #tpu.memory_space<vmem>>, vector<1x12x1xf32>
    %438 = vector.shape_cast %437 : vector<1x12x1xf32> to vector<12x1xf32>
    %439 = vector.broadcast %438 : vector<12x1xf32> to vector<12x128xf32>
    %440 = arith.mulf %439, %436 : vector<12x128xf32>
    %441 = vector.extract_strided_slice %379 {offsets = [0, 1024], sizes = [12, 128], strides = [1, 1]} : vector<12x1152xf32> to vector<12x128xf32>
    %cst_166 = arith.constant 0.000000e+00 : f32
    %442 = vector.broadcast %cst_166 : f32 to vector<4x128xf32>
    %443 = vector.extract_strided_slice %441 {offsets = [4, 0], sizes = [8, 128], strides = [1, 1]} : vector<12x128xf32> to vector<8x128xf32>
    %444 = tpu.concatenate %443, %442 in 0 : vector<8x128xf32>, vector<4x128xf32> -> vector<12x128xf32>
    %c8_167 = arith.constant 8 : index
    %c0_168 = arith.constant 0 : index
    %c0_169 = arith.constant 0 : index
    %445 = vector.load %arg14[%c8_167, %c0_168, %c0_169] : memref<9x12x1xf32, #tpu.memory_space<vmem>>, vector<1x12x1xf32>
    %446 = vector.shape_cast %445 : vector<1x12x1xf32> to vector<12x1xf32>
    %447 = vector.broadcast %446 : vector<12x1xf32> to vector<12x128xf32>
    %448 = arith.mulf %447, %444 : vector<12x128xf32>
    %449 = arith.addf %387, %395 : vector<12x128xf32>
    %450 = arith.addf %403, %411 : vector<12x128xf32>
    %451 = arith.addf %416, %424 : vector<12x128xf32>
    %452 = arith.addf %432, %440 : vector<12x128xf32>
    %453 = arith.addf %449, %450 : vector<12x128xf32>
    %454 = arith.addf %451, %452 : vector<12x128xf32>
    %455 = arith.addf %453, %454 : vector<12x128xf32>
    %456 = arith.addf %455, %448 : vector<12x128xf32>
    %457 = vector.extract_strided_slice %456 {offsets = [0, 0], sizes = [12, 64], strides = [1, 1]} : vector<12x128xf32> to vector<12x64xf32>
    %cst_170 = arith.constant dense<0.000000e+00> : vector<64xf32>
    %458 = vector.multi_reduction <add>, %457, %cst_170 [0] : vector<12x64xf32> to vector<64xf32>
    %459 = vector.shape_cast %458 : vector<64xf32> to vector<1x64xf32>
    %cst_171 = arith.constant 1.200000e+01 : f32
    %460 = vector.broadcast %cst_171 : f32 to vector<1x64xf32>
    %461 = arith.divf %459, %460 : vector<1x64xf32>
    %462 = vector.broadcast %461 : vector<1x64xf32> to vector<12x64xf32>
    %463 = arith.subf %457, %462 : vector<12x64xf32>
    %464 = arith.mulf %463, %463 : vector<12x64xf32>
    %cst_172 = arith.constant dense<0.000000e+00> : vector<64xf32>
    %465 = vector.multi_reduction <add>, %464, %cst_172 [0] : vector<12x64xf32> to vector<64xf32>
    %466 = vector.shape_cast %465 : vector<64xf32> to vector<1x64xf32>
    %cst_173 = arith.constant 1.200000e+01 : f32
    %467 = vector.broadcast %cst_173 : f32 to vector<1x64xf32>
    %468 = arith.divf %466, %467 : vector<1x64xf32>
    %469 = vector.broadcast %461 : vector<1x64xf32> to vector<12x64xf32>
    %470 = arith.subf %457, %469 : vector<12x64xf32>
    %cst_174 = arith.constant 9.99999974E-6 : f32
    %471 = vector.broadcast %cst_174 : f32 to vector<1x64xf32>
    %472 = arith.addf %468, %471 : vector<1x64xf32>
    %473 = math.rsqrt %472 : vector<1x64xf32>
    %474 = vector.broadcast %473 : vector<1x64xf32> to vector<12x64xf32>
    %475 = arith.mulf %470, %474 : vector<12x64xf32>
    %476 = vector.extract_strided_slice %0 {offsets = [2, 0], sizes = [1, 64], strides = [1, 1]} : vector<16x128xf32> to vector<1x64xf32>
    %477 = vector.broadcast %476 : vector<1x64xf32> to vector<12x64xf32>
    %478 = arith.mulf %475, %477 : vector<12x64xf32>
    %479 = vector.extract_strided_slice %0 {offsets = [5, 0], sizes = [1, 64], strides = [1, 1]} : vector<16x128xf32> to vector<1x64xf32>
    %480 = vector.broadcast %479 : vector<1x64xf32> to vector<12x64xf32>
    %481 = arith.addf %478, %480 : vector<12x64xf32>
    %cst_175 = arith.constant 0.000000e+00 : f32
    %482 = vector.broadcast %cst_175 : f32 to vector<12x64xf32>
    %483 = arith.maximumf %481, %482 : vector<12x64xf32>
    %484 = tpu.iota {dimensions = array<i32: 0>} : vector<12x1xi32>
    %c0_i32_176 = arith.constant 0 : i32
    %485 = vector.broadcast %c0_i32_176 : i32 to vector<12x1xi32>
    %486 = arith.cmpi sge, %484, %485 : vector<12x1xi32>
    %c6_i32 = arith.constant 6 : i32
    %487 = vector.broadcast %c6_i32 : i32 to vector<12x1xi32>
    %488 = arith.cmpi slt, %484, %487 : vector<12x1xi32>
    %489 = arith.andi %486, %488 : vector<12x1xi1>
    %490 = arith.extui %489 : vector<12x1xi1> to vector<12x1xi32>
    %491 = arith.sitofp %490 : vector<12x1xi32> to vector<12x1xf32>
    %c6_i32_177 = arith.constant 6 : i32
    %492 = vector.broadcast %c6_i32_177 : i32 to vector<12x1xi32>
    %493 = arith.cmpi sge, %484, %492 : vector<12x1xi32>
    %c12_i32_178 = arith.constant 12 : i32
    %494 = vector.broadcast %c12_i32_178 : i32 to vector<12x1xi32>
    %495 = arith.cmpi slt, %484, %494 : vector<12x1xi32>
    %496 = arith.andi %493, %495 : vector<12x1xi1>
    %497 = arith.extui %496 : vector<12x1xi1> to vector<12x1xi32>
    %498 = arith.sitofp %497 : vector<12x1xi32> to vector<12x1xf32>
    %499 = vector.broadcast %491 : vector<12x1xf32> to vector<12x64xf32>
    %500 = arith.mulf %483, %499 : vector<12x64xf32>
    %cst_179 = arith.constant dense<0xFF800000> : vector<64xf32>
    %501 = vector.multi_reduction <maximumf>, %500, %cst_179 [0] : vector<12x64xf32> to vector<64xf32>
    %502 = vector.shape_cast %501 : vector<64xf32> to vector<1x64xf32>
    %503 = vector.broadcast %498 : vector<12x1xf32> to vector<12x64xf32>
    %504 = arith.mulf %483, %503 : vector<12x64xf32>
    %cst_180 = arith.constant dense<0xFF800000> : vector<64xf32>
    %505 = vector.multi_reduction <maximumf>, %504, %cst_180 [0] : vector<12x64xf32> to vector<64xf32>
    %506 = vector.shape_cast %505 : vector<64xf32> to vector<1x64xf32>
    %507 = vector.broadcast %491 : vector<12x1xf32> to vector<12x64xf32>
    %508 = arith.mulf %483, %507 : vector<12x64xf32>
    %cst_181 = arith.constant dense<0.000000e+00> : vector<64xf32>
    %509 = vector.multi_reduction <add>, %508, %cst_181 [0] : vector<12x64xf32> to vector<64xf32>
    %510 = vector.shape_cast %509 : vector<64xf32> to vector<1x64xf32>
    %cst_182 = arith.constant 0.166666672 : f32
    %511 = vector.broadcast %cst_182 : f32 to vector<1x64xf32>
    %512 = arith.mulf %510, %511 : vector<1x64xf32>
    %513 = vector.broadcast %498 : vector<12x1xf32> to vector<12x64xf32>
    %514 = arith.mulf %483, %513 : vector<12x64xf32>
    %cst_183 = arith.constant dense<0.000000e+00> : vector<64xf32>
    %515 = vector.multi_reduction <add>, %514, %cst_183 [0] : vector<12x64xf32> to vector<64xf32>
    %516 = vector.shape_cast %515 : vector<64xf32> to vector<1x64xf32>
    %cst_184 = arith.constant 0.166666672 : f32
    %517 = vector.broadcast %cst_184 : f32 to vector<1x64xf32>
    %518 = arith.mulf %516, %517 : vector<1x64xf32>
    %519 = tpu.concatenate %502, %506, %512, %518 in 0 : vector<1x64xf32>, vector<1x64xf32>, vector<1x64xf32>, vector<1x64xf32> -> vector<4x64xf32>
    %c0_185 = arith.constant 0 : index
    %c0_186 = arith.constant 0 : index
    %520 = vector.load %arg12[%c0_185, %c0_186] : memref<64x24xf32, #tpu.memory_space<vmem>>, vector<64x24xf32>
    %cst_187 = arith.constant dense<0.000000e+00> : vector<4x24xf32>
    %521 = tpu.matmul %519, %520, %cst_187 {dimension_numbers = #tpu.dot_dimension_numbers<[1], [0], [0], [1], [0, 0, 1, 1], [], []>} : vector<4x64xf32>, vector<64x24xf32>, vector<4x24xf32> -> vector<4x24xf32>
    %522 = vector.extract_strided_slice %0 {offsets = [8, 0], sizes = [1, 24], strides = [1, 1]} : vector<16x128xf32> to vector<1x24xf32>
    %523 = vector.broadcast %522 : vector<1x24xf32> to vector<4x24xf32>
    %524 = arith.addf %521, %523 : vector<4x24xf32>
    %cst_188 = arith.constant 0.000000e+00 : f32
    %525 = vector.broadcast %cst_188 : f32 to vector<4x24xf32>
    %526 = arith.maximumf %524, %525 : vector<4x24xf32>
    %c0_189 = arith.constant 0 : index
    %c0_190 = arith.constant 0 : index
    %527 = vector.load %arg13[%c0_189, %c0_190] : memref<24x64xf32, #tpu.memory_space<vmem>>, vector<24x64xf32>
    %cst_191 = arith.constant dense<0.000000e+00> : vector<4x64xf32>
    %528 = tpu.matmul %526, %527, %cst_191 {dimension_numbers = #tpu.dot_dimension_numbers<[1], [0], [0], [1], [0, 0, 1, 1], [], []>} : vector<4x24xf32>, vector<24x64xf32>, vector<4x64xf32> -> vector<4x64xf32>
    %529 = vector.extract_strided_slice %0 {offsets = [11, 0], sizes = [1, 64], strides = [1, 1]} : vector<16x128xf32> to vector<1x64xf32>
    %530 = vector.broadcast %529 : vector<1x64xf32> to vector<4x64xf32>
    %531 = arith.addf %528, %530 : vector<4x64xf32>
    %532 = vector.extract_strided_slice %531 {offsets = [0, 0], sizes = [2, 64], strides = [1, 1]} : vector<4x64xf32> to vector<2x64xf32>
    %533 = vector.extract_strided_slice %531 {offsets = [2, 0], sizes = [2, 64], strides = [1, 1]} : vector<4x64xf32> to vector<2x64xf32>
    %534 = arith.addf %532, %533 : vector<2x64xf32>
    %535 = arith.negf %534 : vector<2x64xf32>
    %536 = math.exp %535 : vector<2x64xf32>
    %cst_192 = arith.constant 1.000000e+00 : f32
    %537 = vector.broadcast %cst_192 : f32 to vector<2x64xf32>
    %538 = arith.addf %537, %536 : vector<2x64xf32>
    %539 = arith.divf %537, %538 : vector<2x64xf32>
    %540 = vector.extract_strided_slice %539 {offsets = [0, 0], sizes = [1, 64], strides = [1, 1]} : vector<2x64xf32> to vector<1x64xf32>
    %541 = vector.broadcast %491 : vector<12x1xf32> to vector<12x64xf32>
    %542 = vector.broadcast %540 : vector<1x64xf32> to vector<12x64xf32>
    %543 = arith.mulf %541, %542 : vector<12x64xf32>
    %544 = vector.extract_strided_slice %539 {offsets = [1, 0], sizes = [1, 64], strides = [1, 1]} : vector<2x64xf32> to vector<1x64xf32>
    %545 = vector.broadcast %498 : vector<12x1xf32> to vector<12x64xf32>
    %546 = vector.broadcast %544 : vector<1x64xf32> to vector<12x64xf32>
    %547 = arith.mulf %545, %546 : vector<12x64xf32>
    %548 = arith.addf %543, %547 : vector<12x64xf32>
    %549 = arith.mulf %483, %548 : vector<12x64xf32>
    %cst_193 = arith.constant dense<0xFF800000> : vector<12xf32>
    %550 = vector.multi_reduction <maximumf>, %549, %cst_193 [1] : vector<12x64xf32> to vector<12xf32>
    %551 = vector.shape_cast %550 : vector<12xf32> to vector<12x1xf32>
    %cst_194 = arith.constant dense<0.000000e+00> : vector<12xf32>
    %552 = vector.multi_reduction <add>, %549, %cst_194 [1] : vector<12x64xf32> to vector<12xf32>
    %553 = vector.shape_cast %552 : vector<12xf32> to vector<12x1xf32>
    %cst_195 = arith.constant 6.400000e+01 : f32
    %554 = vector.broadcast %cst_195 : f32 to vector<12x1xf32>
    %555 = arith.divf %553, %554 : vector<12x1xf32>
    %c0_196 = arith.constant 0 : index
    %c0_197 = arith.constant 0 : index
    %556 = vector.load %arg15[%c0_196, %c0_197] : memref<12x24xf32, #tpu.memory_space<vmem>>, vector<12x24xf32>
    %557 = tpu.concatenate %551, %555 in 0 : vector<12x1xf32>, vector<12x1xf32> -> vector<24x1xf32>
    %cst_198 = arith.constant dense<0.000000e+00> : vector<12x1xf32>
    %558 = tpu.matmul %556, %557, %cst_198 {dimension_numbers = #tpu.dot_dimension_numbers<[1], [0], [0], [1], [0, 0, 1, 1], [], []>} : vector<12x24xf32>, vector<24x1xf32>, vector<12x1xf32> -> vector<12x1xf32>
    %559 = vector.broadcast %558 : vector<12x1xf32> to vector<12x64xf32>
    %560 = arith.mulf %559, %549 : vector<12x64xf32>
    %c0_199 = arith.constant 0 : index
    %c0_200 = arith.constant 0 : index
    %561 = vector.load %arg17[%c0_199, %c0_200] : memref<64x768xf32, #tpu.memory_space<vmem>>, vector<64x768xf32>
    %cst_201 = arith.constant dense<0.000000e+00> : vector<12x768xf32>
    %562 = tpu.matmul %560, %561, %cst_201 {dimension_numbers = #tpu.dot_dimension_numbers<[1], [0], [0], [1], [0, 0, 1, 1], [], []>} : vector<12x64xf32>, vector<64x768xf32>, vector<12x768xf32> -> vector<12x768xf32>
    %c0_202 = arith.constant 0 : index
    %c0_203 = arith.constant 0 : index
    %563 = vector.load %arg23[%c0_202, %c0_203] : memref<12x768xf32, #tpu.memory_space<vmem>>, vector<12x768xf32>
    %564 = arith.mulf %562, %563 : vector<12x768xf32>
    %565 = vector.extract_strided_slice %564 {offsets = [0, 0], sizes = [12, 128], strides = [1, 1]} : vector<12x768xf32> to vector<12x128xf32>
    %566 = vector.extract_strided_slice %564 {offsets = [0, 128], sizes = [12, 128], strides = [1, 1]} : vector<12x768xf32> to vector<12x128xf32>
    %567 = vector.extract_strided_slice %564 {offsets = [0, 256], sizes = [12, 128], strides = [1, 1]} : vector<12x768xf32> to vector<12x128xf32>
    %568 = vector.extract_strided_slice %564 {offsets = [0, 384], sizes = [12, 128], strides = [1, 1]} : vector<12x768xf32> to vector<12x128xf32>
    %569 = vector.extract_strided_slice %564 {offsets = [0, 512], sizes = [12, 128], strides = [1, 1]} : vector<12x768xf32> to vector<12x128xf32>
    %570 = vector.extract_strided_slice %564 {offsets = [0, 640], sizes = [12, 128], strides = [1, 1]} : vector<12x768xf32> to vector<12x128xf32>
    %571 = arith.addf %565, %566 : vector<12x128xf32>
    %572 = arith.addf %567, %568 : vector<12x128xf32>
    %573 = arith.addf %569, %570 : vector<12x128xf32>
    %574 = arith.addf %571, %572 : vector<12x128xf32>
    %575 = arith.addf %574, %573 : vector<12x128xf32>
    %576 = tpu.iota {dimensions = array<i32: 0>} : vector<12x1xi32>
    %c0_i32_204 = arith.constant 0 : i32
    %577 = vector.broadcast %c0_i32_204 : i32 to vector<12x1xi32>
    %578 = arith.cmpi sge, %576, %577 : vector<12x1xi32>
    %c6_i32_205 = arith.constant 6 : i32
    %579 = vector.broadcast %c6_i32_205 : i32 to vector<12x1xi32>
    %580 = arith.cmpi slt, %576, %579 : vector<12x1xi32>
    %581 = arith.andi %578, %580 : vector<12x1xi1>
    %582 = arith.extui %581 : vector<12x1xi1> to vector<12x1xi32>
    %583 = arith.sitofp %582 : vector<12x1xi32> to vector<12x1xf32>
    %584 = vector.broadcast %583 : vector<12x1xf32> to vector<12x128xf32>
    %585 = arith.mulf %575, %584 : vector<12x128xf32>
    %cst_206 = arith.constant dense<0.000000e+00> : vector<128xf32>
    %586 = vector.multi_reduction <add>, %585, %cst_206 [0] : vector<12x128xf32> to vector<128xf32>
    %587 = vector.shape_cast %586 : vector<128xf32> to vector<1x128xf32>
    %c6_i32_207 = arith.constant 6 : i32
    %588 = vector.broadcast %c6_i32_207 : i32 to vector<12x1xi32>
    %589 = arith.cmpi sge, %576, %588 : vector<12x1xi32>
    %c12_i32_208 = arith.constant 12 : i32
    %590 = vector.broadcast %c12_i32_208 : i32 to vector<12x1xi32>
    %591 = arith.cmpi slt, %576, %590 : vector<12x1xi32>
    %592 = arith.andi %589, %591 : vector<12x1xi1>
    %593 = arith.extui %592 : vector<12x1xi1> to vector<12x1xi32>
    %594 = arith.sitofp %593 : vector<12x1xi32> to vector<12x1xf32>
    %595 = vector.broadcast %594 : vector<12x1xf32> to vector<12x128xf32>
    %596 = arith.mulf %575, %595 : vector<12x128xf32>
    %cst_209 = arith.constant dense<0.000000e+00> : vector<128xf32>
    %597 = vector.multi_reduction <add>, %596, %cst_209 [0] : vector<12x128xf32> to vector<128xf32>
    %598 = vector.shape_cast %597 : vector<128xf32> to vector<1x128xf32>
    %599 = tpu.concatenate %587, %598 in 0 : vector<1x128xf32>, vector<1x128xf32> -> vector<2x128xf32>
    %600 = vector.extract_strided_slice %599 {offsets = [0, 0], sizes = [2, 20], strides = [1, 1]} : vector<2x128xf32> to vector<2x20xf32>
    %601 = vector.extract_strided_slice %0 {offsets = [12, 0], sizes = [1, 20], strides = [1, 1]} : vector<16x128xf32> to vector<1x20xf32>
    %602 = vector.broadcast %601 : vector<1x20xf32> to vector<2x20xf32>
    %603 = arith.addf %600, %602 : vector<2x20xf32>
    %c0_210 = arith.constant 0 : index
    %c0_211 = arith.constant 0 : index
    %604 = vector.load %arg22[%c0_210, %c0_211] : memref<2x12xf32, #tpu.memory_space<vmem>>, vector<2x12xf32>
    %c0_212 = arith.constant 0 : index
    %c0_213 = arith.constant 0 : index
    %605 = vector.load %arg18[%c0_212, %c0_213] : memref<20x32xf32, #tpu.memory_space<vmem>>, vector<20x32xf32>
    %cst_214 = arith.constant dense<0.000000e+00> : vector<2x32xf32>
    %606 = tpu.matmul %603, %605, %cst_214 {dimension_numbers = #tpu.dot_dimension_numbers<[1], [0], [0], [1], [0, 0, 1, 1], [], []>} : vector<2x20xf32>, vector<20x32xf32>, vector<2x32xf32> -> vector<2x32xf32>
    %c0_215 = arith.constant 0 : index
    %c0_216 = arith.constant 0 : index
    %607 = vector.load %arg19[%c0_215, %c0_216] : memref<12x32xf32, #tpu.memory_space<vmem>>, vector<12x32xf32>
    %cst_217 = arith.constant dense<0.000000e+00> : vector<2x32xf32>
    %608 = tpu.matmul %604, %607, %cst_217 {dimension_numbers = #tpu.dot_dimension_numbers<[1], [0], [0], [1], [0, 0, 1, 1], [], []>} : vector<2x12xf32>, vector<12x32xf32>, vector<2x32xf32> -> vector<2x32xf32>
    %609 = arith.addf %606, %608 : vector<2x32xf32>
    %610 = vector.extract_strided_slice %0 {offsets = [13, 0], sizes = [1, 32], strides = [1, 1]} : vector<16x128xf32> to vector<1x32xf32>
    %611 = vector.broadcast %610 : vector<1x32xf32> to vector<2x32xf32>
    %612 = arith.addf %609, %611 : vector<2x32xf32>
    %cst_218 = arith.constant 0.000000e+00 : f32
    %613 = vector.broadcast %cst_218 : f32 to vector<2x32xf32>
    %614 = arith.maximumf %612, %613 : vector<2x32xf32>
    %c0_219 = arith.constant 0 : index
    %c0_220 = arith.constant 0 : index
    %615 = vector.load %arg20[%c0_219, %c0_220] : memref<32x32xf32, #tpu.memory_space<vmem>>, vector<32x32xf32>
    %cst_221 = arith.constant dense<0.000000e+00> : vector<2x32xf32>
    %616 = tpu.matmul %614, %615, %cst_221 {dimension_numbers = #tpu.dot_dimension_numbers<[1], [0], [0], [1], [0, 0, 1, 1], [], []>} : vector<2x32xf32>, vector<32x32xf32>, vector<2x32xf32> -> vector<2x32xf32>
    %617 = vector.extract_strided_slice %0 {offsets = [14, 0], sizes = [1, 32], strides = [1, 1]} : vector<16x128xf32> to vector<1x32xf32>
    %618 = vector.broadcast %617 : vector<1x32xf32> to vector<2x32xf32>
    %619 = arith.addf %616, %618 : vector<2x32xf32>
    %cst_222 = arith.constant 0.000000e+00 : f32
    %620 = vector.broadcast %cst_222 : f32 to vector<2x32xf32>
    %621 = arith.maximumf %619, %620 : vector<2x32xf32>
    %c0_223 = arith.constant 0 : index
    %c0_224 = arith.constant 0 : index
    %622 = vector.load %arg21[%c0_223, %c0_224] : memref<32x1xf32, #tpu.memory_space<vmem>>, vector<32x1xf32>
    %cst_225 = arith.constant dense<0.000000e+00> : vector<2x1xf32>
    %623 = tpu.matmul %621, %622, %cst_225 {dimension_numbers = #tpu.dot_dimension_numbers<[1], [0], [0], [1], [0, 0, 1, 1], [], []>} : vector<2x32xf32>, vector<32x1xf32>, vector<2x1xf32> -> vector<2x1xf32>
    %624 = vector.extract_strided_slice %0 {offsets = [15, 0], sizes = [1, 1], strides = [1, 1]} : vector<16x128xf32> to vector<1x1xf32>
    %625 = vector.broadcast %624 : vector<1x1xf32> to vector<2x1xf32>
    %626 = arith.addf %623, %625 : vector<2x1xf32>
    %627 = math.tanh %626 : vector<2x1xf32>
    %c0_226 = arith.constant 0 : index
    %c0_227 = arith.constant 0 : index
    %628 = vector.load %arg26[%c0_226, %c0_227] : memref<2x1xf32, #tpu.memory_space<vmem>>, vector<2x1xf32>
    tpu.vector_store %arg26[%c0_226, %c0_227], %627 {strides = array<i32>} : memref<2x1xf32, #tpu.memory_space<vmem>>, vector<2x1xf32>,
    return
  }
}

</mosaic_0001>

<bundles_post_ra>
// kernel: actor_forward.1
= control target key start
LH: loop header
LB: loop body
LE: loop exit
PB: predicated region body
PF: predicated region fallthrough
CT: control target
= control target key end

     0   :  { %s6944_s0 = inlined_call_operand.vmem [shape: f32[64,24], index: 0, kind: input, shape index: {}]   ;;  %s6945_s1 = inlined_call_operand.vmem [shape: f32[24,64], index: 1, kind: input, shape index: {}]   ;;  %s6946_s2 = inlined_call_operand.vmem [shape: f32[9,48,1], index: 2, kind: input, shape index: {}]   ;;  %s6947_s3 = inlined_call_operand.vmem [shape: f32[48,48], index: 3, kind: input, shape index: {}]   ;;  %s6948_s4 = inlined_call_operand.vmem [shape: f32[48,96], index: 4, kind: input, shape index: {}]   ;;  %s6949_s5 = inlined_call_operand.hbm [shape: f32[180,1152], index: 5, kind: input, shape index: {}]   ;;  %s6950_s6 = inlined_call_operand.vmem [shape: f32[64,24], index: 6, kind: input, shape index: {}]   ;;  %s6951_s7 = inlined_call_operand.vmem [shape: f32[24,64], index: 7, kind: input, shape index: {}]   ;;  %s6952_s8 = inlined_call_operand.vmem [shape: f32[9,24,1], index: 8, kind: input, shape index: {}]   ;;  %s6953_s9 = inlined_call_operand.vmem [shape: f32[24,24], index: 9, kind: input, shape index: {}]   ;;  %s6954_s10 = inlined_call_operand.vmem [shape: f32[24,48], index: 10, kind: input, shape index: {}]   ;;  %s6955_s11 = inlined_call_operand.vmem [shape: f32[64,1152], index: 11, kind: input, shape index: {}]   ;;  %s6956_s12 = inlined_call_operand.vmem [shape: f32[64,24], index: 12, kind: input, shape index: {}]   ;;  %s6957_s13 = inlined_call_operand.vmem [shape: f32[24,64], index: 13, kind: input, shape index: {}]   ;;  %s6958_s14 = inlined_call_operand.vmem [shape: f32[9,12,1], index: 14, kind: input, shape index: {}]   ;;  %s6959_s15 = inlined_call_operand.vmem [shape: f32[12,24], index: 15, kind: input, shape index: {}]   ;;  %s6960_s16 = inlined_call_operand.hbm [shape: f32[64,1152], index: 16, kind: input, shape index: {}]   ;;  %s6961_s17 = inlined_call_operand.vmem [shape: f32[64,768], index: 17, kind: input, shape index: {}]   ;;  %s6962_s18 = inlined_call_operand.vmem [shape: f32[20,32], index: 18, kind: input, shape index: {}]   ;;  %s6963_s19 = inlined_call_operand.vmem [shape: f32[12,32], index: 19, kind: input, shape index: {}]   ;;  %s6964_s20 = inlined_call_operand.vmem [shape: f32[32,32], index: 20, kind: input, shape index: {}]   ;;  %s6965_s21 = inlined_call_operand.vmem [shape: f32[32,1], index: 21, kind: input, shape index: {}]   ;;  %s6966_s22 = inlined_call_operand.vmem [shape: f32[2,12], index: 22, kind: input, shape index: {}]   ;;  %s6967_s23 = inlined_call_operand.vmem [shape: f32[12,768], index: 23, kind: input, shape index: {}]   ;;  %s6968_s24 = inlined_call_operand.hbm [shape: f32[16,128], index: 24, kind: input, shape index: {}]   ;;  %s6969_s25 = inlined_call_operand.vmem [shape: f32[48,180], index: 25, kind: input, shape index: {}]   ;;  %s6970_s26 = inlined_call_operand.vmem [shape: f32[2,1], index: 26, kind: output, shape index: {}]  }
   0x1   :  { %6987 = sst [smem:[#allocation50_spill]] %s6944_s0 }
   0x2   :  { %6988 = sst [smem:[#allocation51_spill]] %s6945_s1 }
   0x3   :  { %6989 = sst [smem:[#allocation52_spill]] %s6946_s2 }
   0x4   :  { %6990 = sst [smem:[#allocation53_spill]] %s6947_s3 }
   0x5   :  { %6991 = sst [smem:[#allocation54_spill]] %s6948_s4 }
   0x6   :  { %6992 = sst [smem:[#allocation55_spill]] %s6949_s5 }
   0x7   :  { %6993 = sst [smem:[#allocation56_spill]] %s6950_s6 }
   0x8   :  { %6994 = sst [smem:[#allocation57_spill]] %s6951_s7 }
   0x9   :  { %6995 = sst [smem:[#allocation58_spill]] %s6952_s8 }
   0xa   :  { %6996 = sst [smem:[#allocation59_spill]] %s6953_s9 }
   0xb   :  { %6997 = sst [smem:[#allocation60_spill]] %s6954_s10 }
   0xc   :  { %6998 = sst [smem:[#allocation61_spill]] %s6970_s26 }
   0xd   :  { %31 = vsyncpa [#allocation3], 0 }
   0xe   :  { %32 = vsyncpa [#allocation5], 0  ;;  %s80_s7 = sshll.u32 %s6960_s16, 4  ;;  %s4744_s28 = smov [#allocation4]   ;;  %s81_s7 = int_to_ptr.hbm [resolvable:$true] %s80_s7 }
   0xf   :  { %s82_s8 = sshll.u32 %s4744_s28, 4  ;;  %s6999_s0 = sld [smem:[#allocation55_spill]]  ;;  %s83_s8 = int_to_ptr.vmem [resolvable:$true] %s82_s8 }
  0x10   :  { %s4745_s30 = smov 1152   ;;  %s4746_s2 = smov 72  }
  0x11   :  { %88 = dma.hbm_to_vmem [thread:$0]  %s81_s7, 9216, %s83_s8, [#allocation5], %s4745_s30, %s4745_s30, %s4746_s2  }
  0x12   :  { %s4747_s5 = smov [#allocation2]   ;;  %s107_s26 = sshll.u32 %s6968_s24, 4  ;;  %s108_s26 = int_to_ptr.hbm [resolvable:$true] %s107_s26 }
  0x13   :  { %s49_s10 = sshll.u32 %s4747_s5, 4  ;;  %s4748_s16 = smov [#allocation6]   ;;  %s50_s10 = int_to_ptr.vmem [resolvable:$true] %s49_s10 }
  0x14   :  { %s109_s27 = sshll.u32 %s4748_s16, 4  ;;  %s4749_s3 = smov 128   ;;  %s110_s27 = int_to_ptr.vmem [resolvable:$true] %s109_s27 }
  0x15   :  { %s47_s9 = sshll.u32 %s6999_s0, 4  ;;  %s4750_s28 = smov 8   ;;  %s48_s9 = int_to_ptr.hbm [resolvable:$true] %s47_s9 }
  0x16   :  { %55 = dma.hbm_to_vmem [thread:$0]  %s48_s9, 26496, %s50_s10, [#allocation3], %s4745_s30, %s4745_s30, %s4746_s2  }
  0x17   :  { %115 = dma.hbm_to_vmem [thread:$0]  %s108_s26, 256, %s110_s27, [#allocation5], %s4749_s3, %s4749_s3, %s4750_s28  }
  0x18   :  { %4740 = dma.done.wait [#allocation3], 26496  }
  0x19   :  { %4741 = vsyncadd [#allocation3], 4294940800 }
  0x1a   :  { %4742 = dma.done.wait [#allocation5], 9472  }
  0x1b   :  { %4743 = vsyncadd [#allocation5], 4294957824  ;;  %v4751_v0 = vmov 0   ;;  %s7000_s24 = sld [smem:[#allocation52_spill]]  ;;  %v279_v3 = vld [vmem:[#allocation2 + $0x438] sm:$0xff]  ;;  %vm370_vm0 = vcmask 1043456  }
  0x1c   :  { %4622 = vset.pattern.permute.xlu1 %v4751_v0  ;;  %4621 = vset.pattern.permute.xlu0 %v4751_v0  ;;  %v280_v4 = vld [vmem:[#allocation2 + $0x440] sm:$0xff]  ;;  %v343_v5 = vld [vmem:[#allocation2 + $0x638] sm:$0xf]  ;;  %v270_v6 = vld [vmem:[#allocation2 + $0x3f0] sm:$0xff]  ;;  %vm351_vm1 = vcmask 424960   ;;  %vm1100_vm2 = vcmask 1042432  }
  0x1d   :  { %4623 = vset.pattern.permute.xlu2 %v4751_v0  ;;  %398 = vmatpush.msra.mxu0 %v279_v3  ;;  %v271_v7 = vld [vmem:[#allocation2 + $0x3f8] sm:$0xff]  ;;  %v334_v8 = vld [vmem:[#allocation2 + $0x5f0] sm:$0xff]  ;;  %v261_v9 = vld [vmem:[#allocation2 + $0x3a8] sm:$0xff]  ;;  %vm1168_vm3 = vcmask 1041408   ;;  %vm1236_vm4 = vcmask 1040384   ;;  %vm1347_vm5 = vcmask 1046528  }
  0x1e   :  { %468 = vmatpush.msra.mxu2 %v280_v4  ;;  %4367 = vmatpush.msk.msra.mxu3 %vm370_vm0, %v343_v5  ;;  %v262_v10 = vld [vmem:[#allocation2 + $0x3b0] sm:$0xff]  ;;  %v325_v11 = vld [vmem:[#allocation2 + $0x5a8] sm:$0xff]  ;;  %v252_v13 = vld [vmem:[#allocation2 + $0x360] sm:$0xff]  ;;  %vm1415_vm6 = vcmask 1045504   ;;  %vm1483_vm7 = vcmask 1044480   ;;  %vm1660_vm8 = vcmask 523264  }
  0x1f   :  { %399 = vmatpush.msra.mxu0 %v270_v6  ;;  %v342_v12 = vld [vmem:[#allocation2 + $0x630] sm:$0xf]  ;;  %v253_v14 = vld [vmem:[#allocation2 + $0x368] sm:$0xff]  ;;  %v316_v15 = vld [vmem:[#allocation2 + $0x560] sm:$0xff]  ;;  %s7087_s4 = sld [smem:[#allocation50_spill]]  ;;  %vm1942_vm13 = vcmask 195584  }
  0x20   :  { %469 = vmatpush.msra.mxu2 %v271_v7  ;;  %513 = vmatpush.msra.mxu3 %v334_v8  ;;  %v333_v17 = vld [vmem:[#allocation2 + $0x5e8] sm:$0xff]  ;;  %v243_v19 = vld [vmem:[#allocation2 + $0x318] sm:$0xff]  ;;  %v244_v20 = vld [vmem:[#allocation2 + $0x320] sm:$0xff]  ;;  %s7089_s30 = sld [smem:[#allocation54_spill]] }
  0x21   :  { %v4423_v1 = vld [vmem:[%s7000_s24 + $0x30] sm:$0xff]  ;;  %v1052_v2 = vld [vmem:[%s7000_s24] sm:$0xff]  ;;  %4360 = vmatpush.msk.msra.mxu1 %vm370_vm0, %v342_v12  ;;  %400 = vmatpush.msra.mxu0 %v261_v9  ;;  %v4424_v16 = vld [vmem:[%s7000_s24 + $0x38] sm:$0xff]  ;;  %s7090_s8 = sld [smem:[#allocation58_spill]] }
  0x22   :  { %1128 = vperm.xlu1 %4622, %v4423_v1   ;;  %1060 = vperm.xlu0 %4621, %v1052_v2   ;;  %v1053_v18 = vld [vmem:[%s7000_s24 + $0x8] sm:$0xff]  ;;  %v307_v21 = vld [vmem:[#allocation2 + $0x518] sm:$0xff]  ;;  %v234_v22 = vld [vmem:[#allocation2 + $0x2d0] sm:$0xff]  ;;  %s7092_s9 = sld [smem:[#allocation56_spill]] }
  0x23   :  { %470 = vmatpush.msra.mxu2 %v262_v10  ;;  %514 = vmatpush.msra.mxu3 %v325_v11  ;;  %v324_v23 = vld [vmem:[#allocation2 + $0x5a0] sm:$0xff]  ;;  %v235_v24 = vld [vmem:[#allocation2 + $0x2d8] sm:$0xff]  ;;  %v298_v25 = vld [vmem:[#allocation2 + $0x4d0] sm:$0xff]  ;;  %s7093_s26 = sld [smem:[#allocation57_spill]] }
  0x24   :  { %443 = vmatpush.msra.mxu1 %v333_v17  ;;  %401 = vmatpush.msra.mxu0 %v252_v13  ;;  %v225_v26 = vld [vmem:[#allocation2 + $0x288] sm:$0xff]  ;;  %v315_v27 = vld [vmem:[#allocation2 + $0x558] sm:$0xff]  ;;  %v226_v28 = vld [vmem:[#allocation2 + $0x290] sm:$0xff]  ;;  %s7094_s5 = sld [smem:[#allocation60_spill]] }
  0x25   :  { %471 = vmatpush.msra.mxu2 %v253_v14  ;;  %515 = vmatpush.msra.mxu3 %v316_v15  ;;  %v289_v29 = vld [vmem:[#allocation2 + $0x488] sm:$0xff]  ;;  %v216_v31 = vld [vmem:[#allocation2 + $0x240] sm:$0xff]  ;;  %v306_v32 = vld [vmem:[#allocation2 + $0x510] sm:$0xff]  ;;  %s7095_s1 = sld [smem:[#allocation59_spill]] }
  0x26   :  { %402 = vmatpush.msra.mxu0 %v243_v19  ;;  %444 = vmatpush.msra.mxu1 %v324_v23  ;;  %v4918_v30 = vld [vmem:[%s6969_s25 + $0x8] sm:$0xff]  ;;  %v4436_v34 = vld [vmem:[%s7000_s24 + $0x98] sm:$0xff]  ;;  %v4435_v35 = vld [vmem:[%s7000_s24 + $0x90] sm:$0xff]  ;;  %s7096_s3 = sld [smem:[#allocation61_spill]] }
  0x27   :  { %472 = vmatpush.msra.mxu2 %v244_v20  ;;  %516 = vmatpush.msra.mxu3 %v307_v21  ;;  %v217_v33 = vld [vmem:[#allocation2 + $0x248] sm:$0xff]  ;;  %v207_v36 = vld [vmem:[#allocation2 + $0x1f8] sm:$0xff]  ;;  %v208_v38 = vld [vmem:[#allocation2 + $0x200] sm:$0xff] }
  0x28   :  { %403 = vmatpush.msra.mxu0 %v234_v22  ;;  %445 = vmatpush.msra.mxu1 %v315_v27  ;;  %v297_v37 = vld [vmem:[#allocation2 + $0x4c8] sm:$0xff]  ;;  %v4429_v39 = vld [vmem:[%s7000_s24 + $0x60] sm:$0xff]  ;;  %v198_v40 = vld [vmem:[#allocation2 + $0x1b0] sm:$0xff] }
  0x29   :  { %473 = vmatpush.msra.mxu2 %v235_v24  ;;  %517 = vmatpush.msra.mxu3 %v298_v25  ;;  %v288_v41 = vld [vmem:[#allocation2 + $0x480] sm:$0xff]  ;;  %v199_v42 = vld [vmem:[#allocation2 + $0x1b8] sm:$0xff]  ;;  %v189_v43 = vld [vmem:[#allocation2 + $0x168] sm:$0xff] }
  0x2a   :  { %1133 = vperm.xlu1 %4622, %v4424_v16   ;;  %1065 = vperm.xlu0 %4621, %v1053_v18   ;;  %v344_v44 = vld [vmem:[#allocation2 + $0x640] sm:$0xf]  ;;  %v190_v45 = vld [vmem:[#allocation2 + $0x170] sm:$0xff]  ;;  %v4934_v46 = vld [vmem:[%s6969_s25 + $0x18] sm:$0xff] }
  0x2b   :  { %404 = vmatpush.msra.mxu0 %v225_v26  ;;  %474 = vmatpush.msra.mxu2 %v226_v28  ;;  %v180_v47 = vld [vmem:[#allocation2 + $0x120] sm:$0xff]  ;;  %v281_v48 = vld [vmem:[#allocation2 + $0x448] sm:$0xff]  ;;  %v4447_v50 = vld [vmem:[%s7000_s24 + $0xf0] sm:$0xff] }
  0x2c   :  { %518 = vmatpush.msra.mxu3 %v289_v29  ;;  %446 = vmatpush.msra.mxu1 %v306_v32  ;;  %v181_v49 = vld [vmem:[#allocation2 + $0x128] sm:$0xff]  ;;  %v171_v52 = vld [vmem:[#allocation2 + $0xd8] sm:$0xff]  ;;  %v172_v53 = vld [vmem:[#allocation2 + $0xe0] sm:$0xff] }
  0x2d   :  { %4368 = vmatmul.msk.f32.vlgmr.msra.gmra.mxu3 %vm351_vm1, %v4918_v30  ;;  %405 = vmatpush.msra.mxu0 %v216_v31  ;;  %v4442_v51 = vld [vmem:[%s7000_s24 + $0xc8] sm:$0xff]  ;;  %v162_v55 = vld [vmem:[#allocation2 + $0x90] sm:$0xff]  ;;  %v335_v56 = vld [vmem:[#allocation2 + $0x5f8] sm:$0xff] }
  0x2e   :  { %475 = vmatpush.msra.mxu2 %v217_v33  ;;  %447 = vmatpush.msra.mxu1 %v297_v37  ;;  %v4430_v54 = vld [vmem:[%s7000_s24 + $0x68] sm:$0xff]  ;;  %v163_v57 = vld [vmem:[#allocation2 + $0x98] sm:$0xff]  ;;  %v272_v59 = vld [vmem:[#allocation2 + $0x400] sm:$0xff] }
  0x2f   :  { %406 = vmatpush.msra.mxu0 %v207_v36  ;;  %1196 = vperm.xlu2 %4623, %v4429_v39   ;;  %v153_v58 = vld [vmem:[#allocation2 + $0x48] sm:$0xff]  ;;  %v154_v60 = vld [vmem:[#allocation2 + $0x50] sm:$0xff]  ;;  %v144_v62 = vld [vmem:[#allocation2] sm:$0xff] }
  0x30   :  { %476 = vmatpush.msra.mxu2 %v208_v38  ;;  %448 = vmatpush.msra.mxu1 %v288_v41  ;;  %v4953_v61 = vld [vmem:[%s6969_s25 + $0x28] sm:$0xff]  ;;  %v263_v63 = vld [vmem:[#allocation2 + $0x3b8] sm:$0xff]  ;;  %v4960_v1 = vld [vmem:[%s6969_s25] sm:$0xff] }
  0x31   :  { %407 = vmatpush.msra.mxu0 %v198_v40  ;;  %4361 = vmatmul.msk.f32.vlgmr.msra.gmra.mxu1 %vm351_vm1, %v4918_v30  ;;  %v145_v0 = vld [vmem:[#allocation2 + $0x8] sm:$0xff]  ;;  %v4453_v3 = vld [vmem:[%s7000_s24 + $0x120] sm:$0xff]  ;;  %v326_v5 = vld [vmem:[#allocation2 + $0x5b0] sm:$0xff] }
  0x32   :  { %1269 = vperm.xlu1 %4622, %v4436_v34   ;;  %1264 = vperm.xlu0 %4621, %v4435_v35   ;;  %v4454_v2 = vld [vmem:[%s7000_s24 + $0x128] sm:$0xff]  ;;  %v4441_v4 = vld [vmem:[%s7000_s24 + $0xc0] sm:$0xff]  ;;  %v254_v6 = vld [vmem:[#allocation2 + $0x370] sm:$0xff] }
  0x33   :  { %477 = vmatpush.msra.mxu2 %v199_v42  ;;  %408 = vmatpush.msra.mxu0 %v189_v43  ;;  %v282_v7 = vld [vmem:[#allocation2 + $0x450] sm:$0xff]  ;;  %v245_v8 = vld [vmem:[#allocation2 + $0x328] sm:$0xff]  ;;  %v4978_v10 = vld [vmem:[%s6969_s25 + $0x38] sm:$0xff] }
  0x34   :  { %4374 = vmatpush.msk.msrb.mxu3 %vm370_vm0, %v344_v44  ;;  %538 = vmatpush.msrb.mxu1 %v281_v48  ;;  %v317_v9 = vld [vmem:[#allocation2 + $0x568] sm:$0xff]  ;;  %v236_v12 = vld [vmem:[#allocation2 + $0x2e0] sm:$0xff]  ;;  %v4985_v14 = vld [vmem:[%s6969_s25 + $0x10] sm:$0xff] }
  0x35   :  { %478 = vmatpush.msra.mxu2 %v190_v45  ;;  %4369 = vmatmul.msk.f32.gmra.mxu3 %vm351_vm1, %v4934_v46  ;;  %v273_v11 = vld [vmem:[#allocation2 + $0x408] sm:$0xff]  ;;  %v308_v13 = vld [vmem:[#allocation2 + $0x520] sm:$0xff]  ;;  %v1054_v16 = vld [vmem:[%s7000_s24 + $0x10] sm:$0xff] }
  0x36   :  { %409 = vmatpush.msra.mxu0 %v180_v47  ;;  %583 = vmatpush.msrb.mxu3 %v335_v56  ;;  %v345_v15 = vld [vmem:[#allocation2 + $0x648] sm:$0xf]  ;;  %v4460_v17 = vld [vmem:[%s7000_s24 + $0x158] sm:$0xff]  ;;  %v264_v21 = vld [vmem:[#allocation2 + $0x3c0] sm:$0xff] }
  0x37   :  { %479 = vmatpush.msra.mxu2 %v181_v49  ;;  %1201 = vperm.xlu2 %4623, %v4430_v54   ;;  %v4448_v18 = vld [vmem:[%s7000_s24 + $0xf8] sm:$0xff]  ;;  %v218_v22 = vld [vmem:[#allocation2 + $0x250] sm:$0xff]  ;;  %v5004_v24 = vld [vmem:[%s6969_s25 + $0x48] sm:$0xff] }
  0x38   :  { %410 = vmatpush.msra.mxu0 %v171_v52  ;;  %539 = vmatpush.msrb.mxu1 %v272_v59  ;;  %v227_v19 = vld [vmem:[#allocation2 + $0x298] sm:$0xff]  ;;  %v290_v23 = vld [vmem:[#allocation2 + $0x490] sm:$0xff]  ;;  %v209_v26 = vld [vmem:[#allocation2 + $0x208] sm:$0xff] }
  0x39   :  { %480 = vmatpush.msra.mxu2 %v172_v53  ;;  %4362 = vmatmul.msk.f32.gmra.mxu1 %vm351_vm1, %v4934_v46  ;;  %v299_v20 = vld [vmem:[#allocation2 + $0x4d8] sm:$0xff]  ;;  %v336_v27 = vld [vmem:[#allocation2 + $0x600] sm:$0xff]  ;;  %v346_v29 = vld [vmem:[#allocation2 + $0x650] sm:$0xf] }
  0x3a   :  { %1375 = vperm.xlu1 %4622, %v4447_v50   ;;  %1312 = vperm.xlu0 %4621, %v4442_v51   ;;  %v255_v25 = vld [vmem:[#allocation2 + $0x378] sm:$0xff]  ;;  %v5011_v28 = vld [vmem:[%s6969_s25 + $0x20] sm:$0xff]  ;;  %v4431_v32 = vld [vmem:[%s7000_s24 + $0x70] sm:$0xff] }
  0x3b   :  { %411 = vmatpush.msra.mxu0 %v162_v55  ;;  %481 = vmatpush.msra.mxu2 %v163_v57  ;;  %v4437_v31 = vld [vmem:[%s7000_s24 + $0xa0] sm:$0xff]  ;;  %v4459_v33 = vld [vmem:[%s7000_s24 + $0x150] sm:$0xff]  ;;  %v327_v36 = vld [vmem:[#allocation2 + $0x5b8] sm:$0xff] }
  0x3c   :  { %540 = vmatpush.msrb.mxu1 %v263_v63  ;;  %584 = vmatpush.msrb.mxu3 %v326_v5  ;;  %v200_v34 = vld [vmem:[#allocation2 + $0x1c0] sm:$0xff]  ;;  %v246_v35 = vld [vmem:[#allocation2 + $0x330] sm:$0xff]  ;;  %v191_v37 = vld [vmem:[#allocation2 + $0x178] sm:$0xff] }
  0x3d   :  { %412 = vmatpush.msra.mxu0 %v153_v58  ;;  %482 = vmatpush.msra.mxu2 %v154_v60  ;;  %v237_v38 = vld [vmem:[#allocation2 + $0x2e8] sm:$0xff]  ;;  %v5030_v39 = vld [vmem:[%s6969_s25 + $0x58] sm:$0xff]  ;;  %v318_v40 = vld [vmem:[#allocation2 + $0x570] sm:$0xff] }
  0x3e   :  { %4370 = vmatmul.msk.f32.gmra.mxu3 %vm351_vm1, %v4953_v61  ;;  %541 = vmatpush.msrb.mxu1 %v254_v6  ;;  %v182_v41 = vld [vmem:[#allocation2 + $0x130] sm:$0xff]  ;;  %v228_v42 = vld [vmem:[#allocation2 + $0x2a0] sm:$0xff]  ;;  %v309_v44 = vld [vmem:[#allocation2 + $0x528] sm:$0xff] }
  0x3f   :  { %413 = vmatpush.msra.mxu0 %v144_v62  ;;  %483 = vmatpush.msra.mxu2 %v145_v0  ;;  %v5037_v43 = vld [vmem:[%s6969_s25 + $0x30] sm:$0xff]  ;;  %v4449_v47 = vld [vmem:[%s7000_s24 + $0x100] sm:$0xff]  ;;  %v173_v48 = vld [vmem:[#allocation2 + $0xe8] sm:$0xff] }
  0x40   :  { %414 = vmatmul.f32.vlgmr.msra.gmra.mxu0 %v4960_v1  ;;  %484 = vmatmul.f32.vlgmr.msra.gmra.mxu2 %v4960_v1  ;;  %v4455_v45 = vld [vmem:[%s7000_s24 + $0x130] sm:$0xff]  ;;  %v4425_v49 = vld [vmem:[%s7000_s24 + $0x40] sm:$0xff]  ;;  %v219_v50 = vld [vmem:[#allocation2 + $0x258] sm:$0xff] }
  0x41   :  { %1307 = vperm.xlu2 %4623, %v4441_v4   ;;  %4363 = vmatmul.msk.f32.gmra.mxu1 %vm351_vm1, %v4953_v61  ;;  %v300_v51 = vld [vmem:[#allocation2 + $0x4e0] sm:$0xff]  ;;  %v210_v53 = vld [vmem:[#allocation2 + $0x210] sm:$0xff]  ;;  %v291_v54 = vld [vmem:[#allocation2 + $0x498] sm:$0xff] }
  0x42   :  { %1448 = vperm.xlu1 %4622, %v4454_v2   ;;  %1443 = vperm.xlu0 %4621, %v4453_v3   ;;  %v164_v52 = vld [vmem:[#allocation2 + $0xa0] sm:$0xff]  ;;  %v155_v55 = vld [vmem:[#allocation2 + $0x58] sm:$0xff]  ;;  %v201_v56 = vld [vmem:[#allocation2 + $0x1c8] sm:$0xff] }
  0x43   :  { %608 = vmatpush.msrb.mxu0 %v282_v7  ;;  %542 = vmatpush.msrb.mxu1 %v245_v8  ;;  %v5057_v57 = vld [vmem:[%s6969_s25 + $0x40] sm:$0xff]  ;;  %v337_v58 = vld [vmem:[#allocation2 + $0x608] sm:$0xff]  ;;  %v1055_v60 = vld [vmem:[%s7000_s24 + $0x18] sm:$0xff] }
  0x44   :  { %585 = vmatpush.msrb.mxu3 %v317_v9  ;;  %4381 = vmatpush.msk.msrb.mxu2 %vm370_vm0, %v345_v15  ;;  %v4426_v59 = vld [vmem:[%s7000_s24 + $0x48] sm:$0xff]  ;;  %v146_v62 = vld [vmem:[#allocation2 + $0x10] sm:$0xff]  ;;  %v192_v0 = vld [vmem:[#allocation2 + $0x180] sm:$0xff] }
  0x45   :  { %609 = vmatpush.msrb.mxu0 %v273_v11  ;;  %543 = vmatpush.msrb.mxu1 %v236_v12  ;;  %v4443_v63 = vld [vmem:[%s7000_s24 + $0xd0] sm:$0xff]  ;;  %v328_v2 = vld [vmem:[#allocation2 + $0x5c0] sm:$0xff]  ;;  %v183_v3 = vld [vmem:[#allocation2 + $0x138] sm:$0xff] }
  0x46   :  { %4371 = vmatmul.msk.f32.gmra.mxu3 %vm351_vm1, %v4978_v10  ;;  %653 = vmatpush.msrb.mxu2 %v336_v27  ;;  %v283_v4 = vld [vmem:[#allocation2 + $0x458] sm:$0xff]  ;;  %v174_v5 = vld [vmem:[#allocation2 + $0xf0] sm:$0xff]  ;;  %v4438_v11 = vld [vmem:[%s7000_s24 + $0xa8] sm:$0xff] }
  0x47   :  { %586 = vmatpush.msrb.mxu3 %v308_v13  ;;  %544 = vmatpush.msrb.mxu1 %v227_v19  ;;  %v274_v6 = vld [vmem:[#allocation2 + $0x410] sm:$0xff]  ;;  %v319_v8 = vld [vmem:[#allocation2 + $0x578] sm:$0xff]  ;;  %v165_v12 = vld [vmem:[#allocation2 + $0xa8] sm:$0xff] }
  0x48   :  { %417 = vmatmul.f32.gmra.mxu0 %v4985_v14  ;;  %487 = vmatmul.f32.gmra.mxu2 %v4985_v14  ;;  %v5076_v7 = vld [vmem:[%s6969_s25 + $0x50] sm:$0xff]  ;;  %v4444_v9 = vld [vmem:[%s7000_s24 + $0xd8] sm:$0xff]  ;;  %v4461_v13 = vld [vmem:[%s7000_s24 + $0x160] sm:$0xff] }
  0x49   :  { %1380 = vperm.xlu2 %4623, %v4448_v18   ;;  %587 = vmatpush.msrb.mxu3 %v299_v20  ;;  %v265_v15 = vld [vmem:[#allocation2 + $0x3c8] sm:$0xff]  ;;  %v310_v18 = vld [vmem:[#allocation2 + $0x530] sm:$0xff]  ;;  %v147_v19 = vld [vmem:[#allocation2 + $0x18] sm:$0xff] }
  0x4a   :  { %1070 = vperm.xlu1 %4622, %v1054_v16   ;;  %1516 = vperm.xlu0 %4621, %v4460_v17   ;;  %v156_v16 = vld [vmem:[#allocation2 + $0x60] sm:$0xff]  ;;  %v247_v20 = vld [vmem:[#allocation2 + $0x338] sm:$0xff] }
  0x4b   :  { %4364 = vmatmul.msk.f32.gmra.mxu1 %vm351_vm1, %v4978_v10  ;;  %610 = vmatpush.msrb.mxu0 %v264_v21  ;;  %v256_v17 = vld [vmem:[#allocation2 + $0x380] sm:$0xff]  ;;  %v4432_v27 = vld [vmem:[%s7000_s24 + $0x78] sm:$0xff] }
  0x4c   :  { %545 = vmatpush.msrb.mxu1 %v218_v22  ;;  %588 = vmatpush.msrb.mxu3 %v290_v23  ;;  %v284_v21 = vld [vmem:[#allocation2 + $0x460] sm:$0xff]  ;;  %v301_v22 = vld [vmem:[#allocation2 + $0x4e8] sm:$0xff] }
  0x4d   :  { %611 = vmatpush.msrb.mxu0 %v255_v25  ;;  %654 = vmatpush.msrb.mxu2 %v327_v36  ;;  %v4462_v23 = vld [vmem:[%s7000_s24 + $0x168] sm:$0xff]  ;;  %v4456_v25 = vld [vmem:[%s7000_s24 + $0x138] sm:$0xff] }
  0x4e   :  { %4372 = vmatmul.msk.f32.gmra.mxu3 %vm351_vm1, %v5004_v24  ;;  %546 = vmatpush.msrb.mxu1 %v209_v26  ;;  %v238_v26 = vld [vmem:[#allocation2 + $0x2f0] sm:$0xff]  ;;  %v257_v36 = vld [vmem:[#allocation2 + $0x388] sm:$0xff] }
  0x4f   :  { %4388 = vmatpush.msk.msra.mxu3 %vm370_vm0, %v346_v29  ;;  %612 = vmatpush.msrb.mxu0 %v246_v35  ;;  %v275_v29 = vld [vmem:[#allocation2 + $0x418] sm:$0xff]  ;;  %v220_v35 = vld [vmem:[#allocation2 + $0x260] sm:$0xff] }
  0x50   :  { %420 = vmatmul.f32.gmra.mxu0 %v5011_v28  ;;  %490 = vmatmul.f32.gmra.mxu2 %v5011_v28 }
  0x51   :  { %1511 = vperm.xlu2 %4623, %v4459_v33   ;;  %547 = vmatpush.msrb.mxu1 %v200_v34  ;;  %v266_v33 = vld [vmem:[#allocation2 + $0x3d0] sm:$0xff]  ;;  %v347_v34 = vld [vmem:[#allocation2 + $0x658] sm:$0xf] }
  0x52   :  { %1274 = vperm.xlu1 %4622, %v4437_v31   ;;  %1206 = vperm.xlu0 %4621, %v4431_v32   ;;  %v292_v31 = vld [vmem:[#allocation2 + $0x4a0] sm:$0xff]  ;;  %v229_v32 = vld [vmem:[#allocation2 + $0x2a8] sm:$0xff] }
  0x53   :  { %4365 = vmatmul.msk.f32.gmra.mxu1 %vm351_vm1, %v5004_v24  ;;  %613 = vmatpush.msrb.mxu0 %v237_v38  ;;  %v4433_v38 = vld [vmem:[%s7000_s24 + $0x80] sm:$0xff] }
  0x54   :  { %548 = vmatpush.msrb.mxu1 %v191_v37  ;;  %655 = vmatpush.msrb.mxu2 %v318_v40  ;;  %v338_v37 = vld [vmem:[#allocation2 + $0x610] sm:$0xff] }
  0x55   :  { %614 = vmatpush.msrb.mxu0 %v228_v42  ;;  %723 = vmatpush.msra.mxu3 %v337_v58  ;;  %v4427_v40 = vld [vmem:[%s7000_s24 + $0x50] sm:$0xff]  ;;  %v4450_v42 = vld [vmem:[%s7000_s24 + $0x108] sm:$0xff] }
  0x56   :  { %4373 = vmatmul.msk.f32.gmra.mxu3 %vm351_vm1, %v5030_v39  ;;  %549 = vmatpush.msrb.mxu1 %v182_v41  ;;  %v211_v41 = vld [vmem:[#allocation2 + $0x218] sm:$0xff]  ;;  %v221_v58 = vld [vmem:[#allocation2 + $0x268] sm:$0xff] }
  0x57   :  { %656 = vmatpush.msrb.mxu2 %v309_v44  ;;  %615 = vmatpush.msrb.mxu0 %v219_v50  ;;  %v248_v44 = vld [vmem:[#allocation2 + $0x340] sm:$0xff]  ;;  %v193_v50 = vld [vmem:[#allocation2 + $0x188] sm:$0xff] }
  0x58   :  { %423 = vmatmul.f32.gmra.mxu0 %v5037_v43  ;;  %493 = vmatmul.f32.gmra.mxu2 %v5037_v43 }
  0x59   :  { %550 = vmatpush.msrb.mxu1 %v173_v48  ;;  %1138 = vperm.xlu2 %4623, %v4425_v49   ;;  %v239_v48 = vld [vmem:[#allocation2 + $0x2f8] sm:$0xff]  ;;  %v320_v49 = vld [vmem:[#allocation2 + $0x580] sm:$0xff] }
  0x5a   :  { %1453 = vperm.xlu1 %4622, %v4455_v45   ;;  %1385 = vperm.xlu0 %4621, %v4449_v47   ;;  %v329_v45 = vld [vmem:[#allocation2 + $0x5c8] sm:$0xff]  ;;  %v202_v47 = vld [vmem:[#allocation2 + $0x1d0] sm:$0xff] }
  0x5b   :  { %4366 = vmatmul.msk.f32.gmra.mxu1 %vm351_vm1, %v5030_v39  ;;  %657 = vmatpush.msrb.mxu2 %v300_v51  ;;  %v230_v51 = vld [vmem:[#allocation2 + $0x2b0] sm:$0xff] }
  0x5c   :  { %551 = vmatpush.msrb.mxu1 %v164_v52  ;;  %616 = vmatpush.msrb.mxu0 %v210_v53  ;;  %v311_v52 = vld [vmem:[#allocation2 + $0x538] sm:$0xff]  ;;  %v4451_v53 = vld [vmem:[%s7000_s24 + $0x110] sm:$0xff] }
  0x5d   :  { %658 = vmatpush.msrb.mxu2 %v291_v54  ;;  %724 = vmatpush.msra.mxu3 %v328_v2  ;;  %v4445_v54 = vld [vmem:[%s7000_s24 + $0xe0] sm:$0xff]  ;;  %v203_v2 = vld [vmem:[#allocation2 + $0x1d8] sm:$0xff] }
  0x5e   :  { %4375 = vmatmul.msk.f32.vlgmr.msrb.gmra.mxu3 %vm351_vm1, %v4918_v30  ;;  %552 = vmatpush.msrb.mxu1 %v155_v55  ;;  %v184_v55 = vld [vmem:[#allocation2 + $0x140] sm:$0xff] }
  0x5f   :  { %617 = vmatpush.msrb.mxu0 %v201_v56  ;;  %725 = vmatpush.msra.mxu3 %v319_v8  ;;  %v1056_v56 = vld [vmem:[%s7000_s24 + $0x20] sm:$0xff]  ;;  %v4439_v8 = vld [vmem:[%s7000_s24 + $0xb0] sm:$0xff] }
  0x60   :  { %426 = vmatmul.f32.gmra.mxu0 %v5057_v57  ;;  %496 = vmatmul.f32.gmra.mxu2 %v5057_v57 }
  0x61   :  { %553 = vmatpush.msrb.mxu1 %v146_v62  ;;  %1317 = vperm.xlu2 %4623, %v4443_v63   ;;  %v212_v62 = vld [vmem:[#allocation2 + $0x220] sm:$0xff]  ;;  %v302_v63 = vld [vmem:[#allocation2 + $0x4f0] sm:$0xff] }
  0x62   :  { %1143 = vperm.xlu1 %4622, %v4426_v59   ;;  %1075 = vperm.xlu0 %4621, %v1055_v60   ;;  %v348_v59 = vld [vmem:[#allocation2 + $0x660] sm:$0xf]  ;;  %v175_v60 = vld [vmem:[#allocation2 + $0xf8] sm:$0xff] }
  0x63   :  { %618 = vmatpush.msrb.mxu0 %v192_v0  ;;  %554 = vmatmul.f32.vlgmr.msrb.gmra.mxu1 %v4960_v1  ;;  %v166_v0 = vld [vmem:[#allocation2 + $0xb0] sm:$0xff] }
  0x64   :  { %678 = vmatpush.msra.mxu1 %v283_v4  ;;  %726 = vmatpush.msra.mxu3 %v310_v18  ;;  %v4465_v4 = vld [vmem:[%s7000_s24 + $0x180] sm:$0xff]  ;;  %v330_v18 = vld [vmem:[#allocation2 + $0x5d0] sm:$0xff] }
  0x65   :  { %619 = vmatpush.msrb.mxu0 %v183_v3  ;;  %4395 = vmatpush.msk.msra.mxu2 %vm370_vm0, %v347_v34  ;;  %v293_v3 = vld [vmem:[#allocation2 + $0x4a8] sm:$0xff] }
  0x66   :  { %4376 = vmatmul.msk.f32.gmra.mxu3 %vm351_vm1, %v4934_v46  ;;  %679 = vmatpush.msra.mxu1 %v274_v6  ;;  %v157_v6 = vld [vmem:[#allocation2 + $0x68] sm:$0xff] }
  0x67   :  { %620 = vmatpush.msrb.mxu0 %v174_v5  ;;  %727 = vmatpush.msra.mxu3 %v301_v22  ;;  %v4463_v5 = vld [vmem:[%s7000_s24 + $0x170] sm:$0xff]  ;;  %v167_v22 = vld [vmem:[#allocation2 + $0xb8] sm:$0xff] }
  0x68   :  { %429 = vmatmul.f32.gmra.mxu0 %v5076_v7  ;;  %499 = vmatmul.f32.gmra.mxu2 %v5076_v7 }
  0x69   :  { %621 = vmatpush.msrb.mxu0 %v165_v12  ;;  %1521 = vperm.xlu2 %4623, %v4461_v13   ;;  %v148_v12 = vld [vmem:[#allocation2 + $0x20] sm:$0xff]  ;;  %v185_v13 = vld [vmem:[#allocation2 + $0x148] sm:$0xff] }
  0x6a   :  { %1322 = vperm.xlu1 %4622, %v4444_v9   ;;  %1279 = vperm.xlu0 %4621, %v4438_v11   ;;  %v194_v9 = vld [vmem:[#allocation2 + $0x190] sm:$0xff]  ;;  %v339_v11 = vld [vmem:[#allocation2 + $0x618] sm:$0xff] }
  0x6b   :  { %680 = vmatpush.msra.mxu1 %v265_v15  ;;  %622 = vmatpush.msrb.mxu0 %v156_v16  ;;  %v285_v15 = vld [vmem:[#allocation2 + $0x468] sm:$0xff] }
  0x6c   :  { %557 = vmatmul.f32.gmra.mxu1 %v4985_v14  ;;  %728 = vmatpush.msra.mxu3 %v292_v31  ;;  %v258_v31 = vld [vmem:[#allocation2 + $0x390] sm:$0xff] }
  0x6d   :  { %681 = vmatpush.msra.mxu1 %v256_v17  ;;  %623 = vmatpush.msrb.mxu0 %v147_v19  ;;  %v176_v17 = vld [vmem:[#allocation2 + $0x100] sm:$0xff] }
  0x6e   :  { %4377 = vmatmul.msk.f32.gmra.mxu3 %vm351_vm1, %v4953_v61  ;;  %793 = vmatpush.msra.mxu2 %v338_v37  ;;  %v276_v19 = vld [vmem:[#allocation2 + $0x420] sm:$0xff] }
  0x6f   :  { %682 = vmatpush.msra.mxu1 %v247_v20  ;;  %748 = vmatpush.msra.mxu0 %v284_v21  ;;  %v4428_v20 = vld [vmem:[%s7000_s24 + $0x58] sm:$0xff]  ;;  %v1057_v21 = vld [vmem:[%s7000_s24 + $0x28] sm:$0xff]  ;;  %v312_v37 = vld [vmem:[#allocation2 + $0x540] sm:$0xff] }
  0x70   :  { %624 = vmatmul.f32.vlgmr.msrb.gmra.mxu0 %v4960_v1  ;;  %4382 = vmatmul.msk.f32.vlgmr.msrb.gmra.mxu2 %vm351_vm1, %v4918_v30 }
  0x71   :  { %683 = vmatpush.msra.mxu1 %v238_v26  ;;  %1211 = vperm.xlu2 %4623, %v4432_v27  }
  0x72   :  { %1526 = vperm.xlu1 %4622, %v4462_v23   ;;  %1458 = vperm.xlu0 %4621, %v4456_v25   ;;  %v4457_v23 = vld [vmem:[%s7000_s24 + $0x140] sm:$0xff]  ;;  %v267_v25 = vld [vmem:[#allocation2 + $0x3d8] sm:$0xff] }
  0x73   :  { %749 = vmatpush.msra.mxu0 %v275_v29  ;;  %684 = vmatpush.msra.mxu1 %v229_v32  ;;  %v158_v29 = vld [vmem:[#allocation2 + $0x70] sm:$0xff]  ;;  %v321_v32 = vld [vmem:[#allocation2 + $0x588] sm:$0xff] }
  0x74   :  { %560 = vmatmul.f32.gmra.mxu1 %v5011_v28  ;;  %794 = vmatpush.msra.mxu2 %v329_v45 }
  0x75   :  { %750 = vmatpush.msra.mxu0 %v266_v33  ;;  %685 = vmatpush.msra.mxu1 %v220_v35  ;;  %v149_v33 = vld [vmem:[#allocation2 + $0x28] sm:$0xff] }
  0x76   :  { %4378 = vmatmul.msk.f32.gmra.mxu3 %vm351_vm1, %v4978_v10  ;;  %795 = vmatpush.msra.mxu2 %v320_v49  ;;  %v249_v35 = vld [vmem:[#allocation2 + $0x348] sm:$0xff]  ;;  %v303_v49 = vld [vmem:[#allocation2 + $0x4f8] sm:$0xff] }
  0x77   :  { %751 = vmatpush.msra.mxu0 %v257_v36  ;;  %686 = vmatpush.msra.mxu1 %v211_v41  ;;  %v4446_v36 = vld [vmem:[%s7000_s24 + $0xe8] sm:$0xff] }
  0x78   :  { %627 = vmatmul.f32.gmra.mxu0 %v4985_v14  ;;  %4383 = vmatmul.msk.f32.gmra.mxu2 %vm351_vm1, %v4934_v46  ;;  %v4466_v41 = vld [vmem:[%s7000_s24 + $0x188] sm:$0xff] }
  0x79   :  { %1390 = vperm.xlu2 %4623, %v4450_v42   ;;  %752 = vmatpush.msra.mxu0 %v248_v44  ;;  %v286_v42 = vld [vmem:[#allocation2 + $0x470] sm:$0xff] }
  0x7a   :  { %1216 = vperm.xlu1 %4622, %v4433_v38   ;;  %1148 = vperm.xlu0 %4621, %v4427_v40   ;;  %v4440_v38 = vld [vmem:[%s7000_s24 + $0xb8] sm:$0xff]  ;;  %v240_v40 = vld [vmem:[#allocation2 + $0x300] sm:$0xff] }
  0x7b   :  { %687 = vmatpush.msra.mxu1 %v202_v47  ;;  %753 = vmatpush.msra.mxu0 %v239_v48  ;;  %v231_v47 = vld [vmem:[#allocation2 + $0x2b8] sm:$0xff]  ;;  %v277_v48 = vld [vmem:[#allocation2 + $0x428] sm:$0xff] }
  0x7c   :  { %563 = vmatmul.f32.gmra.mxu1 %v5037_v43  ;;  %796 = vmatpush.msra.mxu2 %v311_v52  ;;  %v268_v52 = vld [vmem:[#allocation2 + $0x3e0] sm:$0xff] }
  0x7d   :  { %688 = vmatpush.msra.mxu1 %v193_v50  ;;  %754 = vmatpush.msra.mxu0 %v230_v51  ;;  %v222_v51 = vld [vmem:[#allocation2 + $0x270] sm:$0xff] }
  0x7e   :  { %4379 = vmatmul.msk.f32.gmra.mxu3 %vm351_vm1, %v5004_v24  ;;  %797 = vmatpush.msra.mxu2 %v302_v63  ;;  %v204_v63 = vld [vmem:[#allocation2 + $0x1e0] sm:$0xff] }
  0x7f   :  { %689 = vmatpush.msra.mxu1 %v184_v55  ;;  %755 = vmatpush.msra.mxu0 %v221_v58  ;;  %v4458_v55 = vld [vmem:[%s7000_s24 + $0x148] sm:$0xff] }
  0x80   :  { %630 = vmatmul.f32.gmra.mxu0 %v5011_v28  ;;  %4384 = vmatmul.msk.f32.gmra.mxu2 %vm351_vm1, %v4953_v61  ;;  %v4434_v58 = vld [vmem:[%s7000_s24 + $0x88] sm:$0xff] }
  0x81   :  { %1080 = vperm.xlu2 %4623, %v1056_v56   ;;  %4402 = vmatpush.msk.msrb.mxu3 %vm370_vm0, %v348_v59  ;;  %v213_v56 = vld [vmem:[#allocation2 + $0x228] sm:$0xff]  ;;  %v259_v59 = vld [vmem:[#allocation2 + $0x398] sm:$0xff] }
  0x82   :  { %1395 = vperm.xlu1 %4622, %v4451_v53   ;;  %1327 = vperm.xlu0 %4621, %v4445_v54   ;;  %v294_v53 = vld [vmem:[#allocation2 + $0x4b0] sm:$0xff]  ;;  %v4464_v54 = vld [vmem:[%s7000_s24 + $0x178] sm:$0xff] }
  0x83   :  { %690 = vmatpush.msra.mxu1 %v175_v60  ;;  %756 = vmatpush.msra.mxu0 %v212_v62 }
  0x84   :  { %566 = vmatmul.f32.gmra.mxu1 %v5057_v57  ;;  %798 = vmatpush.msra.mxu2 %v293_v3 }
  0x85   :  { %691 = vmatpush.msra.mxu1 %v166_v0  ;;  %757 = vmatpush.msra.mxu0 %v203_v2  ;;  %v250_v0 = vld [vmem:[#allocation2 + $0x350] sm:$0xff]  ;;  %v349_v2 = vld [vmem:[#allocation2 + $0x668] sm:$0xf] }
  0x86   :  { %4380 = vmatmul.msk.f32.gmra.mxu3 %vm351_vm1, %v5030_v39  ;;  %4409 = vmatpush.msk.msrb.mxu2 %vm370_vm0, %v349_v2 }
  0x87   :  { %692 = vmatpush.msra.mxu1 %v157_v6  ;;  %758 = vmatpush.msra.mxu0 %v194_v9  ;;  %v4469_v6 = vld [vmem:[%s7000_s24 + $0x1a0] sm:$0xff]  ;;  %v186_v9 = vld [vmem:[#allocation2 + $0x150] sm:$0xff] }
  0x88   :  { %633 = vmatmul.f32.gmra.mxu0 %v5037_v43  ;;  %4385 = vmatmul.msk.f32.gmra.mxu2 %vm351_vm1, %v4978_v10 }
  0x89   :  { %1284 = vperm.xlu2 %4623, %v4439_v8   ;;  %v5154_v16 = vpop.permute.xlu2 %1196  ;;  %863 = vmatpush.msrb.mxu3 %v339_v11  ;;  %v4468_v8 = vld [vmem:[%s7000_s24 + $0x198] sm:$0xff] }
  0x8a   :  { %1578 = vperm.xlu1 %4622, %v4465_v4   ;;  %1531 = vperm.xlu0 %4621, %v4463_v5   ;;  %v195_v4 = vld [vmem:[#allocation2 + $0x198] sm:$0xff]  ;;  %v241_v5 = vld [vmem:[#allocation2 + $0x308] sm:$0xff] }
  0x8b   :  { %693 = vmatpush.msra.mxu1 %v148_v12  ;;  %759 = vmatpush.msra.mxu0 %v185_v13  ;;  %v331_v11 = vld [vmem:[#allocation2 + $0x5d8] sm:$0xff]  ;;  %v232_v13 = vld [vmem:[#allocation2 + $0x2c0] sm:$0xff] }
  0x8c   :  { %569 = vmatmul.f32.gmra.mxu1 %v5076_v7  ;;  %864 = vmatpush.msrb.mxu3 %v330_v18  ;;  %v4452_v12 = vld [vmem:[%s7000_s24 + $0x118] sm:$0xff]  ;;  %v177_v18 = vld [vmem:[#allocation2 + $0x108] sm:$0xff] }
  0x8d   :  { %818 = vmatpush.msrb.mxu1 %v285_v15  ;;  %760 = vmatpush.msra.mxu0 %v176_v17  ;;  %v322_v15 = vld [vmem:[#allocation2 + $0x590] sm:$0xff] }
  0x8e   :  { %4389 = vmatmul.msk.f32.vlgmr.msra.gmra.mxu3 %vm351_vm1, %v4918_v30 }
  0x8f   :  { %819 = vmatpush.msrb.mxu1 %v276_v19  ;;  %761 = vmatpush.msra.mxu0 %v167_v22  ;;  %v223_v19 = vld [vmem:[#allocation2 + $0x278] sm:$0xff] }
  0x90   :  { %636 = vmatmul.f32.gmra.mxu0 %v5057_v57  ;;  %4386 = vmatmul.msk.f32.gmra.mxu2 %vm351_vm1, %v5004_v24 }
  0x91   :  { %1463 = vperm.xlu2 %4623, %v4457_v23   ;;  %820 = vmatpush.msrb.mxu1 %v267_v25  ;;  %v5175_v34 = vpop.permute.xlu2 %1201  ;;  %v168_v23 = vld [vmem:[#allocation2 + $0xc0] sm:$0xff]  ;;  %v214_v25 = vld [vmem:[#allocation2 + $0x230] sm:$0xff] }
  0x92   :  { %1153 = vperm.xlu1 %4622, %v4428_v20   ;;  %1085 = vperm.xlu0 %4621, %v1057_v21   ;;  %7001 = vst [vmem:[#allocation9_spill] sm:$0xff] %v5175_v34  ;;  %v313_v21 = vld [vmem:[#allocation2 + $0x548] sm:$0xff] }
  0x93   :  { %762 = vmatpush.msra.mxu0 %v158_v29  ;;  %821 = vmatpush.msrb.mxu1 %v258_v31  ;;  %v159_v29 = vld [vmem:[#allocation2 + $0x78] sm:$0xff]  ;;  %v205_v31 = vld [vmem:[#allocation2 + $0x1e8] sm:$0xff] }
  0x94   :  { %v5170_v26 = vpop.permute.xlu1 %1128  ;;  %v5172_v27 = vpop.permute.xlu0 %1060  ;;  %694 = vmatmul.f32.vlgmr.msra.gmra.mxu1 %v4960_v1  ;;  %865 = vmatpush.msrb.mxu3 %v321_v32  ;;  %v295_v32 = vld [vmem:[#allocation2 + $0x4b8] sm:$0xff] }
  0x95   :  { %763 = vmatpush.msra.mxu0 %v149_v33  ;;  %822 = vmatpush.msrb.mxu1 %v249_v35  ;;  %v4467_v33 = vld [vmem:[%s7000_s24 + $0x190] sm:$0xff] }
  0x96   :  { %4390 = vmatmul.msk.f32.gmra.mxu3 %vm351_vm1, %v4934_v46  ;;  %v150_v35 = vld [vmem:[#allocation2 + $0x30] sm:$0xff] }
  0x97   :  { %866 = vmatpush.msrb.mxu3 %v312_v37  ;;  %823 = vmatpush.msrb.mxu1 %v240_v40 }
  0x98   :  { %639 = vmatmul.f32.gmra.mxu0 %v5076_v7  ;;  %4387 = vmatmul.msk.f32.gmra.mxu2 %vm351_vm1, %v5030_v39 }
  0x99   :  { %1583 = vperm.xlu2 %4623, %v4466_v41   ;;  %888 = vmatpush.msrb.mxu0 %v286_v42  ;;  %v187_v41 = vld [vmem:[#allocation2 + $0x158] sm:$0xff] }
  0x9a   :  { %1332 = vperm.xlu1 %4622, %v4446_v36   ;;  %1289 = vperm.xlu0 %4621, %v4440_v38   ;;  %v196_v38 = vld [vmem:[#allocation2 + $0x1a0] sm:$0xff] }
  0x9b   :  { %v5196_v50 = vpop.permute.xlu2 %1307  ;;  %867 = vmatpush.msrb.mxu3 %v303_v49  ;;  %824 = vmatpush.msrb.mxu1 %v231_v47  ;;  %v350_v47 = vld [vmem:[#allocation2 + $0x670] sm:$0xf] }
  0x9c   :  { %v5191_v44 = vpop.permute.xlu1 %1133  ;;  %v5193_v45 = vpop.permute.xlu0 %1065  ;;  %697 = vmatmul.f32.gmra.mxu1 %v4985_v14  ;;  %889 = vmatpush.msrb.mxu0 %v277_v48  ;;  %v287_v48 = vld [vmem:[#allocation2 + $0x478] sm:$0xff] }
  0x9d   :  { %825 = vmatpush.msrb.mxu1 %v222_v51  ;;  %868 = vmatpush.msrb.mxu3 %v294_v53  ;;  %v178_v51 = vld [vmem:[#allocation2 + $0x110] sm:$0xff]  ;;  %v4470_v53 = vld [vmem:[%s7000_s24 + $0x1a8] sm:$0xff] }
  0x9e   :  { %4391 = vmatmul.msk.f32.gmra.mxu3 %vm351_vm1, %v4953_v61  ;;  %890 = vmatpush.msrb.mxu0 %v268_v52  ;;  %v278_v52 = vld [vmem:[#allocation2 + $0x430] sm:$0xff] }
  0x9f   :  { %826 = vmatpush.msrb.mxu1 %v213_v56  ;;  %4416 = vmatpush.msk.msra.mxu3 %vm370_vm0, %v350_v47 }
  0xa0   :  { %764 = vmatmul.f32.vlgmr.msra.gmra.mxu0 %v4960_v1  ;;  %4396 = vmatmul.msk.f32.vlgmr.msra.gmra.mxu2 %vm351_vm1, %v4918_v30  ;;  %v340_v30 = vld [vmem:[#allocation2 + $0x620] sm:$0xff] }
  0xa1   :  { %1221 = vperm.xlu2 %4623, %v4434_v58   ;;  %891 = vmatpush.msrb.mxu0 %v259_v59  ;;  %v269_v58 = vld [vmem:[#allocation2 + $0x3e8] sm:$0xff]  ;;  %v160_v59 = vld [vmem:[#allocation2 + $0x80] sm:$0xff] }
  0xa2   :  { %1536 = vperm.xlu1 %4622, %v4464_v54   ;;  %1468 = vperm.xlu0 %4621, %v4458_v55   ;;  %v169_v54 = vld [vmem:[#allocation2 + $0xc8] sm:$0xff] }
  0xa3   :  { %v5217_v3 = vpop.permute.xlu2 %1380  ;;  %827 = vmatpush.msrb.mxu1 %v204_v63  ;;  %892 = vmatpush.msrb.mxu0 %v250_v0  ;;  %v260_v0 = vld [vmem:[#allocation2 + $0x3a0] sm:$0xff] }
  0xa4   :  { %v5212_v60 = vpop.permute.xlu1 %1269  ;;  %v5214_v62 = vpop.permute.xlu0 %1264  ;;  %700 = vmatmul.f32.gmra.mxu1 %v5011_v28  ;;  %933 = vmatpush.msrb.mxu2 %v340_v30 }
  0xa5   :  { %828 = vmatpush.msrb.mxu1 %v195_v4  ;;  %893 = vmatpush.msrb.mxu0 %v241_v5  ;;  %v151_v4 = vld [vmem:[#allocation2 + $0x38] sm:$0xff]  ;;  %v332_v5 = vld [vmem:[#allocation2 + $0x5e0] sm:$0xff] }
  0xa6   :  { %4392 = vmatmul.msk.f32.gmra.mxu3 %vm351_vm1, %v4978_v10  ;;  %934 = vmatpush.msrb.mxu2 %v331_v11 }
  0xa7   :  { %829 = vmatpush.msrb.mxu1 %v186_v9  ;;  %894 = vmatpush.msrb.mxu0 %v232_v13  ;;  %v242_v9 = vld [vmem:[#allocation2 + $0x310] sm:$0xff] }
  0xa8   :  { %767 = vmatmul.f32.gmra.mxu0 %v4985_v14  ;;  %4397 = vmatmul.msk.f32.gmra.mxu2 %vm351_vm1, %v4934_v46  ;;  %v304_v46 = vld [vmem:[#allocation2 + $0x500] sm:$0xff] }
  0xa9   :  { %1400 = vperm.xlu2 %4623, %v4452_v12   ;;  %935 = vmatpush.msrb.mxu2 %v322_v15 }
  0xaa   :  { %1598 = vperm.xlu1 %4622, %v4469_v6   ;;  %1593 = vperm.xlu0 %4621, %v4468_v8   ;;  %v5277_v8 = vld [vmem:[%s6969_s25 + $0x8] sm:$0xff] }
  0xab   :  { %v5239_v22 = vpop.permute.xlu2 %1511  ;;  %830 = vmatpush.msrb.mxu1 %v177_v18  ;;  %895 = vmatpush.msrb.mxu0 %v223_v19  ;;  %v233_v19 = vld [vmem:[#allocation2 + $0x2c8] sm:$0xff] }
  0xac   :  { %v5234_v17 = vpop.permute.xlu1 %1375  ;;  %v5236_v20 = vpop.permute.xlu0 %1312  ;;  %703 = vmatmul.f32.gmra.mxu1 %v5037_v43  ;;  %936 = vmatpush.msrb.mxu2 %v313_v21 }
  0xad   :  { %7002 = vst [vmem:[#allocation10_spill] sm:$0xff] %v5236_v20  ;;  %831 = vmatpush.msrb.mxu1 %v168_v23  ;;  %896 = vmatpush.msrb.mxu0 %v214_v25 }
  0xae   :  { %4393 = vmatmul.msk.f32.gmra.mxu3 %vm351_vm1, %v5004_v24  ;;  %937 = vmatpush.msrb.mxu2 %v304_v46  ;;  %v450_v36 = vpop.f32.mrf.mxu1 }
  0xaf   :  { %832 = vmatpush.msrb.mxu1 %v159_v29  ;;  %897 = vmatpush.msrb.mxu0 %v205_v31  ;;  %v323_v29 = vld [vmem:[#allocation2 + $0x598] sm:$0xff]  ;;  %v224_v31 = vld [vmem:[#allocation2 + $0x280] sm:$0xff] }
  0xb0   :  { %770 = vmatmul.f32.gmra.mxu0 %v5011_v28  ;;  %4398 = vmatmul.msk.f32.gmra.mxu2 %vm351_vm1, %v4953_v61  ;;  %v5249_v37 = vpop.f32.mrf.mxu3  ;;  %v341_v61 = vld [vmem:[#allocation2 + $0x628] sm:$0xff] }
  0xb1   :  { %938 = vmatpush.msrb.mxu2 %v295_v32  ;;  %1588 = vperm.xlu2 %4623, %v4467_v33  }
  0xb2   :  { %833 = vmatpush.msrb.mxu1 %v150_v35  ;;  %898 = vmatpush.msrb.mxu0 %v196_v38  ;;  %v215_v35 = vld [vmem:[#allocation2 + $0x238] sm:$0xff]  ;;  %v314_v38 = vld [vmem:[#allocation2 + $0x550] sm:$0xff] }
  0xb3   :  { %v5259_v49 = vpop.permute.xlu2 %1138  ;;  %1003 = vmatpush.msra.mxu3 %v341_v61 }
  0xb4   :  { %v5251_v40 = vpop.permute.xlu1 %1448  ;;  %v5253_v42 = vpop.permute.xlu0 %1443  ;;  %706 = vmatmul.f32.gmra.mxu1 %v5057_v57  ;;  %899 = vmatpush.msrb.mxu0 %v187_v41 }
  0xb5   :  { %7003 = vst [vmem:[#allocation11_spill] sm:$0xff] %v5251_v40  ;;  %958 = vmatpush.msra.mxu1 %v287_v48  ;;  %1004 = vmatpush.msra.mxu3 %v332_v5 }
  0xb6   :  { %4394 = vmatmul.msk.f32.gmra.mxu3 %vm351_vm1, %v5030_v39  ;;  %v453_v55 = vpop.f32.mrf.mxu1  ;;  %900 = vmatpush.msrb.mxu0 %v178_v51 }
  0xb7   :  { %959 = vmatpush.msra.mxu1 %v278_v52  ;;  %1005 = vmatpush.msra.mxu3 %v323_v29  ;;  %v197_v52 = vld [vmem:[#allocation2 + $0x1a8] sm:$0xff] }
  0xb8   :  { %773 = vmatmul.f32.gmra.mxu0 %v5037_v43  ;;  %4399 = vmatmul.msk.f32.gmra.mxu2 %vm351_vm1, %v4978_v10  ;;  %v5267_v56 = vpop.f32.mrf.mxu3  ;;  %v251_v10 = vld [vmem:[#allocation2 + $0x358] sm:$0xff]  ;;  %v161_v29 = vld [vmem:[#allocation2 + $0x88] sm:$0xff] }
  0xb9   :  { %960 = vmatpush.msra.mxu1 %v269_v58  ;;  %1603 = vperm.xlu2 %4623, %v4470_v53   ;;  %v305_v58 = vld [vmem:[#allocation2 + $0x508] sm:$0xff] }
  0xba   :  { %901 = vmatpush.msrb.mxu0 %v169_v54  ;;  %1006 = vmatpush.msra.mxu3 %v314_v38 }
  0xbb   :  { %961 = vmatpush.msra.mxu1 %v260_v0  ;;  %v5281_v12 = vpop.permute.xlu2 %1317 }
  0xbc   :  { %v5269_v63 = vpop.permute.xlu1 %1070  ;;  %v5271_v2 = vpop.permute.xlu0 %1516  ;;  %709 = vmatmul.f32.gmra.mxu1 %v5076_v7  ;;  %902 = vmatpush.msrb.mxu0 %v160_v59 }
  0xbd   :  { %v415_v30 = vpop.f32.mrf.mxu0  ;;  %962 = vmatpush.msra.mxu1 %v251_v10  ;;  %1007 = vmatpush.msra.mxu3 %v305_v58  ;;  %v5325_v10 = vld [vmem:[%s6969_s25 + $0x28] sm:$0xff] }
  0xbe   :  { %v451_v6 = vadd.f32 %v450_v36, %v415_v30  ;;  %4403 = vmatmul.msk.f32.vlgmr.msrb.gmra.mxu3 %vm351_vm1, %v5277_v8  ;;  %903 = vmatpush.msrb.mxu0 %v151_v4  ;;  %v456_v13 = vpop.f32.mrf.mxu1 }
  0xbf   :  { %963 = vmatpush.msra.mxu1 %v242_v9 }
  0xc0   :  { %v1034_v11 = vrot.slane %v451_v6, 4  ;;  %776 = vmatmul.f32.gmra.mxu0 %v5057_v57  ;;  %4400 = vmatmul.msk.f32.gmra.mxu2 %vm351_vm1, %v5004_v24  ;;  %v179_v6 = vld [vmem:[#allocation2 + $0x118] sm:$0xff] }
  0xc1   :  { %v5286_v15 = vpop.f32.mrf.mxu3  ;;  %964 = vmatpush.msra.mxu1 %v233_v19 }
  0xc2   :  { %v1051_v18 = vsel %vm370_vm0, 0.0, %v1034_v11 }
  0xc3   :  { %v1088_v21 = vmul.f32 %v5172_v27, %v1051_v18  ;;  %v485_v46 = vpop.f32.mrf.mxu2  ;;  %v5299_v27 = vld [vmem:[%s6969_s25 + $0x18] sm:$0xff]  ;;  %965 = vmatpush.msra.mxu1 %v224_v31  ;;  %v5312_v54 = vpop.permute.xlu2 %1521 }
  0xc4   :  { %v5290_v23 = vpop.permute.xlu1 %1274  ;;  %v5292_v25 = vpop.permute.xlu0 %1206  ;;  %834 = vmatmul.f32.vlgmr.msrb.gmra.mxu1 %v4960_v1  ;;  %v521_v24 = vadd.f32 %v5249_v37, %v485_v46  ;;  %v206_v37 = vld [vmem:[#allocation2 + $0x1f0] sm:$0xff] }
  0xc5   :  { %v418_v32 = vpop.f32.mrf.mxu0  ;;  %966 = vmatpush.msra.mxu1 %v215_v35 }
  0xc6   :  { %v454_v33 = vadd.f32 %v453_v55, %v418_v32  ;;  %4404 = vmatmul.msk.f32.gmra.mxu3 %vm351_vm1, %v5299_v27  ;;  %v1101_v36 = vrot.slane %v521_v24, 5 }
  0xc7   :  { %967 = vmatpush.msra.mxu1 %v206_v37 }
  0xc8   :  { %v1035_v1 = vrot.slane %v454_v33, 4  ;;  %779 = vmatmul.f32.gmra.mxu0 %v5076_v7  ;;  %v1118_v41 = vsel %vm1100_vm2, 0.0, %v1101_v36  ;;  %4401 = vmatmul.msk.f32.gmra.mxu2 %vm351_vm1, %v5030_v39  ;;  %v459_v47 = vpop.f32.mrf.mxu1 }
  0xc9   :  { %v5307_v48 = vpop.f32.mrf.mxu3  ;;  %v1156_v61 = vmul.f32 %v5170_v26, %v1118_v41  ;;  %v188_v26 = vld [vmem:[#allocation2 + $0x160] sm:$0xff]  ;;  %968 = vmatpush.msra.mxu1 %v197_v52 }
  0xca   :  { %v1036_v51 = vsel %vm370_vm0, %v1034_v11, %v1035_v1  ;;  %v170_v11 = vld [vmem:[#allocation2 + $0xd0] sm:$0xff] }
  0xcb   :  { %v1089_v53 = vmul.f32 %v5193_v45, %v1036_v51  ;;  %v5316_v59 = vadd.f32 %v1156_v61, %v1088_v21  ;;  %v488_v0 = vpop.f32.mrf.mxu2  ;;  %v296_v45 = vld [vmem:[#allocation2 + $0x4c0] sm:$0xff]  ;;  %969 = vmatpush.msra.mxu1 %v188_v26  ;;  %v5345_v41 = vpop.permute.xlu2 %1211 }
  0xcc   :  { %v5314_v55 = vpop.permute.xlu1 %1453  ;;  %v5318_v39 = vpop.permute.xlu0 %1385  ;;  %837 = vmatmul.f32.gmra.mxu1 %v4985_v14  ;;  %v524_v4 = vadd.f32 %v5267_v56, %v488_v0  ;;  %1008 = vmatpush.msra.mxu3 %v296_v45  ;;  %v5332_v56 = vld [vmem:[%s6969_s25] sm:$0xff]  ;;  %7006 = vst [vmem:[#allocation14_spill] sm:$0xff] %v5345_v41 }
  0xcd   :  { %7004 = vst [vmem:[#allocation12_spill] sm:$0xff] %v5316_v59  ;;  %v421_v5 = vpop.f32.mrf.mxu0  ;;  %970 = vmatpush.msra.mxu1 %v179_v6 }
  0xce   :  { %v457_v30 = vadd.f32 %v456_v13, %v421_v5  ;;  %4405 = vmatmul.msk.f32.gmra.mxu3 %vm351_vm1, %v5325_v10  ;;  %v1102_v9 = vrot.slane %v524_v4, 5 }
  0xcf   :  { %971 = vmatpush.msra.mxu1 %v170_v11 }
  0xd0   :  { %v1037_v14 = vrot.slane %v457_v30, 4  ;;  %904 = vmatmul.f32.vlgmr.msrb.gmra.mxu0 %v5332_v56  ;;  %v1103_v13 = vsel %vm1100_vm2, %v1101_v36, %v1102_v9  ;;  %4410 = vmatmul.msk.f32.vlgmr.msrb.gmra.mxu2 %vm351_vm1, %v5277_v8  ;;  %v462_v18 = vpop.f32.mrf.mxu1  ;;  %v152_v36 = vld [vmem:[#allocation2 + $0x40] sm:$0xff] }
  0xd1   :  { %v532_v19 = vpop.f32.mrf.mxu3  ;;  %v1157_v21 = vmul.f32 %v5191_v44, %v1103_v13  ;;  %972 = vmatpush.msra.mxu1 %v161_v29 }
  0xd2   :  { %v1038_v46 = vsel %vm370_vm0, %v1035_v1, %v1037_v14 }
  0xd3   :  { %v1090_v31 = vmul.f32 %v5269_v63, %v1038_v46  ;;  %v5341_v32 = vadd.f32 %v1157_v21, %v1089_v53  ;;  %v491_v35 = vpop.f32.mrf.mxu2  ;;  %v5350_v63 = vld [vmem:[%s6969_s25 + $0x38] sm:$0xff]  ;;  %973 = vmatpush.msra.mxu1 %v152_v36 }
  0xd4   :  { %v1144_v24 = vpop.permute.xlu1 %1143  ;;  %v1076_v33 = vpop.permute.xlu0 %1075  ;;  %840 = vmatmul.f32.gmra.mxu1 %v5011_v28  ;;  %v527_v37 = vadd.f32 %v5286_v15, %v491_v35  ;;  %v5357_v28 = vld [vmem:[%s6969_s25 + $0x10] sm:$0xff] }
  0xd5   :  { %7005 = vst [vmem:[#allocation13_spill] sm:$0xff] %v5341_v32  ;;  %v424_v38 = vpop.f32.mrf.mxu0 }
  0xd6   :  { %v460_v44 = vadd.f32 %v459_v47, %v424_v38  ;;  %4406 = vmatmul.msk.f32.gmra.mxu3 %vm351_vm1, %v5350_v63  ;;  %v1104_v1 = vrot.slane %v527_v37, 5 }
  0xd8   :  { %v1039_v61 = vrot.slane %v460_v44, 4  ;;  %907 = vmatmul.f32.gmra.mxu0 %v5357_v28  ;;  %v1105_v15 = vsel %vm1100_vm2, %v1102_v9, %v1104_v1  ;;  %4411 = vmatmul.msk.f32.gmra.mxu2 %vm351_vm1, %v5299_v27  ;;  %v465_v47 = vpop.f32.mrf.mxu1  ;;  %v5406_v44 = vld [vmem:[%s6969_s25 + $0x58] sm:$0xff] }
  0xd9   :  { %v535_v51 = vpop.f32.mrf.mxu3  ;;  %v1158_v52 = vmul.f32 %v5259_v49, %v1105_v15  ;;  %v5376_v49 = vld [vmem:[%s6969_s25 + $0x48] sm:$0xff] }
  0xda   :  { %v1040_v53 = vsel %vm370_vm0, %v1037_v14, %v1039_v61  ;;  %v5380_v14 = vpop.permute.xlu2 %1390 }
  0xdb   :  { %v1091_v58 = vmul.f32 %v1076_v33, %v1040_v53  ;;  %v5367_v26 = vadd.f32 %v1158_v52, %v1090_v31  ;;  %v494_v5 = vpop.f32.mrf.mxu2  ;;  %7009 = vst [vmem:[#allocation17_spill] sm:$0xff] %v5380_v14 }
  0xdc   :  { %v5365_v0 = vpop.permute.xlu1 %1322  ;;  %v5369_v4 = vpop.permute.xlu0 %1279  ;;  %843 = vmatmul.f32.gmra.mxu1 %v5037_v43  ;;  %v530_v45 = vadd.f32 %v5307_v48, %v494_v5  ;;  %v5385_v43 = vld [vmem:[%s6969_s25 + $0x20] sm:$0xff] }
  0xdd   :  { %7007 = vst [vmem:[#allocation15_spill] sm:$0xff] %v5365_v0  ;;  %v427_v30 = vpop.f32.mrf.mxu0 }
  0xde   :  { %7008 = vst [vmem:[#allocation16_spill] sm:$0xff] %v5369_v4  ;;  %v463_v6 = vadd.f32 %v462_v18, %v427_v30  ;;  %4407 = vmatmul.msk.f32.gmra.mxu3 %vm351_vm1, %v5376_v49  ;;  %v1106_v9 = vrot.slane %v530_v45, 5 }
  0xe0   :  { %v1041_v11 = vrot.slane %v463_v6, 4  ;;  %910 = vmatmul.f32.gmra.mxu0 %v5385_v43  ;;  %v1107_v48 = vsel %vm1100_vm2, %v1104_v1, %v1106_v9  ;;  %4412 = vmatmul.msk.f32.gmra.mxu2 %vm351_vm1, %v5325_v10  ;;  %v5391_v13 = vpop.f32.mrf.mxu1 }
  0xe1   :  { %v5393_v18 = vpop.f32.mrf.mxu3  ;;  %v1159_v21 = vmul.f32 %v1144_v24, %v1107_v48 }
  0xe2   :  { %v1042_v46 = vsel %vm370_vm0, %v1039_v61, %v1041_v11  ;;  %v5413_v61 = vld [vmem:[%s6969_s25 + $0x30] sm:$0xff]  ;;  %v1081_v53 = vpop.permute.xlu2 %1080  ;;  %v591_v20 = vadd.f32 %v5393_v18, %v5391_v13 }
  0xe3   :  { %v5398_v31 = vadd.f32 %v1159_v21, %v1091_v58  ;;  %v497_v35 = vpop.f32.mrf.mxu2  ;;  %v1092_v30 = vmul.f32 %v1081_v53, %v1042_v46 }
  0xe4   :  { %v5396_v29 = vpop.permute.xlu1 %1526  ;;  %v5400_v33 = vpop.permute.xlu0 %1458  ;;  %846 = vmatmul.f32.gmra.mxu1 %v5057_v57  ;;  %v533_v36 = vadd.f32 %v532_v19, %v497_v35 }
  0xe5   :  { %7010 = vst [vmem:[#allocation18_spill] sm:$0xff] %v5396_v29  ;;  %v430_v37 = vpop.f32.mrf.mxu0 }
  0xe6   :  { %7011 = vst [vmem:[#allocation19_spill] sm:$0xff] %v5398_v31  ;;  %v466_v38 = vadd.f32 %v465_v47, %v430_v37  ;;  %4408 = vmatmul.msk.f32.gmra.mxu3 %vm351_vm1, %v5406_v44  ;;  %v1108_v24 = vrot.slane %v533_v36, 5 }
  0xe7   :  { %7012 = vst [vmem:[#allocation20_spill] sm:$0xff] %v5400_v33 }
  0xe8   :  { %v1043_v1 = vrot.slane %v466_v38, 4  ;;  %913 = vmatmul.f32.gmra.mxu0 %v5413_v61  ;;  %4413 = vmatmul.msk.f32.gmra.mxu2 %vm351_vm1, %v5350_v63  ;;  %v1109_v47 = vsel %vm1100_vm2, %v1106_v9, %v1108_v24 }
  0xe9   :  { %v558_v19 = vpop.f32.mrf.mxu1  ;;  %v593_v15 = vpop.f32.mrf.mxu3 }
  0xea   :  { %v1044_v52 = vsel %vm370_vm0, %v1041_v11, %v1043_v1 }
  0xeb   :  { %v500_v45 = vpop.f32.mrf.mxu2 }
  0xec   :  { %v5420_v58 = vpop.permute.xlu1 %1216  ;;  %v1149_v5 = vpop.permute.xlu0 %1148  ;;  %849 = vmatmul.f32.gmra.mxu1 %v5076_v7  ;;  %v536_v48 = vadd.f32 %v535_v51, %v500_v45 }
  0xed   :  { %7013 = vst [vmem:[#allocation21_spill] sm:$0xff] %v5420_v58  ;;  %v1160_v6 = vmul.f32 %v1149_v5, %v1109_v47  ;;  %v5423_v21 = vpop.f32.mrf.mxu0 }
  0xee   :  { %4417 = vmatmul.msk.f32.vlgmr.msra.gmra.mxu3 %vm351_vm1, %v5277_v8  ;;  %v1110_v9 = vrot.slane %v536_v48, 5 }
  0xef   :  { %v5427_v35 = vadd.f32 %v1160_v6, %v1092_v30 }
  0xf0   :  { %916 = vmatmul.f32.gmra.mxu0 %v5057_v57  ;;  %4414 = vmatmul.msk.f32.gmra.mxu2 %vm351_vm1, %v5376_v49  ;;  %v1111_v37 = vsel %vm1100_vm2, %v1108_v24, %v1110_v9 }
  0xf1   :  { %7014 = vst [vmem:[#allocation22_spill] sm:$0xff] %v5427_v35  ;;  %v561_v11 = vpop.f32.mrf.mxu1  ;;  %v596_v36 = vpop.f32.mrf.mxu3 }
  0xf3   :  { %v5437_v38 = vpop.f32.mrf.mxu2 }
  0xf4   :  { %v5433_v46 = vpop.permute.xlu1 %1395  ;;  %v5435_v51 = vpop.permute.xlu0 %1327  ;;  %974 = vmatmul.f32.vlgmr.msra.gmra.mxu1 %v5332_v56 }
  0xf5   :  { %7015 = vst [vmem:[#allocation23_spill] sm:$0xff] %v5433_v46  ;;  %v628_v8 = vpop.f32.mrf.mxu0 }
  0xf6   :  { %7016 = vst [vmem:[#allocation24_spill] sm:$0xff] %v5435_v51  ;;  %4418 = vmatmul.msk.f32.gmra.mxu3 %vm351_vm1, %v5299_v27  ;;  %v5456_v27 = vadd.f32 %v596_v36, %v561_v11 }
  0xf8   :  { %919 = vmatmul.f32.gmra.mxu0 %v5076_v7  ;;  %4415 = vmatmul.msk.f32.gmra.mxu2 %vm351_vm1, %v5406_v44  ;;  %7019 = vst [vmem:[#allocation27_spill] sm:$0xff] %v5456_v27  ;;  %v5458_v7 = vadd.f32 %v593_v15, %v558_v19  ;;  %v6982_v30 = vrot.slane %v5456_v27, 6 }
  0xf9   :  { %v5445_v57 = vpop.f32.mrf.mxu1  ;;  %v5447_v24 = vpop.f32.mrf.mxu3 }
  0xfb   :  { %v663_v53 = vpop.f32.mrf.mxu2 }
  0xfc   :  { %v5449_v1 = vpop.permute.xlu1 %1578  ;;  %v5451_v47 = vpop.permute.xlu0 %1531  ;;  %977 = vmatmul.f32.gmra.mxu1 %v5357_v28  ;;  %v5465_v6 = vadd.f32 %v663_v53, %v628_v8 }
  0xfd   :  { %7017 = vst [vmem:[#allocation25_spill] sm:$0xff] %v5449_v1  ;;  %v631_v56 = vpop.f32.mrf.mxu0 }
  0xfe   :  { %7018 = vst [vmem:[#allocation26_spill] sm:$0xff] %v5451_v47  ;;  %4419 = vmatmul.msk.f32.gmra.mxu3 %vm351_vm1, %v5325_v10  ;;  %v6984_v10 = vrot.slane %v5458_v7, 6 }
 0x100   :  { %v1173_v15 = vsel %vm1168_vm3, %v6984_v10, %v6982_v30 }
 0x101   :  { %v5460_v5 = vpop.f32.mrf.mxu1  ;;  %v5462_v45 = vpop.f32.mrf.mxu3  ;;  %v1226_v53 = vmul.f32 %v5292_v25, %v1173_v15 }
 0x103   :  { %v666_v28 = vpop.f32.mrf.mxu2 }
 0x104   :  { %v1154_v48 = vpop.permute.xlu1 %1153  ;;  %v1086_v35 = vpop.permute.xlu0 %1085  ;;  %980 = vmatmul.f32.gmra.mxu1 %v5385_v43  ;;  %v5469_v36 = vadd.f32 %v666_v28, %v631_v56 }
 0x105   :  { %v1161_v9 = vmul.f32 %v1154_v48, %v1111_v37  ;;  %v1093_v11 = vmul.f32 %v1086_v35, %v1044_v52  ;;  %v5471_v19 = vpop.f32.mrf.mxu0  ;;  %v6983_v37 = vrot.slane %v5465_v6, 7 }
 0x106   :  { %7020 = vst [vmem:[#allocation28_spill] sm:$0xff] %v5469_v36  ;;  %4420 = vmatmul.msk.f32.gmra.mxu3 %vm351_vm1, %v5350_v63  ;;  %v6981_v52 = vrot.slane %v5469_v36, 7 }
 0x107   :  { %v5481_v43 = vadd.f32 %v1161_v9, %v1093_v11 }
 0x108   :  { %v1241_v35 = vsel %vm1236_vm4, %v6983_v37, %v6981_v52 }
 0x109   :  { %7021 = vst [vmem:[#allocation29_spill] sm:$0xff] %v5481_v43  ;;  %v5489_v63 = vpop.f32.mrf.mxu1  ;;  %v5491_v8 = vpop.f32.mrf.mxu3  ;;  %v1294_v56 = vmul.f32 %v5290_v23, %v1241_v35  ;;  %v4662_v23 = vld [vmem:[%s6969_s25 + $0x40] sm:$0xff]  ;;  %v4663_v35 = vld [vmem:[%s6969_s25 + $0x50] sm:$0xff]  ;;  %s7088_s25 = sld [smem:[#allocation51_spill]] }
 0x10a   :  { %7022 = vst [vmem:[#allocation30_spill] sm:$0xff] %v5489_v63  ;;  %v5549_v63 = vpop.permute.xlu2 %1284 }
 0x10b   :  { %7023 = vst [vmem:[#allocation31_spill] sm:$0xff] %v5491_v8  ;;  %v1620_v48 = vadd.f32 %v1294_v56, %v1226_v53  ;;  %v5495_v9 = vpop.f32.mrf.mxu2 }
 0x10c   :  { %983 = vmatmul.f32.gmra.mxu1 %v5413_v61  ;;  %7038 = vst [vmem:[#allocation46_spill] sm:$0xff] %v5549_v63 }
 0x10d   :  { %v5498_v28 = vpop.f32.mrf.mxu0  ;;  %v5501_v11 = vadd.f32 %v1620_v48, %v5367_v26 }
 0x10e   :  { %7024 = vst [vmem:[#allocation32_spill] sm:$0xff] %v5498_v28  ;;  %4421 = vmatmul.msk.f32.gmra.mxu3 %vm351_vm1, %v5376_v49 }
 0x111   :  { %v5505_v52 = vpop.f32.mrf.mxu1  ;;  %v5507_v30 = vpop.f32.mrf.mxu3 }
 0x112   :  { %v5557_v28 = vpop.permute.xlu2 %1463 }
 0x113   :  { %v5509_v25 = vpop.f32.mrf.mxu2  ;;  %7040 = vst [vmem:[#allocation48_spill] sm:$0xff] %v5557_v28 }
 0x114   :  { %7025 = vst [vmem:[#allocation33_spill] sm:$0xff] %v5509_v25  ;;  %986 = vmatmul.f32.gmra.mxu1 %v4662_v23 }
 0x115   :  { %v5514_v61 = vpop.f32.mrf.mxu0 }
 0x116   :  { %7026 = vst [vmem:[#allocation34_spill] sm:$0xff] %v5514_v61  ;;  %4422 = vmatmul.msk.f32.gmra.mxu3 %vm351_vm1, %v5406_v44 }
 0x119   :  { %v5518_v26 = vpop.f32.mrf.mxu1  ;;  %v5520_v15 = vpop.f32.mrf.mxu3 }
 0x11b   :  { %v5522_v49 = vpop.f32.mrf.mxu2 }
 0x11c   :  { %7027 = vst [vmem:[#allocation35_spill] sm:$0xff] %v5522_v49  ;;  %989 = vmatmul.f32.gmra.mxu1 %v4663_v35 }
 0x11d   :  { %v765_v53 = vpop.f32.mrf.mxu0 }
 0x121   :  { %v701_v56 = vpop.f32.mrf.mxu1  ;;  %v736_v48 = vpop.f32.mrf.mxu3 }
 0x122   :  { %v737_v18 = vadd.f32 %v736_v48, %v701_v56  ;;  %v5586_v48 = vpop.permute.xlu2 %1583 }
 0x123   :  { %v800_v23 = vpop.f32.mrf.mxu2 }
 0x125   :  { %v5527_v37 = vpop.f32.mrf.mxu0 }
 0x129   :  { %v5529_v10 = vpop.f32.mrf.mxu1  ;;  %v5531_v44 = vpop.f32.mrf.mxu3 }
 0x12a   :  { %7028 = vst [vmem:[#allocation36_spill] sm:$0xff] %v5529_v10 }
 0x12b   :  { %7029 = vst [vmem:[#allocation37_spill] sm:$0xff] %v5531_v44  ;;  %v803_v43 = vpop.f32.mrf.mxu2 }
 0x12d   :  { %v771_v51 = vpop.f32.mrf.mxu0 }
 0x131   :  { %v5533_v46 = vpop.f32.mrf.mxu1  ;;  %v5535_v47 = vpop.f32.mrf.mxu3 }
 0x132   :  { %7030 = vst [vmem:[#allocation38_spill] sm:$0xff] %v5533_v46 }
 0x133   :  { %7031 = vst [vmem:[#allocation39_spill] sm:$0xff] %v5535_v47  ;;  %v806_v0 = vpop.f32.mrf.mxu2 }
 0x135   :  { %v774_v31 = vpop.f32.mrf.mxu0 }
 0x139   :  { %v5537_v33 = vpop.f32.mrf.mxu1  ;;  %v5539_v35 = vpop.f32.mrf.mxu3 }
 0x13a   :  { %7032 = vst [vmem:[#allocation40_spill] sm:$0xff] %v5537_v33 }
 0x13b   :  { %7033 = vst [vmem:[#allocation41_spill] sm:$0xff] %v5539_v35  ;;  %v809_v14 = vpop.f32.mrf.mxu2 }
 0x13c   :  { %v5555_v25 = vadd.f32 %v809_v14, %v774_v31  ;;  %v661_v14 = vadd.f32 %v5437_v38, %v5423_v21 }
 0x13d   :  { %v5541_v58 = vpop.f32.mrf.mxu0 }
 0x13e   :  { %7034 = vst [vmem:[#allocation42_spill] sm:$0xff] %v5541_v58  ;;  %v1353_v63 = vrot.slane %v5555_v25, 1 }
 0x141   :  { %v835_v29 = vpop.f32.mrf.mxu1  ;;  %v870_v49 = vpop.f32.mrf.mxu3 }
 0x143   :  { %v5543_v10 = vpop.f32.mrf.mxu2 }
 0x144   :  { %7035 = vst [vmem:[#allocation43_spill] sm:$0xff] %v5543_v10 }
 0x145   :  { %v5545_v44 = vpop.f32.mrf.mxu0 }
 0x146   :  { %7036 = vst [vmem:[#allocation44_spill] sm:$0xff] %v5545_v44 }
 0x149   :  { %v838_v61 = vpop.f32.mrf.mxu1  ;;  %v873_v4 = vpop.f32.mrf.mxu3 }
 0x14b   :  { %v5547_v46 = vpop.f32.mrf.mxu2 }
 0x14c   :  { %7037 = vst [vmem:[#allocation45_spill] sm:$0xff] %v5547_v46  ;;  %v5559_v46 = vadd.f32 %v806_v0, %v771_v51 }
 0x14d   :  { %v905_v47 = vpop.f32.mrf.mxu0 }
 0x14e   :  { %v1351_v0 = vrot.slane %v5559_v46, 1  ;;  %v801_v46 = vadd.f32 %v800_v23, %v765_v53 }
 0x151   :  { %v841_v32 = vpop.f32.mrf.mxu1  ;;  %v876_v41 = vpop.f32.mrf.mxu3 }
 0x152   :  { %v5566_v34 = vadd.f32 %v876_v41, %v841_v32  ;;  %v1354_v32 = vsel %vm1347_vm5, %v1351_v0, %v1353_v63 }
 0x153   :  { %v940_v1 = vpop.f32.mrf.mxu2 }
 0x154   :  { %v1419_v41 = vrot.slane %v5566_v34, 2  ;;  %v941_v21 = vadd.f32 %v940_v1, %v905_v47  ;;  %v1405_v34 = vmul.f32 %v5318_v39, %v1354_v32  ;;  %v871_v1 = vadd.f32 %v870_v49, %v835_v29 }
 0x155   :  { %v908_v33 = vpop.f32.mrf.mxu0 }
 0x156   :  { %v1484_v53 = vrot.slane %v941_v21, 3  ;;  %v1416_v49 = vrot.slane %v871_v1, 2  ;;  %v5624_v1 = vpop.permute.xlu2 %1221 }
 0x159   :  { %v844_v8 = vpop.f32.mrf.mxu1  ;;  %v879_v35 = vpop.f32.mrf.mxu3 }
 0x15a   :  { %v5561_v27 = vadd.f32 %v879_v35, %v844_v8  ;;  %v1169_v35 = vrot.slane %v591_v20, 6 }
 0x15b   :  { %v943_v59 = vpop.f32.mrf.mxu2 }
 0x15c   :  { %v1421_v51 = vrot.slane %v5561_v27, 2  ;;  %v944_v38 = vadd.f32 %v943_v59, %v908_v33 }
 0x15d   :  { %v911_v58 = vpop.f32.mrf.mxu0 }
 0x15e   :  { %v1422_v20 = vsel %vm1415_vm6, %v1419_v41, %v1421_v51 }
 0x15f   :  { %v1473_v23 = vmul.f32 %v5314_v55, %v1422_v20  ;;  %v7042_v55 = vrot.slane %v5458_v7, 6  ;;  %v5606_v20 = vadd.f32 %v5447_v24, %v5445_v57  ;;  %v731_v57 = vadd.f32 %v5507_v30, %v5505_v52 }
 0x161   :  { %v5551_v36 = vpop.f32.mrf.mxu1  ;;  %v5553_v10 = vpop.f32.mrf.mxu3 }
 0x162   :  { %7039 = vst [vmem:[#allocation47_spill] sm:$0xff] %v5551_v36 }
 0x163   :  { %v946_v44 = vpop.f32.mrf.mxu2 }
 0x164   :  { %v947_v8 = vadd.f32 %v946_v44, %v911_v58  ;;  %v804_v44 = vadd.f32 %v803_v43, %v5527_v37  ;;  %v1186_v37 = vsel %vm1168_vm3, 0.0, %v1169_v35 }
 0x165   :  { %v914_v31 = vpop.f32.mrf.mxu0  ;;  %v1224_v21 = vmul.f32 %v5154_v16, %v1186_v37  ;;  %v7043_v16 = vrot.slane %v5465_v6, 7 }
 0x166   :  { %v1487_v58 = vrot.slane %v947_v8, 3  ;;  %v1485_v8 = vrot.slane %v944_v38, 3  ;;  %v1349_v43 = vrot.slane %v804_v44, 1  ;;  %v1171_v38 = vsel %vm1168_vm3, %v1169_v35, %v7042_v55 }
 0x169   :  { %v5568_v40 = vpop.f32.mrf.mxu1  ;;  %v5570_v36 = vpop.f32.mrf.mxu3 }
 0x16a   :  { %7041 = vst [vmem:[#allocation49_spill] sm:$0xff] %v5570_v36  ;;  %v1237_v36 = vrot.slane %v661_v14, 7  ;;  %v1337_v14 = vmul.f32 %v5281_v12, %v737_v18  ;;  %v1486_v18 = vsel %vm1483_vm7, %v1484_v53, %v1485_v8  ;;  %v1174_v53 = vrot.slane %v5606_v20, 6  ;;  %v5656_v20 = vpop.permute.xlu0 %1289 }
 0x16b   :  { %v949_v13 = vpop.f32.mrf.mxu2  ;;  %v1539_v24 = vmul.f32 %v5239_v22, %v1486_v18  ;;  %v7050_v18 = vld [vmem:[#allocation33_spill] sm:$0xff] }
 0x16c   :  { %v5580_v28 = vadd.f32 %v949_v13, %v914_v31  ;;  %v874_v31 = vadd.f32 %v873_v4, %v838_v61  ;;  %v1254_v39 = vsel %vm1236_vm4, 0.0, %v1237_v36  ;;  %v1348_v4 = vrot.slane %v801_v46, 1 }
 0x16d   :  { %v1626_v12 = vadd.f32 %v1405_v34, %v1337_v14  ;;  %v1488_v34 = vsel %vm1483_vm7, %v1485_v8, %v1487_v58  ;;  %v1239_v7 = vsel %vm1236_vm4, %v1237_v36, %v7043_v16  ;;  %v734_v36 = vadd.f32 %v5520_v15, %v5518_v26  ;;  %v917_v22 = vpop.f32.mrf.mxu0  ;;  %v7053_v16 = vld [vmem:[#allocation42_spill] sm:$0xff] }
 0x16e   :  { %v1489_v56 = vrot.slane %v5580_v28, 3  ;;  %v1417_v29 = vrot.slane %v874_v31, 2  ;;  %v1350_v46 = vsel %vm1347_vm5, %v1348_v4, %v1349_v43  ;;  %v1540_v30 = vmul.f32 %v5271_v2, %v1488_v34 }
 0x170   :  { %v1490_v59 = vsel %vm1483_vm7, %v1487_v58, %v1489_v56  ;;  %v1418_v44 = vsel %vm1415_vm6, %v1416_v49, %v1417_v29  ;;  %v1420_v58 = vsel %vm1415_vm6, %v1417_v29, %v1419_v41  ;;  %v7049_v49 = vld [vmem:[#allocation32_spill] sm:$0xff] }
 0x171   :  { %v975_v33 = vpop.f32.mrf.mxu1  ;;  %v1010_v47 = vpop.f32.mrf.mxu3  ;;  %v1541_v13 = vmul.f32 %v5312_v54, %v1490_v59  ;;  %v1292_v54 = vmul.f32 %v5214_v62, %v1254_v39  ;;  %v5619_v62 = vadd.f32 %v5495_v9, %v5471_v19  ;;  %v1403_v19 = vmul.f32 %v5234_v17, %v1350_v46  ;;  %v7044_v17 = vld [vmem:[#allocation11_spill] sm:$0xff]  ;;  %v7046_v39 = vld [vmem:[#allocation10_spill] sm:$0xff]  ;;  %v7051_v46 = vld [vmem:[#allocation28_spill] sm:$0xff] }
 0x172   :  { %v1011_v6 = vadd.f32 %v1010_v47, %v975_v33  ;;  %v1471_v9 = vmul.f32 %v5253_v42, %v1418_v44  ;;  %v1335_v33 = vmul.f32 %v5196_v50, %v731_v57  ;;  %v1472_v15 = vmul.f32 %v7044_v17, %v1420_v58  ;;  %v7045_v47 = vld [vmem:[#allocation9_spill] sm:$0xff]  ;;  %v7055_v57 = vld [vmem:[#allocation47_spill] sm:$0xff]  ;;  %v7057_v58 = vld [vmem:[#allocation30_spill] sm:$0xff] }
 0x173   :  { %v1632_v61 = vadd.f32 %v1541_v13, %v1473_v23  ;;  %v952_v52 = vpop.f32.mrf.mxu2  ;;  %v1293_v23 = vmul.f32 %v5212_v60, %v1239_v7  ;;  %v1225_v2 = vmul.f32 %v7045_v47, %v1171_v38  ;;  %v1242_v8 = vrot.slane %v5619_v62, 7  ;;  %v7054_v7 = vld [vmem:[#allocation43_spill] sm:$0xff] }
 0x174   :  { %v1630_v42 = vadd.f32 %v1539_v24, %v1471_v9  ;;  %v1551_v13 = vrot.slane %v1011_v6, 4  ;;  %v1618_v37 = vadd.f32 %v1292_v54, %v1224_v21  ;;  %v1336_v60 = vmul.f32 %v7046_v39, %v734_v36  ;;  %v7058_v6 = vld [vmem:[#allocation31_spill] sm:$0xff] }
 0x175   :  { %v1644_v32 = vadd.f32 %v1632_v61, %v1626_v12  ;;  %v1624_v4 = vadd.f32 %v1403_v19, %v1335_v33  ;;  %v1619_v50 = vadd.f32 %v1293_v23, %v1225_v2  ;;  %v5648_v29 = vadd.f32 %v952_v52, %v917_v22  ;;  %v7059_v19 = vld [vmem:[#allocation25_spill] sm:$0xff]  ;;  %v5674_v52 = vpop.permute.xlu2 %1400  ;;  %v920_v47 = vpop.f32.mrf.mxu0 }
 0x176   :  { %v7052_v44 = vrot.slane %v7051_v46, 7  ;;  %v5663_v62 = vadd.f32 %v7054_v7, %v7053_v16  ;;  %v5667_v24 = vadd.f32 %v5553_v10, %v7055_v57  ;;  %v7061_v33 = vld [vmem:[#allocation13_spill] sm:$0xff]  ;;  %v7062_v10 = vld [vmem:[#allocation16_spill] sm:$0xff] }
 0x177   :  { %v5612_v31 = vadd.f32 %v1644_v32, %v5501_v11  ;;  %v1352_v11 = vsel %vm1347_vm5, %v1349_v43, %v1351_v0  ;;  %v5637_v0 = vadd.f32 %v5462_v45, %v5460_v5  ;;  %v1631_v43 = vadd.f32 %v1540_v30, %v1472_v15  ;;  %v7047_v5 = vld [vmem:[#allocation27_spill] sm:$0xff]  ;;  %v7060_v30 = vld [vmem:[#allocation14_spill] sm:$0xff]  ;;  %v7069_v16 = vld [vmem:[#allocation37_spill] sm:$0xff] }
 0x178   :  { %v1404_v26 = vmul.f32 %v5217_v3, %v1352_v11  ;;  %v7048_v45 = vrot.slane %v7047_v5, 6  ;;  %v5654_v32 = vadd.f32 %v7050_v18, %v7049_v49  ;;  %v1642_v55 = vadd.f32 %v1630_v42, %v1624_v4 }
 0x179   :  { %v978_v35 = vpop.f32.mrf.mxu1  ;;  %v1013_v14 = vpop.f32.mrf.mxu3  ;;  %v1176_v61 = vrot.slane %v5637_v0, 6  ;;  %v1243_v34 = vsel %vm1236_vm4, %v7052_v44, %v1242_v8  ;;  %v1491_v23 = vrot.slane %v5648_v29, 3  ;;  %v1423_v39 = vrot.slane %v5667_v24, 2  ;;  %v7064_v29 = vld [vmem:[#allocation35_spill] sm:$0xff] }
 0x17a   :  { %v1014_v59 = vadd.f32 %v1013_v14, %v978_v35  ;;  %v1175_v12 = vsel %vm1168_vm3, %v7048_v45, %v1174_v53  ;;  %v1625_v21 = vadd.f32 %v1404_v26, %v1336_v60  ;;  %v7056_v14 = vld [vmem:[#allocation12_spill] sm:$0xff]  ;;  %v1637_v26 = vadd.f32 %v1619_v50, %v7061_v33  ;;  %v7063_v50 = vld [vmem:[#allocation34_spill] sm:$0xff] }
 0x17b   :  { %v1636_v11 = vadd.f32 %v1618_v37, %v7056_v14  ;;  %v1227_v22 = vmul.f32 %v7060_v30, %v1175_v12  ;;  %v1295_v17 = vmul.f32 %v7062_v10, %v1243_v34  ;;  %v1244_v15 = vrot.slane %v5654_v32, 7  ;;  %v955_v2 = vpop.f32.mrf.mxu2  ;;  %v5687_v12 = vpop.permute.xlu1 %1332  ;;  %v7065_v32 = vld [vmem:[#allocation44_spill] sm:$0xff]  ;;  %v7074_v30 = vld [vmem:[#allocation19_spill] sm:$0xff] }
 0x17c   :  { %v1552_v41 = vrot.slane %v1014_v59, 4  ;;  %v606_v59 = vadd.f32 %v7058_v6, %v7057_v58  ;;  %v1643_v36 = vadd.f32 %v1631_v43, %v1625_v21  ;;  %v1355_v37 = vrot.slane %v5663_v62, 1  ;;  %v7066_v21 = vld [vmem:[#allocation45_spill] sm:$0xff]  ;;  %v7070_v62 = vld [vmem:[#allocation18_spill] sm:$0xff] }
 0x17d   :  { %v1648_v42 = vadd.f32 %v1642_v55, %v1636_v11  ;;  %v956_v49 = vadd.f32 %v955_v2, %v920_v47  ;;  %v1621_v18 = vadd.f32 %v1295_v17, %v1227_v22  ;;  %v816_v55 = vadd.f32 %v7066_v21, %v7065_v32  ;;  %v7071_v11 = vld [vmem:[#allocation21_spill] sm:$0xff]  ;;  %v1589_v33 = vpop.permute.xlu2 %1588  ;;  %v7075_v17 = vld [vmem:[#allocation46_spill] sm:$0xff]  ;;  %v7076_v47 = vld [vmem:[#allocation15_spill] sm:$0xff] }
 0x17e   :  { %v1553_v3 = vsel %vm370_vm0, %v1551_v13, %v1552_v41  ;;  %v1177_v13 = vsel %vm1168_vm3, %v1174_v53, %v1176_v61  ;;  %v1178_v4 = vrot.slane %v606_v59, 6  ;;  %v1649_v45 = vadd.f32 %v1643_v36, %v1637_v26  ;;  %v7073_v36 = vld [vmem:[#allocation20_spill] sm:$0xff] }
 0x17f   :  { %v1606_v9 = vmul.f32 %v7059_v19, %v1553_v3  ;;  %v676_v3 = vadd.f32 %v7064_v29, %v7063_v50  ;;  %v1492_v53 = vsel %vm1483_vm7, %v1489_v56, %v1491_v23  ;;  %v1356_v46 = vsel %vm1347_vm5, %v1353_v63, %v1355_v37  ;;  %v7067_v56 = vld [vmem:[#allocation49_spill] sm:$0xff]  ;;  %v1469_v63 = vpop.permute.xlu0 %1468  ;;  %v7078_v50 = vld [vmem:[#allocation39_spill] sm:$0xff] }
 0x180   :  { %v1424_v28 = vsel %vm1415_vm6, %v1421_v51, %v1423_v39  ;;  %v886_v44 = vadd.f32 %v7067_v56, %v5568_v40  ;;  %v1542_v57 = vmul.f32 %v7070_v62, %v1492_v53  ;;  %v1493_v27 = vrot.slane %v956_v49, 3  ;;  %v7072_v40 = vld [vmem:[#allocation17_spill] sm:$0xff] }
 0x181   :  { %v981_v38 = vpop.f32.mrf.mxu1  ;;  %v1016_v54 = vpop.f32.mrf.mxu3  ;;  %v5684_v43 = vadd.f32 %v1648_v42, %v1606_v9  ;;  %v1228_v58 = vmul.f32 %v7071_v11, %v1177_v13  ;;  %v1406_v6 = vmul.f32 %v7072_v40, %v1356_v46  ;;  %v1357_v59 = vrot.slane %v816_v55, 1  ;;  %v7080_v53 = vld [vmem:[#allocation41_spill] sm:$0xff] }
 0x182   :  { %v1017_v35 = vadd.f32 %v1016_v54, %v981_v38  ;;  %v1474_v19 = vmul.f32 %v7073_v36, %v1424_v28  ;;  %v1179_v9 = vsel %vm1168_vm3, %v1176_v61, %v1178_v4  ;;  %v1639_v22 = vadd.f32 %v1621_v18, %v7074_v30  ;;  %v7079_v4 = vld [vmem:[#allocation40_spill] sm:$0xff]  ;;  %v7081_v28 = vld [vmem:[#allocation26_spill] sm:$0xff] }
 0x183   :  { %v1661_v24 = vsel %vm1660_vm8, %v5684_v43, 0.0  ;;  %v1425_v26 = vrot.slane %v886_v44, 2  ;;  %v1501_v61 = vsel %vm1483_vm7, %v1493_v27, 0.0  ;;  %v746_v49 = vadd.f32 %v7080_v53, %v7079_v4  ;;  %v1537_v55 = vpop.permute.xlu1 %1536 }
 0x184   :  { %v1554_v0 = vrot.slane %v1017_v35, 4  ;;  %v1246_v35 = vrot.slane %v676_v3, 7  ;;  %v1494_v3 = vsel %vm1483_vm7, %v1491_v23, %v1493_v27  ;;  %v1544_v44 = vmul.f32 %v1537_v55, %v1501_v61  ;;  %v7084_v27 = vld [vmem:[#allocation24_spill] sm:$0xff] }
 0x185   :  { %v1433_v23 = vsel %vm1415_vm6, %v1425_v26, 0.0  ;;  %v1543_v56 = vmul.f32 %v7081_v28, %v1494_v3  ;;  %v1340_v40 = vmul.f32 %v5687_v12, %v746_v49  ;;  %v4752_v30 = vmov 48.0  }
 0x186   :  { %v1555_v60 = vsel %vm370_vm0, %v1552_v41, %v1554_v0  ;;  %v1245_v41 = vsel %vm1236_vm4, %v1242_v8, %v1244_v15  ;;  %v7068_v8 = vld [vmem:[#allocation36_spill] sm:$0xff]  ;;  %v1247_v13 = vsel %vm1236_vm4, %v1244_v15, %v1246_v35  ;;  %v1365_v15 = vsel %vm1347_vm5, %v1357_v59, 0.0 }
 0x187   :  { %v1607_v5 = vmul.f32 %v5586_v48, %v1555_v60  ;;  %v740_v7 = vadd.f32 %v7069_v16, %v7068_v8  ;;  %v1296_v42 = vmul.f32 %v7075_v17, %v1245_v41  ;;  %v1633_v60 = vadd.f32 %v1542_v57, %v1474_v19  ;;  %v7083_v57 = vld [vmem:[#allocation48_spill] sm:$0xff]  ;;  %v1594_v35 = vpop.permute.xlu0 %1593 }
 0x188   :  { %v1408_v62 = vmul.f32 %v5674_v52, %v1365_v15  ;;  %4624 = vrcp.f32 %v4752_v30 }
 0x189   :  { %v5697_v38 = vadd.f32 %v1649_v45, %v1607_v5  ;;  %v984_v48 = vpop.f32.mrf.mxu1  ;;  %v1019_v54 = vpop.f32.mrf.mxu3  ;;  %v1338_v2 = vmul.f32 %v7076_v47, %v740_v7  ;;  %v7077_v45 = vld [vmem:[#allocation38_spill] sm:$0xff] }
 0x18a   :  { %v1020_v34 = vadd.f32 %v1019_v54, %v984_v48  ;;  %v743_v29 = vadd.f32 %v7078_v50, %v7077_v45  ;;  %v1426_v48 = vsel %vm1415_vm6, %v1423_v39, %v1425_v26  ;;  %v1629_v26 = vadd.f32 %v1408_v62, %v1340_v40 }
 0x18b   :  { %v1662_v25 = vsel %vm1660_vm8, %v5697_v38, 0.0  ;;  %v1627_v18 = vadd.f32 %v1406_v6, %v1338_v2  ;;  %v1475_v39 = vmul.f32 %v7083_v57, %v1426_v48  ;;  %v1599_v45 = vpop.permute.xlu1 %1598 }
 0x18c   :  { %v1663_v14 = vadd.f32 %v1662_v25, %v1661_v24  ;;  %v1556_v51 = vrot.slane %v1020_v34, 4  ;;  %v7082_v34 = vld [vmem:[#allocation23_spill] sm:$0xff]  ;;  %v1476_v24 = vmul.f32 %v1469_v63, %v1433_v23  ;;  %v1229_v25 = vmul.f32 %v5624_v1, %v1179_v9 }
 0x18d   :  { %v1645_v46 = vadd.f32 %v1633_v60, %v1627_v18  ;;  %v1339_v11 = vmul.f32 %v7084_v27, %v743_v29  ;;  %v7085_v60 = vld [vmem:[#allocation22_spill] sm:$0xff] }
 0x18e   :  { %v1557_v10 = vsel %vm370_vm0, %v1554_v0, %v1556_v51  ;;  %v1358_v0 = vsel %vm1347_vm5, %v1355_v37, %v1357_v59  ;;  %v1634_v59 = vadd.f32 %v1543_v56, %v1475_v39 }
 0x18f   :  { %v1608_v5 = vmul.f32 %v1589_v33, %v1557_v10  ;;  %v1407_v8 = vmul.f32 %v7082_v34, %v1358_v0  ;;  %v1651_v19 = vadd.f32 %v1645_v46, %v1639_v22 }
 0x191   :  { %v5731_v41 = vadd.f32 %v5612_v31, %v1608_v5  ;;  %v987_v32 = vpop.f32.mrf.mxu1  ;;  %v1022_v21 = vpop.f32.mrf.mxu3  ;;  %v1297_v31 = vmul.f32 %v5656_v20, %v1247_v13  ;;  %v1635_v20 = vadd.f32 %v1544_v44, %v1476_v24  ;;  %v1628_v33 = vadd.f32 %v1407_v8, %v1339_v11  ;;  %v7086_v13 = vld [vmem:[#allocation29_spill] sm:$0xff] }
 0x192   :  { %v1023_v54 = vadd.f32 %v1022_v21, %v987_v32 }
 0x193   :  { %v1664_v37 = vsel %vm1660_vm8, %v5731_v41, 0.0  ;;  %v1623_v52 = vadd.f32 %v1297_v31, %v1229_v25  ;;  %v1646_v17 = vadd.f32 %v1634_v59, %v1628_v33  ;;  %v1647_v47 = vadd.f32 %v1635_v20, %v1629_v26 }
 0x194   :  { %v1665_v16 = vadd.f32 %v1664_v37, %v1663_v14  ;;  %v1558_v7 = vrot.slane %v1023_v54, 4  ;;  %v1622_v14 = vadd.f32 %v1296_v42, %v1228_v58  ;;  %v4625_v58 = vpop.eup %4624  ;;  %v1604_v42 = vpop.permute.xlu2 %1603 }
 0x195   :  { %v1641_v22 = vadd.f32 %v1623_v52, %v7086_v13  ;;  %v1679_v0 = vmul.f32 48.0, %v4625_v58  ;;  %vm1683_vm9 = vweird.f32 %v4625_v58  ;;  %v1908_v13 = vld [vmem:[%s7087_s4 + $0x18] sm:$0xff] }
 0x196   :  { %v1559_v6 = vsel %vm370_vm0, %v1556_v51, %v1558_v7  ;;  %v1640_v5 = vadd.f32 %v1622_v14, %v7085_v60  ;;  %v1910_v60 = vld [vmem:[%s7087_s4 + $0x28] sm:$0xff] }
 0x197   :  { %v1609_v36 = vmul.f32 %v1594_v35, %v1559_v6  ;;  %v1653_v53 = vadd.f32 %v1647_v47, %v1641_v22  ;;  %v1680_v15 = vsub.f32 1.0, %v1679_v0 }
 0x198   :  { %v1652_v4 = vadd.f32 %v1646_v17, %v1640_v5  ;;  %v1909_v5 = vld [vmem:[%s7087_s4 + $0x20] sm:$0xff] }
 0x199   :  { %v1657_v63 = vadd.f32 %v1651_v19, %v1609_v36  ;;  %v990_v10 = vpop.f32.mrf.mxu1  ;;  %v1025_v1 = vpop.f32.mrf.mxu3  ;;  %v1681_v54 = vmul.f32 %v4625_v58, %v1680_v15 }
 0x19a   :  { %v1026_v9 = vadd.f32 %v1025_v1, %v990_v10 }
 0x19b   :  { %v1666_v12 = vsel %vm1660_vm8, %v1657_v63, 0.0  ;;  %v1682_v56 = vadd.f32 %v4625_v58, %v1681_v54 }
 0x19c   :  { %v1667_v2 = vadd.f32 %v1666_v12, %v1665_v16  ;;  %v1560_v51 = vrot.slane %v1026_v9, 4 }
 0x19d   :  { %v1684_v31 = vsel %vm1683_vm9, %v4625_v58, %v1682_v56  ;;  %v1907_v58 = vld [vmem:[%s7087_s4 + $0x10] sm:$0xff] }
 0x19e   :  { %v1561_v50 = vsel %vm370_vm0, %v1558_v7, %v1560_v51  ;;  %v1568_v29 = vsel %vm370_vm0, %v1560_v51, 0.0  ;;  %v1911_v51 = vld [vmem:[%s7087_s4 + $0x30] sm:$0xff] }
 0x19f   :  { %v1610_v3 = vmul.f32 %v1599_v45, %v1561_v50  ;;  %v1611_v61 = vmul.f32 %v1604_v42, %v1568_v29  ;;  %v1906_v45 = vld [vmem:[%s7087_s4 + $0x8] sm:$0xff]  ;;  %v1905_v29 = vld [vmem:[%s7087_s4] sm:$0xff] }
 0x1a1   :  { %v1658_v49 = vadd.f32 %v1652_v4, %v1610_v3  ;;  %v1659_v18 = vadd.f32 %v1653_v53, %v1611_v61  ;;  %v5787_v61 = vld [vmem:[#allocation6] sm:$0xff] }
 0x1a2   :  { %v1740_v0 = vperm.slane %v5787_v61, 3 }
 0x1a3   :  { %v1668_v32 = vsel %vm1660_vm8, %v1658_v49, 0.0  ;;  %v1670_v55 = vsel %vm1660_vm8, %v1659_v18, 0.0 }
 0x1a4   :  { %v1669_v21 = vadd.f32 %v1668_v32, %v1667_v2  ;;  %v1912_v2 = vld [vmem:[%s7087_s4 + $0x38] sm:$0xff] }
 0x1a5   :  { %1925 = vmatpush.msra.mxu0 %v1912_v2 }
 0x1a6   :  { %v1671_v48 = vadd.f32 %v1670_v55, %v1669_v21 }
 0x1a7   :  { %1926 = vmatpush.msra.mxu0 %v1911_v51 }
 0x1a8   :  { %v1672_v23 = vrot.slane %v1671_v48, 4 }
 0x1a9   :  { %1927 = vmatpush.msra.mxu0 %v1910_v60 }
 0x1aa   :  { %v1673_v46 = vadd.f32 %v1672_v23, %v1671_v48 }
 0x1ab   :  { %1928 = vmatpush.msra.mxu0 %v1909_v5 }
 0x1ac   :  { %v1674_v28 = vrot.slane %v1673_v46, 2 }
 0x1ad   :  { %1929 = vmatpush.msra.mxu0 %v1908_v13 }
 0x1ae   :  { %v1675_v44 = vadd.f32 %v1674_v28, %v1673_v46 }
 0x1af   :  { %1930 = vmatpush.msra.mxu0 %v1907_v58 }
 0x1b0   :  { %v1676_v37 = vrot.slane %v1675_v44, 1 }
 0x1b1   :  { %1931 = vmatpush.msra.mxu0 %v1906_v45 }
 0x1b2   :  { %v1677_v34 = vadd.f32 %v1676_v37, %v1675_v44 }
 0x1b3   :  { %1932 = vmatpush.msra.mxu0 %v1905_v29 }
 0x1b4   :  { %v1685_v8 = vmul.f32 %v1684_v31, %v1677_v34 }
 0x1b6   :  { %v1686_v16 = vsub.f32 %v5684_v43, %v1685_v8  ;;  %v1687_v7 = vsub.f32 %v5697_v38, %v1685_v8  ;;  %v1688_v62 = vsub.f32 %v5731_v41, %v1685_v8  ;;  %v1689_v57 = vsub.f32 %v1657_v63, %v1685_v8 }
 0x1b7   :  { %v1690_v39 = vsub.f32 %v1658_v49, %v1685_v8  ;;  %v1691_v24 = vsub.f32 %v1659_v18, %v1685_v8  ;;  %v1733_v49 = vperm.slane %v5787_v61, 0 }
 0x1b8   :  { %v1692_v25 = vmul.f32 %v1686_v16, %v1686_v16  ;;  %v1693_v35 = vmul.f32 %v1687_v7, %v1687_v7  ;;  %v1694_v27 = vmul.f32 %v1688_v62, %v1688_v62  ;;  %v1695_v11 = vmul.f32 %v1689_v57, %v1689_v57 }
 0x1b9   :  { %v1696_v20 = vmul.f32 %v1690_v39, %v1690_v39  ;;  %v1697_v19 = vmul.f32 %v1691_v24, %v1691_v24 }
 0x1ba   :  { %v1698_v40 = vsel %vm1660_vm8, %v1692_v25, 0.0  ;;  %v1699_v6 = vsel %vm1660_vm8, %v1693_v35, 0.0  ;;  %v1701_v36 = vsel %vm1660_vm8, %v1694_v27, 0.0  ;;  %v1703_v38 = vsel %vm1660_vm8, %v1695_v11, 0.0 }
 0x1bb   :  { %v1700_v59 = vadd.f32 %v1699_v6, %v1698_v40  ;;  %v1705_v14 = vsel %vm1660_vm8, %v1696_v20, 0.0  ;;  %v1707_v52 = vsel %vm1660_vm8, %v1697_v19, 0.0 }
 0x1bd   :  { %v1702_v43 = vadd.f32 %v1701_v36, %v1700_v59 }
 0x1bf   :  { %v1704_v41 = vadd.f32 %v1703_v38, %v1702_v43 }
 0x1c1   :  { %v1706_v30 = vadd.f32 %v1705_v14, %v1704_v41 }
 0x1c3   :  { %v1708_v33 = vadd.f32 %v1707_v52, %v1706_v30  ;;  %v1940_v52 = vld [vmem:[%s7088_s25 + $0x10] sm:$0xff] }
 0x1c4   :  { %1959 = vmatpush.msra.mxu2 %v1940_v52 }
 0x1c5   :  { %v1709_v26 = vrot.slane %v1708_v33, 4 }
 0x1c7   :  { %v1710_v63 = vadd.f32 %v1709_v26, %v1708_v33  ;;  %v1939_v33 = vld [vmem:[%s7088_s25 + $0x8] sm:$0xff] }
 0x1c8   :  { %1960 = vmatpush.msra.mxu2 %v1939_v33 }
 0x1c9   :  { %v1711_v10 = vrot.slane %v1710_v63, 2 }
 0x1cb   :  { %v1712_v1 = vadd.f32 %v1711_v10, %v1710_v63 }
 0x1cd   :  { %v1713_v9 = vrot.slane %v1712_v1, 1 }
 0x1cf   :  { %v1714_v17 = vadd.f32 %v1713_v9, %v1712_v1 }
 0x1d1   :  { %v1715_v47 = vmul.f32 %v1714_v17, %v1684_v31 }
 0x1d3   :  { %v1716_v12 = vadd.f32 1e-05, %v1715_v47 }
 0x1d5   :  { %4626 = vrsqrt.f32 %v1716_v12  ;;  %vm1723_vm11 = vweird.f32 %v1716_v12 }
 0x1db   :  { %v4627_v22 = vpop.eup %4626 }
 0x1dc   :  { %v1718_v42 = vmul.f32 %v4627_v22, %v1716_v12  ;;  %vm1724_vm10 = vweird.f32 %v4627_v22 }
 0x1dd   :  { %vm1725_vm12 = vmor %vm1723_vm11, %vm1724_vm10  ;;  %vm2070_vm11 = vcmask 785408  }
 0x1de   :  { %v1719_v50 = vmul.f32 %v4627_v22, %v1718_v42 }
 0x1e0   :  { %v1720_v3 = vmul.f32 0.5, %v1719_v50 }
 0x1e2   :  { %v1721_v4 = vsub.f32 1.5, %v1720_v3 }
 0x1e4   :  { %v1722_v53 = vmul.f32 %v4627_v22, %v1721_v4 }
 0x1e6   :  { %v1726_v18 = vsel %vm1725_vm12, %v4627_v22, %v1722_v53  ;;  %vm2166_vm12 = vcmask 392192  }
 0x1e7   :  { %v1727_v32 = vmul.f32 %v1726_v18, %v1686_v16  ;;  %v1728_v21 = vmul.f32 %v1726_v18, %v1687_v7  ;;  %v1729_v55 = vmul.f32 %v1726_v18, %v1688_v62  ;;  %v1730_v15 = vmul.f32 %v1726_v18, %v1689_v57 }
 0x1e8   :  { %v1731_v48 = vmul.f32 %v1726_v18, %v1690_v39  ;;  %v1732_v23 = vmul.f32 %v1726_v18, %v1691_v24 }
 0x1e9   :  { %v1734_v54 = vmul.f32 %v1733_v49, %v1727_v32  ;;  %v1735_v46 = vmul.f32 %v1733_v49, %v1728_v21  ;;  %v1736_v28 = vmul.f32 %v1733_v49, %v1729_v55  ;;  %v1737_v56 = vmul.f32 %v1733_v49, %v1730_v15 }
 0x1ea   :  { %v1738_v44 = vmul.f32 %v1733_v49, %v1731_v48  ;;  %v1739_v37 = vmul.f32 %v1733_v49, %v1732_v23 }
 0x1eb   :  { %v1741_v31 = vadd.f32 %v1740_v0, %v1734_v54  ;;  %v1742_v34 = vadd.f32 %v1740_v0, %v1735_v46  ;;  %v1743_v8 = vadd.f32 %v1740_v0, %v1736_v28  ;;  %v1744_v25 = vadd.f32 %v1740_v0, %v1737_v56 }
 0x1ec   :  { %v1745_v35 = vadd.f32 %v1740_v0, %v1738_v44  ;;  %v1746_v27 = vadd.f32 %v1740_v0, %v1739_v37 }
 0x1ed   :  { %v5791_v11 = vmax.f32 %v1741_v31, 0.0  ;;  %v5793_v16 = vmax.f32 %v1742_v34, 0.0  ;;  %v5795_v7 = vmax.f32 %v1743_v8, 0.0  ;;  %v5797_v62 = vmax.f32 %v1744_v25, 0.0 }
 0x1ee   :  { %v5799_v57 = vmax.f32 %v1745_v35, 0.0  ;;  %v5801_v39 = vmax.f32 %v1746_v27, 0.0 }
 0x1ef   :  { %v1827_v24 = vsel %vm1660_vm8, %v5793_v16, -inf  ;;  %v1843_v40 = vmul.f32 0.0, %v5791_v11  ;;  %v1844_v6 = vmul.f32 0.0, %v5793_v16  ;;  %v1823_v59 = vmul.f32 0.0, %v5797_v62 }
 0x1f0   :  { %v1824_v20 = vmul.f32 0.0, %v5799_v57  ;;  %v1825_v36 = vmul.f32 0.0, %v5801_v39  ;;  %v1853_v43 = vsel %vm1660_vm8, %v5799_v57, -inf  ;;  %v1855_v19 = vsel %vm1660_vm8, %v5801_v39, -inf }
 0x1f1   :  { %v1849_v38 = vsel %vm1660_vm8, %v1843_v40, -inf  ;;  %v1850_v41 = vsel %vm1660_vm8, %v1844_v6, -inf  ;;  %v1826_v14 = vsel %vm1660_vm8, %v5791_v11, -inf  ;;  %v1828_v30 = vsel %vm1660_vm8, %v5795_v7, -inf }
 0x1f2   :  { %v1830_v26 = vsel %vm1660_vm8, %v1824_v20, -inf  ;;  %v1832_v63 = vsel %vm1660_vm8, %v1825_v36, -inf  ;;  %v1854_v10 = vmax.f32 %v1849_v38, %v1853_v43  ;;  %v1856_v1 = vmax.f32 %v1850_v41, %v1855_v19 }
 0x1f3   :  { %v1833_v9 = vmax.f32 %v1827_v24, %v1832_v63  ;;  %v1829_v17 = vsel %vm1660_vm8, %v1823_v59, -inf  ;;  %v1831_v47 = vmax.f32 %v1826_v14, %v1830_v26  ;;  %v1845_v12 = vmul.f32 0.0, %v5795_v7 }
 0x1f4   :  { %v1835_v2 = vmax.f32 %v1828_v30, %v1829_v17  ;;  %v1857_v51 = vmax.f32 %v1854_v10, %v1856_v1  ;;  %v1866_v60 = vsel %vm1660_vm8, %v5791_v11, 0.0  ;;  %v1852_v22 = vsel %vm1660_vm8, %v5797_v62, -inf }
 0x1f5   :  { %v1834_v5 = vmax.f32 %v1831_v47, %v1833_v9  ;;  %v1851_v13 = vsel %vm1660_vm8, %v1845_v12, -inf  ;;  %v1867_v58 = vsel %vm1660_vm8, %v5793_v16, 0.0  ;;  %v1869_v29 = vsel %vm1660_vm8, %v5795_v7, 0.0 }
 0x1f6   :  { %v1858_v42 = vmax.f32 %v1851_v13, %v1852_v22  ;;  %v1868_v45 = vadd.f32 %v1867_v58, %v1866_v60  ;;  %v1884_v3 = vsel %vm1660_vm8, %v1843_v40, 0.0  ;;  %v1885_v4 = vsel %vm1660_vm8, %v1844_v6, 0.0  ;;  %v1938_v60 = vld [vmem:[%s7088_s25] sm:$0xff]  ;;  %s7091_s25 = sld [smem:[#allocation53_spill]] }
 0x1f7   :  { %v1836_v50 = vmax.f32 %v1834_v5, %v1835_v2  ;;  %v1886_v18 = vadd.f32 %v1885_v4, %v1884_v3  ;;  %v1871_v32 = vsel %vm1660_vm8, %v1823_v59, 0.0  ;;  %v1887_v21 = vsel %vm1660_vm8, %v1845_v12, 0.0  ;;  %1961 = vmatpush.msra.mxu2 %v1938_v60 }
 0x1f8   :  { %v1859_v53 = vmax.f32 %v1857_v51, %v1858_v42  ;;  %v1870_v49 = vadd.f32 %v1869_v29, %v1868_v45  ;;  %v1873_v54 = vsel %vm1660_vm8, %v1824_v20, 0.0  ;;  %v1889_v46 = vsel %vm1660_vm8, %v5797_v62, 0.0  ;;  %v131_v42 = vld [vmem:[#allocation6 + $0x8] sm:$0xff] }
 0x1f9   :  { %v1837_v0 = vrot.slane %v1836_v50, 4  ;;  %v1888_v48 = vadd.f32 %v1887_v21, %v1886_v18  ;;  %v1875_v31 = vsel %vm1660_vm8, %v1825_v36, 0.0  ;;  %v1891_v34 = vsel %vm1660_vm8, %v5799_v57, 0.0 }
 0x1fa   :  { %v1860_v55 = vrot.slane %v1859_v53, 4  ;;  %v1872_v15 = vadd.f32 %v1871_v32, %v1870_v49  ;;  %v1893_v27 = vsel %vm1660_vm8, %v5801_v39, 0.0  ;;  %v1913_v5 = vperm.slane %v5787_v61, 6 }
 0x1fb   :  { %v1838_v23 = vmax.f32 %v1836_v50, %v1837_v0  ;;  %v1890_v44 = vadd.f32 %v1889_v46, %v1888_v48  ;;  %v1941_v45 = vperm.slane %v131_v42, 1 }
 0x1fc   :  { %v1861_v28 = vmax.f32 %v1859_v53, %v1860_v55  ;;  %v1874_v56 = vadd.f32 %v1873_v54, %v1872_v15 }
 0x1fd   :  { %v1839_v37 = vrot.slane %v1838_v23, 2  ;;  %v1892_v35 = vadd.f32 %v1891_v34, %v1890_v44 }
 0x1fe   :  { %v1862_v8 = vrot.slane %v1861_v28, 2  ;;  %v1876_v25 = vadd.f32 %v1875_v31, %v1874_v56 }
 0x1ff   :  { %v1894_v40 = vadd.f32 %v1893_v27, %v1892_v35  ;;  %v1840_v6 = vmax.f32 %v1838_v23, %v1839_v37 }
 0x200   :  { %v1877_v24 = vrot.slane %v1876_v25, 4  ;;  %v1863_v59 = vmax.f32 %v1861_v28, %v1862_v8 }
 0x201   :  { %v1895_v43 = vrot.slane %v1894_v40, 4  ;;  %v1841_v41 = vrot.slane %v1840_v6, 1 }
 0x202   :  { %v1878_v20 = vadd.f32 %v1877_v24, %v1876_v25  ;;  %v1864_v14 = vrot.slane %v1863_v59, 1 }
 0x203   :  { %v1896_v38 = vadd.f32 %v1895_v43, %v1894_v40  ;;  %v1842_v26 = vmax.f32 %v1840_v6, %v1841_v41  ;;  %v4753_v41 = vmov 64.0  }
 0x204   :  { %v1879_v19 = vrot.slane %v1878_v20, 2  ;;  %v1865_v63 = vmax.f32 %v1863_v59, %v1864_v14 }
 0x205   :  { %v1897_v30 = vrot.slane %v1896_v38, 2 }
 0x206   :  { %v1880_v36 = vadd.f32 %v1879_v19, %v1878_v20  ;;  %v1902_v47 = vsel %vm1236_vm4, %v1842_v26, %v1865_v63 }
 0x207   :  { %v1898_v33 = vadd.f32 %v1897_v30, %v1896_v38 }
 0x208   :  { %v1881_v52 = vrot.slane %v1880_v36, 1 }
 0x209   :  { %v1899_v1 = vrot.slane %v1898_v33, 1 }
 0x20a   :  { %v1882_v10 = vadd.f32 %v1881_v52, %v1880_v36 }
 0x20b   :  { %v1900_v17 = vadd.f32 %v1899_v1, %v1898_v33 }
 0x20c   :  { %v1883_v9 = vmul.f32 0.041666668, %v1882_v10 }
 0x20d   :  { %v1901_v12 = vmul.f32 0.041666668, %v1900_v17 }
 0x20e   :  { %v1903_v2 = vsel %vm1168_vm3, %v1902_v47, %v1883_v9 }
 0x20f   :  { %v1904_v51 = vsel %vm1100_vm2, %v1903_v2, %v1901_v12 }
 0x210   :  { %4471 = vmatmul.msk.f32.vlgmr.msra.gmra.mxu0 %vm1660_vm8, %v1904_v51 }
 0x28d   :  { %v1934_v13 = vpop.f32.mrf.mxu0 }
 0x28e   :  { %v1935_v22 = vadd.f32 %v1934_v13, %v1913_v5 }
 0x290   :  { %v1937_v58 = vmax.f32 %v1935_v22, 0.0 }
 0x292   :  { %4472 = vmatmul.msk.f32.vlgmr.msra.gmra.mxu2 %vm1942_vm13, %v1937_v58 }
 0x315   :  { %v1963_v50 = vpop.f32.mrf.mxu2 }
 0x316   :  { %v1964_v29 = vadd.f32 %v1963_v50, %v1941_v45 }
 0x318   :  { %v1967_v3 = vrot.slane %v1964_v29, 2 }
 0x31a   :  { %v1969_v4 = vadd.f32 %v1967_v3, %v1964_v29  ;;  %v2064_v29 = vld [vmem:[%s7089_s30] sm:$0xff] }
 0x31c   :  { %v4473_v53 = vmul.f32 -1.442695, %v1969_v4  ;;  %v2065_v4 = vld [vmem:[%s7089_s30 + $0x8] sm:$0xff] }
 0x31e   :  { %4628 = vpow2.f32 %v4473_v53  ;;  %v2066_v53 = vld [vmem:[%s7089_s30 + $0x10] sm:$0xff] }
 0x324   :  { %v4629_v49 = vpop.eup %4628 }
 0x325   :  { %v1973_v18 = vadd.f32 1.0, %v4629_v49  ;;  %v2067_v49 = vld [vmem:[%s7089_s30 + $0x18] sm:$0xff] }
 0x327   :  { %4630 = vrcp.f32 %v1973_v18  ;;  %v1985_v21 = vand.u32 2147483648, %v1973_v18  ;;  %v1983_v15 = vand.u32 2147483647, %v1973_v18  ;;  %vm1979_vm15 = vweird.f32 %v1973_v18 }
 0x328   :  { %4632 = vrcp.f32 %v4753_v41  ;;  %v4536_v41 = vld [vmem:[%s7090_s8 + $0xd0] sm:$0xff] }
 0x329   :  { %v1986_v23 = vor.u32 1.1754944e-38, %v1985_v21  ;;  %vm1984_vm9 = vcmp.eq.f32.partialorder %v1983_v15, 8.507059e+37 }
 0x32d   :  { %v4631_v0 = vpop.eup %4630 }
 0x32e   :  { %v1975_v32 = vmul.f32 %v4631_v0, %v1973_v18  ;;  %vm1980_vm14 = vweird.f32 %v4631_v0  ;;  %v4633_v14 = vpop.eup %4632  ;;  %v2068_v18 = vld [vmem:[%s7089_s30 + $0x20] sm:$0xff] }
 0x32f   :  { %vm1981_vm1 = vmor %vm1979_vm15, %vm1980_vm14  ;;  %v2052_v36 = vmul.f32 64.0, %v4633_v14  ;;  %vm2056_vm10 = vweird.f32 %v4633_v14 }
 0x330   :  { %v1976_v61 = vsub.f32 1.0, %v1975_v32 }
 0x331   :  { %v2053_v30 = vsub.f32 1.0, %v2052_v36  ;;  %v4521_v36 = vld [vmem:[%s7090_s8 + $0x58] sm:$0xff] }
 0x332   :  { %v1977_v55 = vmul.f32 %v4631_v0, %v1976_v61 }
 0x333   :  { %v2054_v52 = vmul.f32 %v4633_v14, %v2053_v30  ;;  %v4534_v30 = vld [vmem:[%s7090_s8 + $0xc0] sm:$0xff] }
 0x334   :  { %v1978_v48 = vadd.f32 %v4631_v0, %v1977_v55 }
 0x335   :  { %v2055_v33 = vadd.f32 %v4633_v14, %v2054_v52  ;;  %v4530_v52 = vld [vmem:[%s7090_s8 + $0xa0] sm:$0xff] }
 0x336   :  { %v1982_v54 = vsel %vm1981_vm1, %v4631_v0, %v1978_v48  ;;  %v2069_v0 = vld [vmem:[%s7089_s30 + $0x28] sm:$0xff]  ;;  %v4513_v48 = vld [vmem:[%s7090_s8 + $0x18] sm:$0xff] }
 0x337   :  { %v1987_v46 = vsel %vm1984_vm9, %v1986_v23, %v1982_v54  ;;  %v5902_v26 = vsel %vm2056_vm10, %v4633_v14, %v2055_v33  ;;  %v4517_v54 = vld [vmem:[%s7090_s8 + $0x38] sm:$0xff]  ;;  %v4527_v14 = vld [vmem:[%s7090_s8 + $0x88] sm:$0xff] }
 0x338   :  { %v1989_v28 = vperm.slane %v1987_v46, 0  ;;  %v1996_v56 = vperm.slane %v1987_v46, 1  ;;  %v2550_v46 = vld [vmem:[%s7090_s8] sm:$0xff]  ;;  %v4535_v33 = vld [vmem:[%s7090_s8 + $0xc8] sm:$0xff] }
 0x33a   :  { %v1993_v44 = vmul.f32 0.0, %v1989_v28  ;;  %v1997_v31 = vmul.f32 0.0, %v1996_v56 }
 0x33c   :  { %v2006_v37 = vadd.f32 %v1996_v56, %v1993_v44  ;;  %v2003_v40 = vadd.f32 %v1997_v31, %v1989_v28  ;;  %v4522_v28 = vld [vmem:[%s7090_s8 + $0x60] sm:$0xff]  ;;  %v2551_v44 = vld [vmem:[%s7090_s8 + $0x8] sm:$0xff] }
 0x33d   :  { %v4514_v56 = vld [vmem:[%s7090_s8 + $0x20] sm:$0xff]  ;;  %v4519_v31 = vld [vmem:[%s7090_s8 + $0x48] sm:$0xff] }
 0x33e   :  { %v5861_v34 = vmul.f32 %v2006_v37, %v5801_v39  ;;  %v5864_v8 = vmul.f32 %v2006_v37, %v5799_v57  ;;  %v5867_v25 = vmul.f32 %v2006_v37, %v5797_v62  ;;  %v5876_v39 = vmul.f32 %v2003_v40, %v5793_v16  ;;  %v4526_v37 = vld [vmem:[%s7090_s8 + $0x80] sm:$0xff] }
 0x33f   :  { %v5879_v57 = vmul.f32 %v2003_v40, %v5791_v11  ;;  %v5882_v62 = vmul.f32 %v2003_v40, %v5795_v7  ;;  %v4520_v40 = vld [vmem:[%s7090_s8 + $0x50] sm:$0xff] }
 0x340   :  { %v2048_v35 = vsel %vm1660_vm8, %v5861_v34, 0.0  ;;  %v2045_v27 = vsel %vm1660_vm8, %v5864_v8, 0.0  ;;  %v2042_v24 = vsel %vm1660_vm8, %v5867_v25, 0.0  ;;  %v2036_v6 = vsel %vm1660_vm8, %v5876_v39, 0.0 }
 0x341   :  { %2049 = vadd.xlane.f32.xlu0 %v2048_v35  ;;  %2046 = vadd.xlane.f32.xlu1 %v2045_v27  ;;  %v2033_v59 = vsel %vm1660_vm8, %v5879_v57, 0.0  ;;  %v2039_v20 = vsel %vm1660_vm8, %v5882_v62, 0.0  ;;  %v2027_v16 = vsel %vm1660_vm8, %v5864_v8, -inf  ;;  %v2024_v11 = vsel %vm1660_vm8, %v5867_v25, -inf  ;;  %v4516_v35 = vld [vmem:[%s7090_s8 + $0x30] sm:$0xff]  ;;  %v4531_v27 = vld [vmem:[%s7090_s8 + $0xa8] sm:$0xff] }
 0x342   :  { %2043 = vadd.xlane.f32.xlu2 %v2042_v24  ;;  %v2030_v7 = vsel %vm1660_vm8, %v5861_v34, -inf  ;;  %v2018_v43 = vsel %vm1660_vm8, %v5876_v39, -inf  ;;  %v2015_v19 = vsel %vm1660_vm8, %v5879_v57, -inf  ;;  %v2021_v38 = vsel %vm1660_vm8, %v5882_v62, -inf  ;;  %v4523_v24 = vld [vmem:[%s7090_s8 + $0x68] sm:$0xff] }
 0x349   :  { %2037 = vadd.xlane.f32.xlu0 %v2036_v6  ;;  %2034 = vadd.xlane.f32.xlu1 %v2033_v59  ;;  %v4515_v6 = vld [vmem:[%s7090_s8 + $0x28] sm:$0xff]  ;;  %v4528_v59 = vld [vmem:[%s7090_s8 + $0x90] sm:$0xff] }
 0x34a   :  { %2040 = vadd.xlane.f32.xlu2 %v2039_v20  ;;  %v4525_v20 = vld [vmem:[%s7090_s8 + $0x78] sm:$0xff] }
 0x351   :  { %2028 = vmax.xlane.f32.xlu0 %v2027_v16  ;;  %2025 = vmax.xlane.f32.xlu1 %v2024_v11  ;;  %v4524_v16 = vld [vmem:[%s7090_s8 + $0x70] sm:$0xff] }
 0x352   :  { %2031 = vmax.xlane.f32.xlu2 %v2030_v7  ;;  %v4532_v11 = vld [vmem:[%s7090_s8 + $0xb0] sm:$0xff]  ;;  %v4529_v7 = vld [vmem:[%s7090_s8 + $0x98] sm:$0xff] }
 0x359   :  { %2019 = vmax.xlane.f32.xlu0 %v2018_v43  ;;  %2016 = vmax.xlane.f32.xlu1 %v2015_v19  ;;  %v4533_v43 = vld [vmem:[%s7090_s8 + $0xb8] sm:$0xff]  ;;  %v4518_v19 = vld [vmem:[%s7090_s8 + $0x40] sm:$0xff] }
 0x35a   :  { %2022 = vmax.xlane.f32.xlu2 %v2021_v38  ;;  %v2552_v38 = vld [vmem:[%s7090_s8 + $0x10] sm:$0xff] }
 0x3b4   :  { %v2050_v63 = vpop.xlane.xlu0 %2049  ;;  %v2047_v10 = vpop.xlane.xlu1 %2046 }
 0x3b5   :  { %v2063_v1 = vmul.f32 %v5902_v26, %v2050_v63  ;;  %v2044_v9 = vpop.xlane.xlu2 %2043  ;;  %v2062_v17 = vmul.f32 %v5902_v26, %v2047_v10 }
 0x3b6   :  { %v2061_v47 = vmul.f32 %v5902_v26, %v2044_v9 }
 0x3b7   :  { %2093 = vmatpush.msrb.mxu0 %v2063_v1 }
 0x3b9   :  { %2094 = vmatpush.msrb.mxu0 %v2062_v17 }
 0x3bb   :  { %2095 = vmatpush.msrb.mxu0 %v2061_v47 }
 0x3bc   :  { %v2038_v12 = vpop.xlane.xlu0 %2037  ;;  %v2035_v2 = vpop.xlane.xlu1 %2034 }
 0x3bd   :  { %v2041_v51 = vpop.xlane.xlu2 %2040  ;;  %v2059_v5 = vmul.f32 %v5902_v26, %v2038_v12  ;;  %v2058_v13 = vmul.f32 %v5902_v26, %v2035_v2 }
 0x3be   :  { %v2060_v60 = vmul.f32 %v5902_v26, %v2041_v51 }
 0x3c0   :  { %2096 = vmatpush.msrb.mxu0 %v2060_v60 }
 0x3c2   :  { %2097 = vmatpush.msrb.mxu0 %v2059_v5 }
 0x3c4   :  { %2098 = vmatpush.msrb.mxu0 %v2058_v13  ;;  %v2029_v22 = vpop.xlane.xlu0 %2028  ;;  %v2026_v42 = vpop.xlane.xlu1 %2025 }
 0x3c5   :  { %v2032_v58 = vpop.xlane.xlu2 %2031 }
 0x3c6   :  { %2099 = vmatpush.msrb.mxu0 %v2032_v58  ;;  %v2278_v58 = vld [vmem:[%s6955_s11 + $0x1b8] sm:$0xff] }
 0x3c8   :  { %2100 = vmatpush.msrb.mxu0 %v2029_v22  ;;  %v2286_v22 = vld [vmem:[%s6955_s11 + $0x1f8] sm:$0xff] }
 0x3c9   :  { %2312 = vmatpush.msrb.mxu1 %v2286_v22  ;;  %v2283_v22 = vld [vmem:[%s6955_s11 + $0x1e0] sm:$0xff] }
 0x3ca   :  { %2101 = vmatpush.msrb.mxu0 %v2026_v42  ;;  %v2165_v42 = vld [vmem:[%s7091_s25 + $0x28] sm:$0xff] }
 0x3cc   :  { %v2020_v50 = vpop.xlane.xlu0 %2019  ;;  %v2017_v3 = vpop.xlane.xlu1 %2016 }
 0x3cd   :  { %v2023_v45 = vpop.xlane.xlu2 %2022 }
 0x3ce   :  { %2102 = vmatpush.msrb.mxu0 %v2023_v45  ;;  %v2277_v45 = vld [vmem:[%s6955_s11 + $0x1b0] sm:$0xff] }
 0x3cf   :  { %2313 = vmatpush.msrb.mxu1 %v2277_v45  ;;  %v2275_v45 = vld [vmem:[%s6955_s11 + $0x1a0] sm:$0xff] }
 0x3d0   :  { %2103 = vmatpush.msrb.mxu0 %v2020_v50  ;;  %v2269_v50 = vld [vmem:[%s6955_s11 + $0x170] sm:$0xff] }
 0x3d2   :  { %2104 = vmatpush.msrb.mxu0 %v2017_v3  ;;  %v2260_v3 = vld [vmem:[%s6955_s11 + $0x128] sm:$0xff] }
 0x3d3   :  { %4474 = vmatmul.msk.f32.vlgmr.msrb.gmra.mxu0 %vm2070_vm11, %v2064_v29  ;;  %v2268_v29 = vld [vmem:[%s6955_s11 + $0x168] sm:$0xff] }
 0x3d4   :  { %2314 = vmatpush.msrb.mxu1 %v2268_v29 }
 0x3db   :  { %4475 = vmatmul.msk.f32.gmra.mxu0 %vm2070_vm11, %v2065_v4  ;;  %v2290_v4 = vld [vmem:[%s6955_s11 + $0x218] sm:$0xff] }
 0x3e3   :  { %4476 = vmatmul.msk.f32.gmra.mxu0 %vm2070_vm11, %v2066_v53  ;;  %v2291_v53 = vld [vmem:[%s6955_s11 + $0x220] sm:$0xff] }
 0x3e4   :  { %2442 = vmatpush.msra.mxu0 %v2291_v53  ;;  %v2256_v53 = vld [vmem:[%s6955_s11 + $0x108] sm:$0xff] }
 0x3eb   :  { %4477 = vmatmul.msk.f32.gmra.mxu0 %vm2070_vm11, %v2067_v49  ;;  %v2281_v49 = vld [vmem:[%s6955_s11 + $0x1d0] sm:$0xff] }
 0x3f3   :  { %4478 = vmatmul.msk.f32.gmra.mxu0 %vm2070_vm11, %v2068_v18  ;;  %v2282_v18 = vld [vmem:[%s6955_s11 + $0x1d8] sm:$0xff] }
 0x3f4   :  { %2443 = vmatpush.msra.mxu0 %v2282_v18  ;;  %v2247_v18 = vld [vmem:[%s6955_s11 + $0xc0] sm:$0xff] }
 0x3fb   :  { %4479 = vmatmul.msk.f32.gmra.mxu0 %vm2070_vm11, %v2069_v0  ;;  %v2259_v0 = vld [vmem:[%s6955_s11 + $0x120] sm:$0xff] }
 0x3fc   :  { %2315 = vmatpush.msrb.mxu1 %v2259_v0  ;;  %v2248_v0 = vld [vmem:[%s6955_s11 + $0xc8] sm:$0xff] }
 0x450   :  { %v2106_v32 = vpop.f32.mrf.mxu0 }
 0x458   :  { %v2109_v61 = vpop.f32.mrf.mxu0 }
 0x460   :  { %v2112_v21 = vpop.f32.mrf.mxu0 }
 0x468   :  { %v2115_v55 = vpop.f32.mrf.mxu0 }
 0x469   :  { %2141 = vperm.xlu1 %4622, %v2115_v55   ;;  %v2263_v55 = vld [vmem:[%s6955_s11 + $0x140] sm:$0xff] }
 0x470   :  { %v2118_v15 = vpop.f32.mrf.mxu0 }
 0x471   :  { %2126 = vperm.xlu1 %4622, %v2106_v32   ;;  %2146 = vperm.xlu0 %4621, %v2118_v15   ;;  %v2251_v32 = vld [vmem:[%s6955_s11 + $0xe0] sm:$0xff]  ;;  %v2264_v15 = vld [vmem:[%s6955_s11 + $0x148] sm:$0xff] }
 0x478   :  { %v2121_v23 = vpop.f32.mrf.mxu0 }
 0x479   :  { %2589 = vperm.xlu1 %4622, %v4513_v48   ;;  %2136 = vperm.xlu0 %4621, %v2112_v21   ;;  %v2273_v21 = vld [vmem:[%s6955_s11 + $0x190] sm:$0xff]  ;;  %v2250_v48 = vld [vmem:[%s6955_s11 + $0xd8] sm:$0xff] }
 0x47a   :  { %2151 = vperm.xlu2 %4623, %v2121_v23   ;;  %2444 = vmatpush.msra.mxu0 %v2273_v21  ;;  %v2254_v23 = vld [vmem:[%s6955_s11 + $0xf8] sm:$0xff] }
 0x47b   :  { %2316 = vmatpush.msrb.mxu1 %v2250_v48  ;;  %v2238_v21 = vld [vmem:[%s6955_s11 + $0x78] sm:$0xff] }
 0x47c   :  { %2445 = vmatpush.msra.mxu0 %v2264_v15  ;;  %v2229_v15 = vld [vmem:[%s6955_s11 + $0x30] sm:$0xff]  ;;  %v2230_v48 = vld [vmem:[%s6955_s11 + $0x38] sm:$0xff] }
 0x481   :  { %2628 = vperm.xlu1 %4622, %v4517_v54   ;;  %2555 = vperm.xlu0 %4621, %v2550_v46   ;;  %v2255_v54 = vld [vmem:[%s6955_s11 + $0x100] sm:$0xff]  ;;  %v2241_v46 = vld [vmem:[%s6955_s11 + $0x90] sm:$0xff] }
 0x482   :  { %2131 = vperm.xlu2 %4623, %v2109_v61   ;;  %v2272_v61 = vld [vmem:[%s6955_s11 + $0x188] sm:$0xff]  ;;  %2317 = vmatpush.msrb.mxu1 %v2241_v46 }
 0x483   :  { %2446 = vmatpush.msra.mxu0 %v2255_v54 }
 0x489   :  { %2679 = vperm.xlu1 %4622, %v4522_v28   ;;  %2594 = vperm.xlu0 %4621, %v4514_v56   ;;  %v2242_v28 = vld [vmem:[%s6955_s11 + $0x98] sm:$0xff]  ;;  %v2245_v56 = vld [vmem:[%s6955_s11 + $0xb0] sm:$0xff] }
 0x48a   :  { %2560 = vperm.xlu2 %4623, %v2551_v44   ;;  %v2246_v44 = vld [vmem:[%s6955_s11 + $0xb8] sm:$0xff] }
 0x48b   :  { %2447 = vmatpush.msra.mxu0 %v2246_v44 }
 0x491   :  { %2718 = vperm.xlu1 %4622, %v4526_v37   ;;  %2657 = vperm.xlu0 %4621, %v4519_v31   ;;  %v2232_v37 = vld [vmem:[%s6955_s11 + $0x48] sm:$0xff]  ;;  %v2233_v31 = vld [vmem:[%s6955_s11 + $0x50] sm:$0xff] }
 0x492   :  { %2623 = vperm.xlu2 %4623, %v4516_v35   ;;  %v2236_v35 = vld [vmem:[%s6955_s11 + $0x68] sm:$0xff]  ;;  %2318 = vmatpush.msrb.mxu1 %v2232_v37 }
 0x499   :  { %2781 = vperm.xlu1 %4622, %v4531_v27   ;;  %2684 = vperm.xlu0 %4621, %v4523_v24   ;;  %v2237_v27 = vld [vmem:[%s6955_s11 + $0x70] sm:$0xff]  ;;  %v2223_v24 = vld [vmem:[%s6955_s11] sm:$0xff] }
 0x49a   :  { %2662 = vperm.xlu2 %4623, %v4520_v40   ;;  %v2224_v40 = vld [vmem:[%s6955_s11 + $0x8] sm:$0xff]  ;;  %2448 = vmatpush.msra.mxu0 %v2237_v27 }
 0x49b   :  { %2319 = vmatpush.msrb.mxu1 %v2223_v24 }
 0x4a1   :  { %2599 = vperm.xlu1 %4622, %v4515_v6   ;;  %2747 = vperm.xlu0 %4621, %v4528_v59   ;;  %v2227_v6 = vld [vmem:[%s6955_s11 + $0x20] sm:$0xff]  ;;  %v2228_v59 = vld [vmem:[%s6955_s11 + $0x28] sm:$0xff] }
 0x4a2   :  { %2713 = vperm.xlu2 %4623, %v4525_v20   ;;  %2449 = vmatpush.msra.mxu0 %v2228_v59 }
 0x4a9   :  { %2689 = vperm.xlu1 %4622, %v4524_v16   ;;  %2786 = vperm.xlu0 %4621, %v4532_v11   ;;  %v2288_v16 = vld [vmem:[%s6955_s11 + $0x208] sm:$0xff]  ;;  %v2289_v11 = vld [vmem:[%s6955_s11 + $0x210] sm:$0xff] }
 0x4aa   :  { %2752 = vperm.xlu2 %4623, %v4529_v7   ;;  %v2294_v7 = vld [vmem:[%s6955_s11 + $0x238] sm:$0xff]  ;;  %2364 = vmatpush.msra.mxu1 %v2288_v16 }
 0x4b1   :  { %2791 = vperm.xlu1 %4622, %v4533_v43   ;;  %2633 = vperm.xlu0 %4621, %v4518_v19   ;;  %v2279_v43 = vld [vmem:[%s6955_s11 + $0x1c0] sm:$0xff]  ;;  %v2280_v19 = vld [vmem:[%s6955_s11 + $0x1c8] sm:$0xff] }
 0x4b2   :  { %2565 = vperm.xlu2 %4623, %v2552_v38   ;;  %v2285_v38 = vld [vmem:[%s6955_s11 + $0x1f0] sm:$0xff]  ;;  %2365 = vmatpush.msra.mxu1 %v2279_v43 }
 0x4b9   :  { %2825 = vperm.xlu1 %4622, %v4536_v41   ;;  %2723 = vperm.xlu0 %4621, %v4527_v14   ;;  %v2270_v14 = vld [vmem:[%s6955_s11 + $0x178] sm:$0xff] }
 0x4ba   :  { %2667 = vperm.xlu2 %4623, %v4521_v36   ;;  %v2271_v36 = vld [vmem:[%s6955_s11 + $0x180] sm:$0xff]  ;;  %2366 = vmatpush.msra.mxu1 %v2270_v14 }
 0x4c1   :  { %2815 = vperm.xlu0 %4621, %v4534_v30   ;;  %v2276_v30 = vld [vmem:[%s6955_s11 + $0x1a8] sm:$0xff] }
 0x4c2   :  { %2757 = vperm.xlu2 %4623, %v4530_v52   ;;  %v2261_v52 = vld [vmem:[%s6955_s11 + $0x130] sm:$0xff] }
 0x4c3   :  { %2367 = vmatpush.msra.mxu1 %v2261_v52 }
 0x4ca   :  { %2820 = vperm.xlu2 %4623, %v4535_v33   ;;  %v2262_v33 = vld [vmem:[%s6955_s11 + $0x138] sm:$0xff] }
 0x4d4   :  { %v2152_v63 = vpop.permute.xlu2 %2151 }
 0x4d5   :  { %v2159_v10 = vmul.f32 %v2152_v63, %v5861_v34  ;;  %v2160_v34 = vld [vmem:[%s7091_s25] sm:$0xff] }
 0x4d6   :  { %v2267_v63 = vld [vmem:[%s6955_s11 + $0x160] sm:$0xff] }
 0x4d7   :  { %2195 = vmatpush.msrb.mxu2 %v2159_v10  ;;  %v2252_v10 = vld [vmem:[%s6955_s11 + $0xe8] sm:$0xff] }
 0x4d8   :  { %2368 = vmatpush.msra.mxu1 %v2252_v10 }
 0x4db   :  { %v2142_v1 = vpop.permute.xlu1 %2141 }
 0x4dc   :  { %v2157_v47 = vmul.f32 %v2142_v1, %v5867_v25  ;;  %v2132_v12 = vpop.permute.xlu2 %2131  ;;  %v2162_v25 = vld [vmem:[%s7091_s25 + $0x10] sm:$0xff] }
 0x4dd   :  { %v2155_v5 = vmul.f32 %v2132_v12, %v5876_v39  ;;  %v2163_v39 = vld [vmem:[%s7091_s25 + $0x18] sm:$0xff]  ;;  %v2253_v1 = vld [vmem:[%s6955_s11 + $0xf0] sm:$0xff] }
 0x4de   :  { %v2249_v12 = vld [vmem:[%s6955_s11 + $0xd0] sm:$0xff] }
 0x4e3   :  { %v2147_v9 = vpop.permute.xlu0 %2146  ;;  %v2127_v60 = vpop.permute.xlu1 %2126 }
 0x4e4   :  { %v2158_v17 = vmul.f32 %v2147_v9, %v5864_v8  ;;  %v2154_v13 = vmul.f32 %v2127_v60, %v5879_v57  ;;  %v2161_v8 = vld [vmem:[%s7091_s25 + $0x8] sm:$0xff]  ;;  %v2164_v57 = vld [vmem:[%s7091_s25 + $0x20] sm:$0xff]  ;;  %v2258_v9 = vld [vmem:[%s6955_s11 + $0x118] sm:$0xff]  ;;  %v2561_v54 = vpop.permute.xlu2 %2560 }
 0x4e6   :  { %2196 = vmatpush.msrb.mxu2 %v2158_v17  ;;  %v2243_v17 = vld [vmem:[%s6955_s11 + $0xa0] sm:$0xff] }
 0x4e7   :  { %2369 = vmatpush.msra.mxu1 %v2243_v17 }
 0x4e8   :  { %2197 = vmatpush.msrb.mxu2 %v2157_v47  ;;  %v2244_v47 = vld [vmem:[%s6955_s11 + $0xa8] sm:$0xff] }
 0x4eb   :  { %v2137_v2 = vpop.permute.xlu0 %2136  ;;  %v2590_v46 = vpop.permute.xlu1 %2589 }
 0x4ec   :  { %v2156_v51 = vmul.f32 %v2137_v2, %v5882_v62  ;;  %v2287_v62 = vld [vmem:[%s6955_s11 + $0x200] sm:$0xff]  ;;  %v2234_v2 = vld [vmem:[%s6955_s11 + $0x58] sm:$0xff]  ;;  %v6283_v27 = vpop.permute.xlu2 %2623 }
 0x4ed   :  { %2338 = vmatpush.msrb.mxu3 %v2287_v62  ;;  %2370 = vmatpush.msra.mxu1 %v2234_v2  ;;  %v2293_v62 = vld [vmem:[%s6955_s11 + $0x230] sm:$0xff] }
 0x4ee   :  { %2198 = vmatpush.msrb.mxu2 %v2156_v51  ;;  %v2235_v51 = vld [vmem:[%s6955_s11 + $0x60] sm:$0xff] }
 0x4ef   :  { %2339 = vmatpush.msrb.mxu3 %v2278_v58  ;;  %v2284_v58 = vld [vmem:[%s6955_s11 + $0x1e8] sm:$0xff] }
 0x4f0   :  { %2199 = vmatpush.msrb.mxu2 %v2155_v5  ;;  %v2240_v5 = vld [vmem:[%s6955_s11 + $0x88] sm:$0xff] }
 0x4f1   :  { %2340 = vmatpush.msrb.mxu3 %v2269_v50 }
 0x4f2   :  { %2200 = vmatpush.msrb.mxu2 %v2154_v13  ;;  %v2225_v13 = vld [vmem:[%s6955_s11 + $0x10] sm:$0xff] }
 0x4f3   :  { %4480 = vmatmul.msk.f32.vlgmr.msrb.gmra.mxu2 %vm2166_vm12, %v2160_v34  ;;  %2341 = vmatpush.msrb.mxu3 %v2260_v3  ;;  %v2226_v34 = vld [vmem:[%s6955_s11 + $0x18] sm:$0xff]  ;;  %v2265_v3 = vld [vmem:[%s6955_s11 + $0x150] sm:$0xff] }
 0x4f4   :  { %2416 = vmatpush.msra.mxu2 %v2290_v4  ;;  %2371 = vmatpush.msra.mxu1 %v2225_v13  ;;  %v2266_v4 = vld [vmem:[%s6955_s11 + $0x158] sm:$0xff] }
 0x4f5   :  { %2342 = vmatpush.msrb.mxu3 %v2251_v32 }
 0x4f6   :  { %2417 = vmatpush.msra.mxu2 %v2281_v49  ;;  %v2257_v49 = vld [vmem:[%s6955_s11 + $0x110] sm:$0xff] }
 0x4f7   :  { %2343 = vmatpush.msrb.mxu3 %v2242_v28 }
 0x4f8   :  { %2418 = vmatpush.msra.mxu2 %v2272_v61 }
 0x4f9   :  { %2344 = vmatpush.msrb.mxu3 %v2233_v31 }
 0x4fa   :  { %2419 = vmatpush.msra.mxu2 %v2263_v55  ;;  %v2239_v55 = vld [vmem:[%s6955_s11 + $0x80] sm:$0xff] }
 0x4fb   :  { %4481 = vmatmul.msk.f32.gmra.mxu2 %vm2166_vm12, %v2161_v8  ;;  %2345 = vmatpush.msrb.mxu3 %v2224_v40  ;;  %v2231_v8 = vld [vmem:[%s6955_s11 + $0x40] sm:$0xff]  ;;  %v6287_v40 = vpop.permute.xlu1 %2628 }
 0x4fc   :  { %2420 = vmatpush.msra.mxu2 %v2254_v23  ;;  %v2556_v23 = vpop.permute.xlu0 %2555 }
 0x4fd   :  { %2390 = vmatpush.msra.mxu3 %v2289_v11 }
 0x4fe   :  { %2421 = vmatpush.msra.mxu2 %v2245_v56 }
 0x4ff   :  { %2391 = vmatpush.msra.mxu3 %v2280_v19 }
 0x500   :  { %2422 = vmatpush.msra.mxu2 %v2236_v35 }
 0x501   :  { %2392 = vmatpush.msra.mxu3 %v2271_v36  ;;  %v6304_v36 = vpop.permute.xlu2 %2662 }
 0x502   :  { %2423 = vmatpush.msra.mxu2 %v2227_v6 }
 0x503   :  { %4482 = vmatmul.msk.f32.gmra.mxu2 %vm2166_vm12, %v2162_v25  ;;  %2393 = vmatpush.msra.mxu3 %v2262_v33  ;;  %v2680_v33 = vpop.permute.xlu1 %2679 }
 0x504   :  { %2520 = vmatpush.msrb.mxu2 %v2294_v7  ;;  %v2595_v44 = vpop.permute.xlu0 %2594 }
 0x505   :  { %2394 = vmatpush.msra.mxu3 %v2253_v1 }
 0x506   :  { %2521 = vmatpush.msrb.mxu2 %v2285_v38 }
 0x507   :  { %2395 = vmatpush.msra.mxu3 %v2244_v47 }
 0x508   :  { %2522 = vmatpush.msrb.mxu2 %v2276_v30 }
 0x509   :  { %2396 = vmatpush.msra.mxu3 %v2235_v51  ;;  %v2714_v47 = vpop.permute.xlu2 %2713 }
 0x50a   :  { %2523 = vmatpush.msrb.mxu2 %v2267_v63 }
 0x50b   :  { %4483 = vmatmul.msk.f32.gmra.mxu2 %vm2166_vm12, %v2163_v39  ;;  %2397 = vmatpush.msra.mxu3 %v2226_v34 }
 0x50c   :  { %2524 = vmatpush.msrb.mxu2 %v2258_v9  ;;  %v2658_v38 = vpop.permute.xlu0 %2657 }
 0x50e   :  { %2525 = vmatpush.msrb.mxu2 %v2249_v12  ;;  %v6310_v12 = vpop.permute.xlu1 %2718 }
 0x510   :  { %2526 = vmatpush.msrb.mxu2 %v2240_v5 }
 0x511   :  { %v6314_v34 = vpop.permute.xlu2 %2752 }
 0x512   :  { %2527 = vmatpush.msrb.mxu2 %v2231_v8 }
 0x513   :  { %4484 = vmatmul.msk.f32.gmra.mxu2 %vm2166_vm12, %v2164_v57  ;;  %v2292_v57 = vld [vmem:[%s6955_s11 + $0x228] sm:$0xff] }
 0x514   :  { %v2685_v17 = vpop.permute.xlu0 %2684 }
 0x51b   :  { %4485 = vmatmul.msk.f32.gmra.mxu2 %vm2166_vm12, %v2165_v42  ;;  %v2274_v42 = vld [vmem:[%s6955_s11 + $0x198] sm:$0xff] }
 0x51c   :  { %v2748_v5 = vpop.permute.xlu0 %2747 }
 0x576   :  { %v2202_v20 = vpop.f32.mrf.mxu2 }
 0x57e   :  { %v2205_v41 = vpop.f32.mrf.mxu2 }
 0x586   :  { %v2208_v60 = vpop.f32.mrf.mxu2 }
 0x58e   :  { %v2211_v25 = vpop.f32.mrf.mxu2 }
 0x58f   :  { %v2220_v39 = vmax.f32 %v2202_v20, %v2211_v25  ;;  %v2782_v25 = vpop.permute.xlu1 %2781 }
 0x591   :  { %4486 = vmatmul.msk.f32.vlgmr.msrb.gmra.mxu1 %vm1660_vm8, %v2220_v39  ;;  %4489 = vmatmul.msk.f32.vlgmr.msrb.gmra.mxu3 %vm1660_vm8, %v2220_v39 }
 0x592   :  { %4498 = vmatmul.msk.f32.vlgmr.msra.gmra.mxu2 %vm1660_vm8, %v2220_v39  ;;  %4501 = vmatmul.msk.f32.vlgmr.msra.gmra.mxu0 %vm1660_vm8, %v2220_v39 }
 0x593   :  { %2468 = vmatpush.msrb.mxu1 %v2292_v57  ;;  %2494 = vmatpush.msrb.mxu3 %v2293_v62  ;;  %v6318_v62 = vpop.permute.xlu0 %2786 }
 0x595   :  { %2469 = vmatpush.msrb.mxu1 %v2283_v22  ;;  %2495 = vmatpush.msrb.mxu3 %v2284_v58 }
 0x596   :  { %v2214_v50 = vpop.f32.mrf.mxu2 }
 0x597   :  { %v2221_v29 = vmax.f32 %v2205_v41, %v2214_v50  ;;  %2470 = vmatpush.msrb.mxu1 %v2274_v42  ;;  %2496 = vmatpush.msrb.mxu3 %v2275_v45  ;;  %v2566_v42 = vpop.permute.xlu2 %2565  ;;  %v2600_v50 = vpop.permute.xlu1 %2599 }
 0x599   :  { %4487 = vmatmul.msk.f32.gmra.mxu1 %vm1660_vm8, %v2221_v29  ;;  %4490 = vmatmul.msk.f32.gmra.mxu3 %vm1660_vm8, %v2221_v29 }
 0x59a   :  { %4499 = vmatmul.msk.f32.gmra.mxu2 %vm1660_vm8, %v2221_v29  ;;  %4502 = vmatmul.msk.f32.gmra.mxu0 %vm1660_vm8, %v2221_v29 }
 0x59b   :  { %2471 = vmatpush.msrb.mxu1 %v2265_v3  ;;  %2497 = vmatpush.msrb.mxu3 %v2266_v4 }
 0x59d   :  { %2472 = vmatpush.msrb.mxu1 %v2256_v53  ;;  %2498 = vmatpush.msrb.mxu3 %v2257_v49 }
 0x59e   :  { %v2217_v32 = vpop.f32.mrf.mxu2 }
 0x59f   :  { %v2222_v61 = vmax.f32 %v2208_v60, %v2217_v32  ;;  %2473 = vmatpush.msrb.mxu1 %v2247_v18  ;;  %2499 = vmatpush.msrb.mxu3 %v2248_v0  ;;  %v2634_v0 = vpop.permute.xlu0 %2633 }
 0x5a1   :  { %4488 = vmatmul.msk.f32.gmra.mxu1 %vm1660_vm8, %v2222_v61  ;;  %4491 = vmatmul.msk.f32.gmra.mxu3 %vm1660_vm8, %v2222_v61 }
 0x5a2   :  { %4500 = vmatmul.msk.f32.gmra.mxu2 %vm1660_vm8, %v2222_v61  ;;  %4503 = vmatmul.msk.f32.gmra.mxu0 %vm1660_vm8, %v2222_v61 }
 0x5a3   :  { %2474 = vmatpush.msrb.mxu1 %v2238_v21  ;;  %2500 = vmatpush.msrb.mxu3 %v2239_v55  ;;  %v2668_v55 = vpop.permute.xlu2 %2667 }
 0x5a5   :  { %2475 = vmatpush.msrb.mxu1 %v2229_v15  ;;  %2501 = vmatpush.msrb.mxu3 %v2230_v48  ;;  %v2690_v48 = vpop.permute.xlu1 %2689 }
 0x5a9   :  { %4492 = vmatmul.msk.f32.vlgmr.msra.gmra.mxu1 %vm1660_vm8, %v2220_v39  ;;  %4495 = vmatmul.msk.f32.vlgmr.msra.gmra.mxu3 %vm1660_vm8, %v2220_v39 }
 0x5aa   :  { %4510 = vmatmul.msk.f32.vlgmr.msrb.gmra.mxu2 %vm1660_vm8, %v2220_v39 }
 0x5b1   :  { %4493 = vmatmul.msk.f32.gmra.mxu1 %vm1660_vm8, %v2221_v29  ;;  %4496 = vmatmul.msk.f32.gmra.mxu3 %vm1660_vm8, %v2221_v29 }
 0x5b2   :  { %4511 = vmatmul.msk.f32.gmra.mxu2 %vm1660_vm8, %v2221_v29 }
 0x5b9   :  { %4494 = vmatmul.msk.f32.gmra.mxu1 %vm1660_vm8, %v2222_v61  ;;  %4497 = vmatmul.msk.f32.gmra.mxu3 %vm1660_vm8, %v2222_v61 }
 0x5ba   :  { %4512 = vmatmul.msk.f32.gmra.mxu2 %vm1660_vm8, %v2222_v61 }
 0x5c1   :  { %4504 = vmatmul.msk.f32.vlgmr.msrb.gmra.mxu1 %vm1660_vm8, %v2220_v39  ;;  %4507 = vmatmul.msk.f32.vlgmr.msrb.gmra.mxu3 %vm1660_vm8, %v2220_v39 }
 0x5c9   :  { %4505 = vmatmul.msk.f32.gmra.mxu1 %vm1660_vm8, %v2221_v29  ;;  %4508 = vmatmul.msk.f32.gmra.mxu3 %vm1660_vm8, %v2221_v29 }
 0x5d1   :  { %4506 = vmatmul.msk.f32.gmra.mxu1 %vm1660_vm8, %v2222_v61  ;;  %4509 = vmatmul.msk.f32.gmra.mxu3 %vm1660_vm8, %v2222_v61 }
 0x60e   :  { %v2321_v28 = vpop.f32.mrf.mxu1 }
 0x60f   :  { %v2541_v56 = vrot.slane %v2321_v28, 4  ;;  %v2451_v13 = vpop.f32.mrf.mxu0 }
 0x610   :  { %v2698_v4 = vrot.slane %v2451_v13, 1 }
 0x611   :  { %v2549_v31 = vsel %vm370_vm0, 0.0, %v2541_v56 }
 0x612   :  { %v2568_v59 = vmul.f32 %v2556_v23, %v2549_v31 }
 0x614   :  { %v2347_v37 = vpop.f32.mrf.mxu3 }
 0x615   :  { %v2574_v35 = vrot.slane %v2347_v37, 5  ;;  %v2425_v63 = vpop.f32.mrf.mxu2 }
 0x616   :  { %v6285_v24 = vpop.f32.mrf.mxu1  ;;  %v2692_v28 = vmul.f32 %v2680_v33, %v2425_v63 }
 0x617   :  { %v2582_v6 = vsel %vm1100_vm2, 0.0, %v2574_v35  ;;  %v2542_v16 = vrot.slane %v6285_v24, 4  ;;  %v2454_v58 = vpop.f32.mrf.mxu0 }
 0x618   :  { %v2602_v20 = vmul.f32 %v2590_v46, %v2582_v6  ;;  %v2699_v3 = vrot.slane %v2454_v58, 1 }
 0x619   :  { %v2543_v43 = vsel %vm370_vm0, %v2541_v56, %v2542_v16 }
 0x61a   :  { %v6291_v11 = vadd.f32 %v2602_v20, %v2568_v59  ;;  %v2569_v30 = vmul.f32 %v2561_v54, %v2543_v43  ;;  %v2700_v49 = vsel %vm1347_vm5, %v2698_v4, %v2699_v3  ;;  %v2758_v4 = vpop.permute.xlu2 %2757 }
 0x61b   :  { %v2726_v15 = vmul.f32 %v2714_v47, %v2700_v49 }
 0x61c   :  { %v6293_v7 = vpop.f32.mrf.mxu3 }
 0x61d   :  { %v2575_v19 = vrot.slane %v6293_v7, 5  ;;  %v2428_v2 = vpop.f32.mrf.mxu2  ;;  %v2837_v59 = vadd.f32 %v2726_v15, %v2692_v28 }
 0x61e   :  { %v6299_v41 = vpop.f32.mrf.mxu1  ;;  %v2693_v20 = vmul.f32 %v2685_v17, %v2428_v2 }
 0x61f   :  { %v2576_v14 = vsel %vm1100_vm2, %v2574_v35, %v2575_v19  ;;  %v2457_v61 = vpop.f32.mrf.mxu0  ;;  %v2544_v56 = vrot.slane %v6299_v41, 4 }
 0x620   :  { %v2603_v52 = vmul.f32 %v2595_v44, %v2576_v14  ;;  %v2701_v44 = vrot.slane %v2457_v61, 1 }
 0x621   :  { %v2545_v41 = vsel %vm370_vm0, %v2542_v16, %v2544_v56 }
 0x622   :  { %v6306_v10 = vadd.f32 %v2603_v52, %v2569_v30  ;;  %v2702_v33 = vsel %vm1347_vm5, %v2699_v3, %v2701_v44 }
 0x624   :  { %v2353_v1 = vpop.f32.mrf.mxu3 }
 0x625   :  { %v6316_v39 = vpop.f32.mrf.mxu2  ;;  %v2577_v37 = vrot.slane %v2353_v1, 5 }
 0x626   :  { %v6308_v9 = vpop.f32.mrf.mxu1 }
 0x627   :  { %v2608_v21 = vrot.slane %v6308_v9, 6  ;;  %v2578_v17 = vsel %vm1100_vm2, %v2575_v19, %v2577_v37 }
 0x628   :  { %v2604_v61 = vmul.f32 %v2600_v50, %v2578_v17 }
 0x629   :  { %v2616_v31 = vsel %vm1168_vm3, 0.0, %v2608_v21 }
 0x62a   :  { %v2636_v63 = vmul.f32 %v6283_v27, %v2616_v31  ;;  %v2727_v27 = vmul.f32 %v6310_v12, %v2702_v33 }
 0x62c   :  { %v2399_v51 = vpop.f32.mrf.mxu3 }
 0x62d   :  { %v6320_v29 = vpop.f32.mrf.mxu2  ;;  %v2642_v18 = vrot.slane %v2399_v51, 7 }
 0x62e   :  { %v6312_v60 = vpop.f32.mrf.mxu1 }
 0x62f   :  { %v2650_v23 = vsel %vm1236_vm4, 0.0, %v2642_v18  ;;  %v2609_v52 = vrot.slane %v6312_v60, 6 }
 0x630   :  { %v2670_v43 = vmul.f32 %v2658_v38, %v2650_v23  ;;  %v2706_v38 = vsel %vm1347_vm5, %v2701_v44, 0.0 }
 0x632   :  { %v2834_v24 = vadd.f32 %v2670_v43, %v2636_v63 }
 0x634   :  { %v2402_v8 = vpop.f32.mrf.mxu3  ;;  %v2843_v12 = vadd.f32 %v2834_v24, %v6291_v11 }
 0x635   :  { %v6325_v54 = vpop.f32.mrf.mxu2  ;;  %v2643_v35 = vrot.slane %v2402_v8, 7  ;;  %v2724_v8 = vpop.permute.xlu0 %2723 }
 0x636   :  { %v2379_v57 = vpop.f32.mrf.mxu1  ;;  %v2801_v19 = vrot.slane %v6325_v54, 4 }
 0x637   :  { %v2611_v1 = vrot.slane %v2379_v57, 6  ;;  %v2644_v2 = vsel %vm1236_vm4, %v2642_v18, %v2643_v35  ;;  %v2610_v57 = vsel %vm1168_vm3, %v2608_v21, %v2609_v52  ;;  %v2792_v18 = vpop.permute.xlu1 %2791  ;;  %v2800_v21 = vrot.slane %v6320_v29, 4 }
 0x638   :  { %v2671_v7 = vmul.f32 %v6304_v36, %v2644_v2  ;;  %v2637_v15 = vmul.f32 %v6287_v40, %v2610_v57  ;;  %v4754_v29 = vmov 24.0  }
 0x639   :  { %v2802_v50 = vsel %vm370_vm0, %v2800_v21, %v2801_v19  ;;  %4634 = vrcp.f32 %v4754_v29  ;;  %v3002_v29 = vld [vmem:[%s7092_s9 + $0x30] sm:$0xff] }
 0x63a   :  { %v2835_v44 = vadd.f32 %v2671_v7, %v2637_v15 }
 0x63c   :  { %v2405_v22 = vpop.f32.mrf.mxu3  ;;  %v2844_v33 = vadd.f32 %v2835_v44, %v6306_v10 }
 0x63d   :  { %v2645_v14 = vrot.slane %v2405_v22, 7 }
 0x63e   :  { %v2477_v45 = vpop.f32.mrf.mxu1 }
 0x63f   :  { %v2732_v6 = vrot.slane %v2477_v45, 2  ;;  %v2646_v16 = vsel %vm1236_vm4, %v2643_v35, %v2645_v14  ;;  %v2570_v45 = vmul.f32 %v2566_v42, %v2545_v41  ;;  %v2535_v42 = vpop.f32.mrf.mxu2  ;;  %v2838_v35 = vadd.f32 %v2727_v27, %v2693_v20  ;;  %v2816_v14 = vpop.permute.xlu0 %2815 }
 0x640   :  { %v2803_v37 = vrot.slane %v2535_v42, 4  ;;  %v2821_v41 = vpop.permute.xlu2 %2820 }
 0x644   :  { %v2503_v53 = vpop.f32.mrf.mxu3 }
 0x645   :  { %v2766_v9 = vrot.slane %v2503_v53, 3  ;;  %v2612_v53 = vsel %vm1168_vm3, %v2609_v52, %v2611_v1 }
 0x646   :  { %v2480_v32 = vpop.f32.mrf.mxu1  ;;  %v2638_v36 = vmul.f32 %v2634_v0, %v2612_v53 }
 0x647   :  { %v2733_v46 = vrot.slane %v2480_v32, 2  ;;  %v2728_v32 = vmul.f32 %v2724_v8, %v2706_v38 }
 0x649   :  { %v2734_v47 = vsel %vm1415_vm6, %v2732_v6, %v2733_v46  ;;  %v2833_v6 = vadd.f32 %v2604_v61, %v2570_v45 }
 0x64a   :  { %v2760_v22 = vmul.f32 %v2748_v5, %v2734_v47  ;;  %v2694_v5 = vmul.f32 %v2690_v48, %v6316_v39  ;;  %v2828_v47 = vmul.f32 %v2816_v14, %v2802_v50  ;;  %v2997_v14 = vld [vmem:[%s7092_s9 + $0x8] sm:$0xff] }
 0x64c   :  { %v2506_v30 = vpop.f32.mrf.mxu3  ;;  %v2839_v43 = vadd.f32 %v2728_v32, %v2694_v5 }
 0x64d   :  { %v2767_v51 = vrot.slane %v2506_v30, 3  ;;  %v2804_v30 = vsel %vm370_vm0, %v2801_v19, %v2803_v37 }
 0x64e   :  { %v2483_v13 = vpop.f32.mrf.mxu1  ;;  %v2829_v20 = vmul.f32 %v2821_v41, %v2804_v30  ;;  %v2996_v30 = vld [vmem:[%s7092_s9] sm:$0xff] }
 0x64f   :  { %v2768_v60 = vsel %vm1483_vm7, %v2766_v9, %v2767_v51  ;;  %v2735_v3 = vrot.slane %v2483_v13, 2  ;;  %v2826_v13 = vpop.permute.xlu1 %2825 }
 0x650   :  { %v2794_v58 = vmul.f32 %v2782_v25, %v2768_v60  ;;  %v2672_v25 = vmul.f32 %v2668_v55, %v2646_v16 }
 0x651   :  { %v2736_v54 = vsel %vm1415_vm6, %v2733_v46, %v2735_v3  ;;  %v2740_v28 = vsel %vm1415_vm6, %v2735_v3, 0.0 }
 0x652   :  { %v2840_v49 = vadd.f32 %v2794_v58, %v2760_v22  ;;  %v2836_v55 = vadd.f32 %v2672_v25, %v2638_v36  ;;  %v2761_v40 = vmul.f32 %v6314_v34, %v2736_v54  ;;  %v2762_v0 = vmul.f32 %v2758_v4, %v2740_v28 }
 0x654   :  { %v2509_v23 = vpop.f32.mrf.mxu3  ;;  %v2846_v39 = vadd.f32 %v2840_v49, %v2837_v59  ;;  %v2845_v34 = vadd.f32 %v2836_v55, %v2833_v6  ;;  %v2999_v6 = vld [vmem:[%s7092_s9 + $0x18] sm:$0xff] }
 0x655   :  { %v2769_v56 = vrot.slane %v2509_v23, 3 }
 0x656   :  { %v2849_v59 = vadd.f32 %v2846_v39, %v2843_v12 }
 0x657   :  { %v2770_v48 = vsel %vm1483_vm7, %v2767_v51, %v2769_v56  ;;  %v2774_v11 = vsel %vm1483_vm7, %v2769_v56, 0.0  ;;  %v2808_v51 = vsel %vm370_vm0, %v2803_v37, 0.0 }
 0x658   :  { %v2795_v46 = vmul.f32 %v6318_v62, %v2770_v48  ;;  %v2796_v31 = vmul.f32 %v2792_v18, %v2774_v11  ;;  %v4635_v62 = vpop.eup %4634  ;;  %v2830_v38 = vmul.f32 %v2826_v13, %v2808_v51  ;;  %v2852_v17 = vadd.f32 %v2849_v59, %v2828_v47  ;;  %v3003_v11 = vld [vmem:[%s7092_s9 + $0x38] sm:$0xff] }
 0x659   :  { %v2867_v16 = vmul.f32 24.0, %v4635_v62  ;;  %vm2871_vm14 = vweird.f32 %v4635_v62  ;;  %3016 = vmatpush.msrb.mxu0 %v3003_v11 }
 0x65a   :  { %v2841_v52 = vadd.f32 %v2795_v46, %v2761_v40  ;;  %v2842_v9 = vadd.f32 %v2796_v31, %v2762_v0  ;;  %v2855_v22 = vsel %vm1660_vm8, %v2852_v17, 0.0  ;;  %v3001_v0 = vld [vmem:[%s7092_s9 + $0x28] sm:$0xff]  ;;  %v3000_v31 = vld [vmem:[%s7092_s9 + $0x20] sm:$0xff] }
 0x65b   :  { %v2868_v27 = vsub.f32 1.0, %v2867_v16  ;;  %3017 = vmatpush.msrb.mxu0 %v3002_v29 }
 0x65c   :  { %v2847_v63 = vadd.f32 %v2841_v52, %v2838_v35  ;;  %v2848_v1 = vadd.f32 %v2842_v9, %v2839_v43  ;;  %v2998_v43 = vld [vmem:[%s7092_s9 + $0x10] sm:$0xff]  ;;  %v1753_v9 = vlaneseq }
 0x65d   :  { %v2869_v4 = vmul.f32 %v4635_v62, %v2868_v27  ;;  %3018 = vmatpush.msrb.mxu0 %v3001_v0 }
 0x65e   :  { %v2850_v2 = vadd.f32 %v2847_v63, %v2844_v33  ;;  %v2851_v60 = vadd.f32 %v2848_v1, %v2845_v34  ;;  %v6392_v41 = vshrl.u32 %v1753_v9, 7  ;;  %v6394_v63 = vld [vmem:[#allocation6] sm:$0xff] }
 0x65f   :  { %v2870_v53 = vadd.f32 %v4635_v62, %v2869_v4  ;;  %3019 = vmatpush.msrb.mxu0 %v3000_v31  ;;  %v2906_v1 = vperm.slane %v6394_v63, 1 }
 0x660   :  { %v2853_v8 = vadd.f32 %v2850_v2, %v2829_v20  ;;  %v2854_v24 = vadd.f32 %v2851_v60, %v2830_v38  ;;  %v2910_v2 = vperm.slane %v6394_v63, 4  ;;  %v3031_v60 = vld [vmem:[%s7093_s26 + $0x10] sm:$0xff] }
 0x661   :  { %v2872_v32 = vsel %vm2871_vm14, %v4635_v62, %v2870_v53  ;;  %3020 = vmatpush.msrb.mxu0 %v2999_v6  ;;  %v1755_v62 = vadd.s32 8, %v6392_v41  ;;  %3049 = vmatpush.msra.mxu1 %v3031_v60 }
 0x662   :  { %v2856_v58 = vsel %vm1660_vm8, %v2853_v8, 0.0  ;;  %v2858_v10 = vsel %vm1660_vm8, %v2854_v24, 0.0 }
 0x663   :  { %v2857_v45 = vadd.f32 %v2856_v58, %v2855_v22  ;;  %3021 = vmatpush.msrb.mxu0 %v2998_v43  ;;  %vm2918_vm10 = vcmp.lt.s32.totalorder %v1755_v62, 12  ;;  %vm2930_vm11 = vcmp.ge.s32.totalorder %v1755_v62, 12 }
 0x665   :  { %v2859_v57 = vadd.f32 %v2858_v10, %v2857_v45  ;;  %3022 = vmatpush.msrb.mxu0 %v2997_v14  ;;  %v4755_v10 = vmov 0.0  }
 0x666   :  { %v6403_v27 = vsel %vm2918_vm10, 1.0, %v4755_v10 }
 0x667   :  { %v2860_v3 = vrot.slane %v2859_v57, 4  ;;  %3023 = vmatpush.msrb.mxu0 %v2996_v30 }
 0x669   :  { %v2861_v7 = vadd.f32 %v2860_v3, %v2859_v57 }
 0x66b   :  { %v2862_v19 = vrot.slane %v2861_v7, 2 }
 0x66d   :  { %v2863_v49 = vadd.f32 %v2862_v19, %v2861_v7  ;;  %v6412_v7 = vsel %vm2930_vm11, 1.0, %v4755_v10  ;;  %vm3762_vm11 = vcmp.lt.s32.totalorder %v6392_v41, 6 }
 0x66f   :  { %v2864_v18 = vrot.slane %v2863_v49, 1 }
 0x671   :  { %v2865_v61 = vadd.f32 %v2864_v18, %v2863_v49 }
 0x673   :  { %v2873_v5 = vmul.f32 %v2872_v32, %v2865_v61 }
 0x675   :  { %v2874_v25 = vsub.f32 %v2852_v17, %v2873_v5  ;;  %v2875_v42 = vsub.f32 %v2853_v8, %v2873_v5  ;;  %v2876_v12 = vsub.f32 %v2854_v24, %v2873_v5 }
 0x677   :  { %v2877_v21 = vmul.f32 %v2874_v25, %v2874_v25  ;;  %v2878_v15 = vmul.f32 %v2875_v42, %v2875_v42  ;;  %v2879_v23 = vmul.f32 %v2876_v12, %v2876_v12 }
 0x679   :  { %v2880_v36 = vsel %vm1660_vm8, %v2877_v21, 0.0  ;;  %v2881_v54 = vsel %vm1660_vm8, %v2878_v15, 0.0  ;;  %v2883_v56 = vsel %vm1660_vm8, %v2879_v23, 0.0 }
 0x67a   :  { %v2882_v28 = vadd.f32 %v2881_v54, %v2880_v36 }
 0x67c   :  { %v2884_v44 = vadd.f32 %v2883_v56, %v2882_v28 }
 0x67e   :  { %v2885_v50 = vrot.slane %v2884_v44, 4 }
 0x680   :  { %v2886_v37 = vadd.f32 %v2885_v50, %v2884_v44 }
 0x682   :  { %v2887_v39 = vrot.slane %v2886_v37, 2 }
 0x684   :  { %v2888_v55 = vadd.f32 %v2887_v39, %v2886_v37 }
 0x686   :  { %v2889_v48 = vrot.slane %v2888_v55, 1 }
 0x688   :  { %v2890_v40 = vadd.f32 %v2889_v48, %v2888_v55 }
 0x68a   :  { %v2891_v46 = vmul.f32 %v2890_v40, %v2872_v32 }
 0x68c   :  { %v2892_v35 = vadd.f32 1e-05, %v2891_v46 }
 0x68e   :  { %4636 = vrsqrt.f32 %v2892_v35  ;;  %vm2899_vm1 = vweird.f32 %v2892_v35 }
 0x694   :  { %v4637_v59 = vpop.eup %4636 }
 0x695   :  { %v2894_v52 = vmul.f32 %v4637_v59, %v2892_v35  ;;  %vm2900_vm15 = vweird.f32 %v4637_v59 }
 0x696   :  { %vm2901_vm9 = vmor %vm2899_vm1, %vm2900_vm15 }
 0x697   :  { %v2895_v47 = vmul.f32 %v4637_v59, %v2894_v52 }
 0x699   :  { %v2896_v51 = vmul.f32 0.5, %v2895_v47 }
 0x69b   :  { %v2897_v33 = vsub.f32 1.5, %v2896_v51 }
 0x69d   :  { %v2898_v34 = vmul.f32 %v4637_v59, %v2897_v33 }
 0x69f   :  { %v2902_v13 = vsel %vm2901_vm9, %v4637_v59, %v2898_v34 }
 0x6a0   :  { %v2903_v20 = vmul.f32 %v2902_v13, %v2874_v25  ;;  %v2904_v38 = vmul.f32 %v2902_v13, %v2875_v42  ;;  %v2905_v17 = vmul.f32 %v2902_v13, %v2876_v12 }
 0x6a2   :  { %v2907_v8 = vmul.f32 %v2906_v1, %v2903_v20  ;;  %v2908_v24 = vmul.f32 %v2906_v1, %v2904_v38  ;;  %v2909_v16 = vmul.f32 %v2906_v1, %v2905_v17 }
 0x6a4   :  { %v2911_v22 = vadd.f32 %v2910_v2, %v2907_v8  ;;  %v2912_v58 = vadd.f32 %v2910_v2, %v2908_v24  ;;  %v2913_v45 = vadd.f32 %v2910_v2, %v2909_v16 }
 0x6a6   :  { %v6405_v57 = vmax.f32 %v2911_v22, 0.0  ;;  %v6407_v3 = vmax.f32 %v2912_v58, 0.0  ;;  %v6409_v4 = vmax.f32 %v2913_v45, 0.0  ;;  %v3030_v58 = vld [vmem:[%s7093_s26 + $0x8] sm:$0xff]  ;;  %v3029_v45 = vld [vmem:[%s7093_s26] sm:$0xff] }
 0x6a7   :  { %3050 = vmatpush.msra.mxu1 %v3030_v58 }
 0x6a8   :  { %v2942_v19 = vmul.f32 %v6403_v27, %v6407_v3  ;;  %v2943_v53 = vmul.f32 0.0, %v6409_v4  ;;  %v2955_v49 = vmul.f32 0.0, %v6405_v57  ;;  %v2944_v18 = vsel %vm1660_vm8, %v6405_v57, -inf }
 0x6a9   :  { %v2956_v32 = vmul.f32 %v6412_v7, %v6407_v3  ;;  %v2969_v25 = vsel %vm1660_vm8, %v6405_v57, 0.0  ;;  %v2960_v50 = vsel %vm1660_vm8, %v6409_v4, -inf  ;;  %v2984_v48 = vsel %vm1660_vm8, %v6409_v4, 0.0  ;;  %3051 = vmatpush.msra.mxu1 %v3029_v45  ;;  %v4573_v45 = vld [vmem:[%s6958_s14 + $0x48] sm:$0xf] }
 0x6aa   :  { %v2945_v61 = vsel %vm1660_vm8, %v2942_v19, -inf  ;;  %v2958_v5 = vsel %vm1660_vm8, %v2955_v49, -inf  ;;  %v2970_v42 = vsel %vm1660_vm8, %v2942_v19, 0.0  ;;  %v2946_v12 = vsel %vm1660_vm8, %v2943_v53, -inf }
 0x6ab   :  { %v2947_v21 = vmax.f32 %v2944_v18, %v2945_v61  ;;  %v2959_v15 = vsel %vm1660_vm8, %v2956_v32, -inf  ;;  %v2971_v23 = vadd.f32 %v2970_v42, %v2969_v25  ;;  %v2972_v54 = vsel %vm1660_vm8, %v2943_v53, 0.0 }
 0x6ac   :  { %v2961_v36 = vmax.f32 %v2958_v5, %v2959_v15  ;;  %v2981_v28 = vsel %vm1660_vm8, %v2955_v49, 0.0  ;;  %v2982_v56 = vsel %vm1660_vm8, %v2956_v32, 0.0  ;;  %v3004_v19 = vperm.slane %v6394_v63, 7  ;;  %v4665_v32 = vld [vmem:[#allocation6 + $0x8] sm:$0xff] }
 0x6ad   :  { %v2948_v44 = vmax.f32 %v2947_v21, %v2946_v12  ;;  %v2973_v37 = vadd.f32 %v2972_v54, %v2971_v23  ;;  %v2983_v39 = vadd.f32 %v2982_v56, %v2981_v28  ;;  %v3032_v61 = vperm.slane %v4665_v32, 2  ;;  %v4566_v32 = vld [vmem:[%s6958_s14 + $0x10] sm:$0xff] }
 0x6ae   :  { %v2962_v55 = vmax.f32 %v2961_v36, %v2960_v50 }
 0x6af   :  { %v2949_v11 = vrot.slane %v2948_v44, 4  ;;  %v2974_v29 = vrot.slane %v2973_v37, 4  ;;  %v2985_v40 = vadd.f32 %v2984_v48, %v2983_v39 }
 0x6b0   :  { %v2963_v0 = vrot.slane %v2962_v55, 4 }
 0x6b1   :  { %v2950_v46 = vmax.f32 %v2948_v44, %v2949_v11  ;;  %v2975_v31 = vadd.f32 %v2974_v29, %v2973_v37  ;;  %v2986_v35 = vrot.slane %v2985_v40, 4 }
 0x6b2   :  { %v2964_v6 = vmax.f32 %v2962_v55, %v2963_v0 }
 0x6b3   :  { %v2951_v43 = vrot.slane %v2950_v46, 2  ;;  %v2976_v14 = vrot.slane %v2975_v31, 2  ;;  %v2987_v30 = vadd.f32 %v2986_v35, %v2985_v40 }
 0x6b4   :  { %v2965_v59 = vrot.slane %v2964_v6, 2 }
 0x6b5   :  { %v2952_v52 = vmax.f32 %v2950_v46, %v2951_v43  ;;  %v2977_v9 = vadd.f32 %v2976_v14, %v2975_v31  ;;  %v2988_v47 = vrot.slane %v2987_v30, 2 }
 0x6b6   :  { %v2966_v51 = vmax.f32 %v2964_v6, %v2965_v59 }
 0x6b7   :  { %v2953_v33 = vrot.slane %v2952_v52, 1  ;;  %v2978_v34 = vrot.slane %v2977_v9, 1  ;;  %v2989_v1 = vadd.f32 %v2988_v47, %v2987_v30 }
 0x6b8   :  { %v2967_v62 = vrot.slane %v2966_v51, 1 }
 0x6b9   :  { %v2954_v13 = vmax.f32 %v2952_v52, %v2953_v33  ;;  %v2979_v20 = vadd.f32 %v2978_v34, %v2977_v9  ;;  %v2990_v38 = vrot.slane %v2989_v1, 1 }
 0x6ba   :  { %v2968_v17 = vmax.f32 %v2966_v51, %v2967_v62 }
 0x6bb   :  { %v2980_v2 = vmul.f32 0.083333336, %v2979_v20  ;;  %v2991_v60 = vadd.f32 %v2990_v38, %v2989_v1  ;;  %v3114_v20 = vld [vmem:[%s7094_s5] sm:$0xff] }
 0x6bc   :  { %v2993_v8 = vsel %vm1236_vm4, %v2954_v13, %v2968_v17  ;;  %v3115_v17 = vld [vmem:[%s7094_s5 + $0x8] sm:$0xff] }
 0x6bd   :  { %v2992_v24 = vmul.f32 0.083333336, %v2991_v60  ;;  %v2994_v16 = vsel %vm1168_vm3, %v2993_v8, %v2980_v2  ;;  %v3116_v2 = vld [vmem:[%s7094_s5 + $0x10] sm:$0xff]  ;;  %v4567_v8 = vld [vmem:[%s6958_s14 + $0x18] sm:$0xf] }
 0x6bf   :  { %v2995_v22 = vsel %vm1100_vm2, %v2994_v16, %v2992_v24  ;;  %v4570_v16 = vld [vmem:[%s6958_s14 + $0x30] sm:$0xff] }
 0x6c0   :  { %4539 = vmatmul.msk.f32.vlgmr.msrb.gmra.mxu0 %vm1660_vm8, %v2995_v22  ;;  %v3506_v22 = vld [vmem:[%s6958_s14 + $0x8] sm:$0xf] }
 0x73d   :  { %v3025_v53 = vpop.f32.mrf.mxu0 }
 0x73e   :  { %v3026_v49 = vadd.f32 %v3025_v53, %v3004_v19  ;;  %v4568_v19 = vld [vmem:[%s6958_s14 + $0x20] sm:$0xff] }
 0x73f   :  { %v3505_v53 = vld [vmem:[%s6958_s14] sm:$0xff] }
 0x740   :  { %v3028_v18 = vmax.f32 %v3026_v49, 0.0  ;;  %v4576_v49 = vld [vmem:[%s6958_s14 + $0x60] sm:$0xff] }
 0x742   :  { %4540 = vmatmul.msk.f32.vlgmr.msra.gmra.mxu1 %vm1942_vm13, %v3028_v18  ;;  %v4571_v18 = vld [vmem:[%s6958_s14 + $0x38] sm:$0xf] }
 0x7bf   :  { %v3053_v5 = vpop.f32.mrf.mxu1 }
 0x7c0   :  { %v3054_v25 = vadd.f32 %v3053_v5, %v3032_v61  ;;  %v4579_v61 = vld [vmem:[%s6958_s14 + $0x78] sm:$0xf]  ;;  %v4574_v5 = vld [vmem:[%s6958_s14 + $0x50] sm:$0xff] }
 0x7c2   :  { %v3057_v42 = vrot.slane %v3054_v25, 2 }
 0x7c4   :  { %v3059_v12 = vadd.f32 %v3057_v42, %v3054_v25  ;;  %v4569_v25 = vld [vmem:[%s6958_s14 + $0x28] sm:$0xf] }
 0x7c5   :  { %v4577_v42 = vld [vmem:[%s6958_s14 + $0x68] sm:$0xf] }
 0x7c6   :  { %v4541_v21 = vmul.f32 -1.442695, %v3059_v12  ;;  %v4572_v12 = vld [vmem:[%s6958_s14 + $0x40] sm:$0xff] }
 0x7c8   :  { %4638 = vpow2.f32 %v4541_v21  ;;  %v4580_v21 = vld [vmem:[%s6958_s14 + $0x80] sm:$0xff] }
 0x7ce   :  { %v4639_v15 = vpop.eup %4638 }
 0x7cf   :  { %v3063_v23 = vadd.f32 1.0, %v4639_v15  ;;  %v4575_v15 = vld [vmem:[%s6958_s14 + $0x58] sm:$0xf] }
 0x7d1   :  { %4640 = vrcp.f32 %v3063_v23  ;;  %v3075_v63 = vand.u32 2147483648, %v3063_v23  ;;  %v3073_v44 = vand.u32 2147483647, %v3063_v23  ;;  %vm3069_vm15 = vweird.f32 %v3063_v23 }
 0x7d3   :  { %v3076_v37 = vor.u32 1.1754944e-38, %v3075_v63  ;;  %vm3074_vm9 = vcmp.eq.f32.partialorder %v3073_v44, 8.507059e+37 }
 0x7d7   :  { %v4641_v36 = vpop.eup %4640 }
 0x7d8   :  { %v3065_v54 = vmul.f32 %v4641_v36, %v3063_v23  ;;  %vm3070_vm14 = vweird.f32 %v4641_v36  ;;  %v4578_v23 = vld [vmem:[%s6958_s14 + $0x70] sm:$0xff] }
 0x7d9   :  { %vm3071_vm1 = vmor %vm3069_vm15, %vm3070_vm14  ;;  %vm3770_vm14 = vcmp.ge.s32.totalorder %v6392_v41, 6 }
 0x7da   :  { %v3066_v28 = vsub.f32 1.0, %v3065_v54 }
 0x7dc   :  { %v3067_v56 = vmul.f32 %v4641_v36, %v3066_v28 }
 0x7de   :  { %v3068_v50 = vadd.f32 %v4641_v36, %v3067_v56 }
 0x7e0   :  { %v3072_v39 = vsel %vm3071_vm1, %v4641_v36, %v3068_v50  ;;  %v4581_v36 = vld [vmem:[%s6958_s14 + $0x88] sm:$0xf] }
 0x7e1   :  { %v3077_v55 = vsel %vm3074_vm9, %v3076_v37, %v3072_v39  ;;  %v3170_v37 = vld [vmem:[%s7095_s1] sm:$0xff]  ;;  %v3171_v39 = vld [vmem:[%s7095_s1 + $0x8] sm:$0xff] }
 0x7e2   :  { %v3079_v48 = vperm.slane %v3077_v55, 0  ;;  %v3083_v11 = vperm.slane %v3077_v55, 1  ;;  %v3172_v55 = vld [vmem:[%s7095_s1 + $0x10] sm:$0xff] }
 0x7e4   :  { %v3084_v29 = vmul.f32 0.0, %v3083_v11  ;;  %v3082_v40 = vmul.f32 0.0, %v3079_v48  ;;  %v3081_v0 = vmul.f32 %v6403_v27, %v3079_v48  ;;  %v3085_v46 = vmul.f32 %v6412_v7, %v3083_v11 }
 0x7e6   :  { %v3087_v31 = vadd.f32 %v3084_v29, %v3079_v48  ;;  %v3089_v35 = vadd.f32 %v3083_v11, %v3082_v40  ;;  %v3088_v6 = vadd.f32 %v3085_v46, %v3081_v0  ;;  %v3280_v48 = vld [vmem:[#allocation4 + $0x1f8] sm:$0xff]  ;;  %v3281_v11 = vld [vmem:[#allocation4 + $0x200] sm:$0xff]  ;;  %v3283_v29 = vld [vmem:[#allocation4 + $0x210] sm:$0xff] }
 0x7e7   :  { %3303 = vmatpush.msra.mxu2 %v3280_v48  ;;  %3325 = vmatpush.msrb.mxu1 %v3281_v11  ;;  %v3284_v40 = vld [vmem:[#allocation4 + $0x218] sm:$0xff]  ;;  %v3271_v0 = vld [vmem:[#allocation4 + $0x1b0] sm:$0xff]  ;;  %v3234_v48 = vld [vmem:[#allocation4 + $0x88] sm:$0xff] }
 0x7e8   :  { %v6451_v43 = vmul.f32 %v3087_v31, %v6405_v57  ;;  %v6454_v14 = vmul.f32 %v3089_v35, %v6409_v4  ;;  %v6457_v30 = vmul.f32 %v3088_v6, %v6407_v3  ;;  %v3272_v46 = vld [vmem:[#allocation4 + $0x1b8] sm:$0xff]  ;;  %v3274_v31 = vld [vmem:[#allocation4 + $0x1c8] sm:$0xff]  ;;  %v3275_v35 = vld [vmem:[#allocation4 + $0x1d0] sm:$0xff] }
 0x7e9   :  { %3304 = vmatpush.msra.mxu2 %v3271_v0  ;;  %3326 = vmatpush.msrb.mxu1 %v3272_v46  ;;  %v3262_v6 = vld [vmem:[#allocation4 + $0x168] sm:$0xff]  ;;  %v3219_v11 = vld [vmem:[#allocation4 + $0x10] sm:$0xff]  ;;  %v3225_v0 = vld [vmem:[#allocation4 + $0x40] sm:$0xff] }
 0x7ea   :  { %v3102_v59 = vsel %vm1660_vm8, %v6451_v43, 0.0  ;;  %v3108_v52 = vsel %vm1660_vm8, %v6454_v14, 0.0  ;;  %v3105_v7 = vsel %vm1660_vm8, %v6457_v30, 0.0  ;;  %v3093_v57 = vsel %vm1660_vm8, %v6451_v43, -inf }
 0x7eb   :  { %3103 = vadd.xlane.f32.xlu1 %v3102_v59  ;;  %3109 = vadd.xlane.f32.xlu0 %v3108_v52  ;;  %v3099_v4 = vsel %vm1660_vm8, %v6454_v14, -inf  ;;  %v3096_v3 = vsel %vm1660_vm8, %v6457_v30, -inf  ;;  %v3253_v59 = vld [vmem:[#allocation4 + $0x120] sm:$0xff]  ;;  %v3254_v52 = vld [vmem:[#allocation4 + $0x128] sm:$0xff] }
 0x7ec   :  { %3106 = vadd.xlane.f32.xlu2 %v3105_v7  ;;  %3305 = vmatpush.msra.mxu2 %v3262_v6  ;;  %v3256_v7 = vld [vmem:[#allocation4 + $0x138] sm:$0xff] }
 0x7ee   :  { %3306 = vmatpush.msra.mxu2 %v3253_v59  ;;  %v3277_v59 = vld [vmem:[#allocation4 + $0x1e0] sm:$0xff] }
 0x7f3   :  { %3094 = vmax.xlane.f32.xlu1 %v3093_v57  ;;  %3100 = vmax.xlane.f32.xlu0 %v3099_v4  ;;  %v3257_v57 = vld [vmem:[#allocation4 + $0x140] sm:$0xff]  ;;  %v3244_v4 = vld [vmem:[#allocation4 + $0xd8] sm:$0xff] }
 0x7f4   :  { %3097 = vmax.xlane.f32.xlu2 %v3096_v3  ;;  %v3245_v3 = vld [vmem:[#allocation4 + $0xe0] sm:$0xff]  ;;  %3307 = vmatpush.msra.mxu2 %v3244_v4  ;;  %v3250_v4 = vld [vmem:[#allocation4 + $0x108] sm:$0xff] }
 0x85e   :  { %v3110_v9 = vpop.xlane.xlu0 %3109  ;;  %v3104_v33 = vpop.xlane.xlu1 %3103 }
 0x85f   :  { %v3113_v47 = vmul.f32 %v3110_v9, %v5902_v26  ;;  %v3107_v51 = vpop.xlane.xlu2 %3106  ;;  %v3111_v1 = vmul.f32 %v3104_v33, %v5902_v26  ;;  %v3247_v9 = vld [vmem:[#allocation4 + $0xf0] sm:$0xff]  ;;  %v3236_v33 = vld [vmem:[#allocation4 + $0x98] sm:$0xff] }
 0x860   :  { %v3112_v34 = vmul.f32 %v3107_v51, %v5902_v26  ;;  %v3235_v51 = vld [vmem:[#allocation4 + $0x90] sm:$0xff] }
 0x861   :  { %3136 = vmatpush.msra.mxu3 %v3113_v47  ;;  %v3248_v47 = vld [vmem:[#allocation4 + $0xf8] sm:$0xff]  ;;  %3308 = vmatpush.msra.mxu2 %v3235_v51 }
 0x863   :  { %3137 = vmatpush.msra.mxu3 %v3112_v34  ;;  %v3238_v34 = vld [vmem:[#allocation4 + $0xa8] sm:$0xff] }
 0x865   :  { %3138 = vmatpush.msra.mxu3 %v3111_v1  ;;  %v3239_v1 = vld [vmem:[#allocation4 + $0xb0] sm:$0xff] }
 0x866   :  { %v3101_v62 = vpop.xlane.xlu0 %3100  ;;  %v3095_v38 = vpop.xlane.xlu1 %3094 }
 0x867   :  { %3139 = vmatpush.msra.mxu3 %v3101_v62  ;;  %v3098_v13 = vpop.xlane.xlu2 %3097  ;;  %v3226_v62 = vld [vmem:[#allocation4 + $0x48] sm:$0xff] }
 0x868   :  { %3309 = vmatpush.msra.mxu2 %v3226_v62 }
 0x869   :  { %3140 = vmatpush.msra.mxu3 %v3098_v13  ;;  %v3227_v13 = vld [vmem:[#allocation4 + $0x50] sm:$0xff] }
 0x86b   :  { %3141 = vmatpush.msra.mxu3 %v3095_v38  ;;  %v3230_v38 = vld [vmem:[#allocation4 + $0x68] sm:$0xff] }
 0x86c   :  { %4542 = vmatmul.msk.f32.vlgmr.msra.gmra.mxu3 %vm2166_vm12, %v3114_v20  ;;  %v3229_v20 = vld [vmem:[#allocation4 + $0x60] sm:$0xff] }
 0x86d   :  { %3371 = vmatpush.msrb.mxu3 %v3283_v29  ;;  %v3222_v29 = vld [vmem:[#allocation4 + $0x28] sm:$0xff] }
 0x86f   :  { %3372 = vmatpush.msrb.mxu3 %v3274_v31 }
 0x874   :  { %4543 = vmatmul.msk.f32.gmra.mxu3 %vm2166_vm12, %v3115_v17  ;;  %v3217_v17 = vld [vmem:[#allocation4] sm:$0xff] }
 0x875   :  { %3310 = vmatpush.msra.mxu2 %v3217_v17 }
 0x87c   :  { %4544 = vmatmul.msk.f32.gmra.mxu3 %vm2166_vm12, %v3116_v2  ;;  %v3218_v2 = vld [vmem:[#allocation4 + $0x8] sm:$0xff] }
 0x8ef   :  { %v3143_v60 = vpop.f32.mrf.mxu3 }
 0x8f0   :  { %3154 = vperm.xlu1 %4622, %v3143_v60   ;;  %v3220_v60 = vld [vmem:[#allocation4 + $0x18] sm:$0xff] }
 0x8f7   :  { %v3146_v24 = vpop.f32.mrf.mxu3 }
 0x8f8   :  { %3537 = vperm.xlu1 %4622, %v4567_v8   ;;  %3159 = vperm.xlu2 %4623, %v3146_v24   ;;  %v3221_v8 = vld [vmem:[#allocation4 + $0x20] sm:$0xff]  ;;  %v3282_v24 = vld [vmem:[#allocation4 + $0x208] sm:$0xff] }
 0x8f9   :  { %3348 = vmatpush.msrb.mxu2 %v3282_v24 }
 0x8ff   :  { %v3149_v58 = vpop.f32.mrf.mxu3 }
 0x900   :  { %3578 = vperm.xlu1 %4622, %v4570_v16   ;;  %3514 = vperm.xlu2 %4623, %v3506_v22   ;;  %v3285_v16 = vld [vmem:[#allocation4 + $0x220] sm:$0xff]  ;;  %v3287_v22 = vld [vmem:[#allocation4 + $0x230] sm:$0xff] }
 0x901   :  { %3164 = vperm.xlu0 %4621, %v3149_v58   ;;  %v3288_v58 = vld [vmem:[#allocation4 + $0x238] sm:$0xff] }
 0x908   :  { %3598 = vperm.xlu1 %4622, %v4573_v45   ;;  %3555 = vperm.xlu2 %4623, %v4568_v19   ;;  %v3273_v45 = vld [vmem:[#allocation4 + $0x1c0] sm:$0xff]  ;;  %v3276_v19 = vld [vmem:[#allocation4 + $0x1d8] sm:$0xff] }
 0x909   :  { %3509 = vperm.xlu0 %4621, %v3505_v53   ;;  %v3278_v53 = vld [vmem:[#allocation4 + $0x1e8] sm:$0xff]  ;;  %3349 = vmatpush.msrb.mxu2 %v3273_v45 }
 0x910   :  { %3639 = vperm.xlu1 %4622, %v4576_v49   ;;  %3583 = vperm.xlu2 %4623, %v4571_v18   ;;  %v3279_v49 = vld [vmem:[#allocation4 + $0x1f0] sm:$0xff]  ;;  %v3264_v18 = vld [vmem:[#allocation4 + $0x178] sm:$0xff] }
 0x911   :  { %3532 = vperm.xlu0 %4621, %v4566_v32   ;;  %v3267_v32 = vld [vmem:[#allocation4 + $0x190] sm:$0xff]  ;;  %3350 = vmatpush.msrb.mxu2 %v3264_v18 }
 0x918   :  { %3667 = vperm.xlu1 %4622, %v4579_v61   ;;  %3616 = vperm.xlu2 %4623, %v4574_v5   ;;  %v3269_v61 = vld [vmem:[#allocation4 + $0x1a0] sm:$0xff]  ;;  %v3270_v5 = vld [vmem:[#allocation4 + $0x1a8] sm:$0xff] }
 0x919   :  { %3560 = vperm.xlu0 %4621, %v4569_v25   ;;  %v3255_v25 = vld [vmem:[#allocation4 + $0x130] sm:$0xff] }
 0x91a   :  { %3351 = vmatpush.msrb.mxu2 %v3255_v25 }
 0x920   :  { %3644 = vperm.xlu2 %4623, %v4577_v42   ;;  %v3258_v42 = vld [vmem:[#allocation4 + $0x148] sm:$0xff] }
 0x921   :  { %3593 = vperm.xlu0 %4621, %v4572_v12   ;;  %v3260_v12 = vld [vmem:[#allocation4 + $0x158] sm:$0xff] }
 0x928   :  { %3683 = vperm.xlu2 %4623, %v4580_v21   ;;  %v3261_v21 = vld [vmem:[#allocation4 + $0x160] sm:$0xff] }
 0x929   :  { %3621 = vperm.xlu0 %4621, %v4575_v15   ;;  %v3246_v15 = vld [vmem:[#allocation4 + $0xe8] sm:$0xff] }
 0x92a   :  { %3352 = vmatpush.msrb.mxu2 %v3246_v15 }
 0x931   :  { %3662 = vperm.xlu0 %4621, %v4578_v23   ;;  %v3249_v23 = vld [vmem:[#allocation4 + $0x100] sm:$0xff] }
 0x939   :  { %3688 = vperm.xlu0 %4621, %v4581_v36   ;;  %v3251_v36 = vld [vmem:[#allocation4 + $0x110] sm:$0xff] }
 0x952   :  { %v3160_v54 = vpop.permute.xlu2 %3159 }
 0x953   :  { %v3168_v44 = vmul.f32 %v3160_v54, %v6457_v30  ;;  %v3266_v30 = vld [vmem:[#allocation4 + $0x188] sm:$0xff] }
 0x962   :  { %v3155_v56 = vpop.permute.xlu1 %3154 }
 0x963   :  { %v3167_v50 = vmul.f32 %v3155_v56, %v6451_v43  ;;  %v3263_v43 = vld [vmem:[#allocation4 + $0x170] sm:$0xff]  ;;  %v3240_v56 = vld [vmem:[#allocation4 + $0xb8] sm:$0xff] }
 0x964   :  { %3327 = vmatpush.msrb.mxu1 %v3263_v43 }
 0x966   :  { %3328 = vmatpush.msrb.mxu1 %v3254_v52  ;;  %v3268_v52 = vld [vmem:[#allocation4 + $0x198] sm:$0xff] }
 0x968   :  { %3329 = vmatpush.msrb.mxu1 %v3245_v3  ;;  %v3241_v3 = vld [vmem:[#allocation4 + $0xc0] sm:$0xff] }
 0x96a   :  { %3330 = vmatpush.msrb.mxu1 %v3236_v33 }
 0x96c   :  { %3331 = vmatpush.msrb.mxu1 %v3227_v13  ;;  %v3538_v13 = vpop.permute.xlu1 %3537 }
 0x96e   :  { %3332 = vmatpush.msrb.mxu1 %v3218_v2 }
 0x970   :  { %3417 = vmatpush.msra.mxu1 %v3285_v16 }
 0x972   :  { %3418 = vmatpush.msra.mxu1 %v3276_v19 }
 0x973   :  { %v3165_v28 = vpop.permute.xlu0 %3164 }
 0x974   :  { %v3169_v63 = vmul.f32 %v3165_v28, %v6454_v14  ;;  %v3265_v14 = vld [vmem:[#allocation4 + $0x180] sm:$0xff]  ;;  %3419 = vmatpush.msra.mxu1 %v3267_v32  ;;  %v3252_v28 = vld [vmem:[#allocation4 + $0x118] sm:$0xff]  ;;  %v3579_v24 = vpop.permute.xlu1 %3578 }
 0x975   :  { %3373 = vmatpush.msrb.mxu3 %v3265_v14 }
 0x976   :  { %3195 = vmatpush.msra.mxu0 %v3169_v63  ;;  %3420 = vmatpush.msra.mxu1 %v3258_v42  ;;  %v3237_v63 = vld [vmem:[#allocation4 + $0xa0] sm:$0xff] }
 0x977   :  { %3374 = vmatpush.msrb.mxu3 %v3256_v7  ;;  %3353 = vmatpush.msrb.mxu2 %v3237_v63 }
 0x978   :  { %3196 = vmatpush.msra.mxu0 %v3168_v44  ;;  %3421 = vmatpush.msra.mxu1 %v3249_v23  ;;  %v3242_v44 = vld [vmem:[#allocation4 + $0xc8] sm:$0xff] }
 0x979   :  { %3375 = vmatpush.msrb.mxu3 %v3247_v9  ;;  %v3232_v9 = vld [vmem:[#allocation4 + $0x78] sm:$0xff] }
 0x97a   :  { %3197 = vmatpush.msra.mxu0 %v3167_v50  ;;  %v3243_v50 = vld [vmem:[#allocation4 + $0xd0] sm:$0xff]  ;;  %3422 = vmatpush.msra.mxu1 %v3240_v56 }
 0x97b   :  { %4545 = vmatmul.msk.f32.vlgmr.msra.gmra.mxu0 %vm1942_vm13, %v3170_v37  ;;  %3376 = vmatpush.msrb.mxu3 %v3238_v34  ;;  %v3228_v37 = vld [vmem:[#allocation4 + $0x58] sm:$0xff]  ;;  %v3510_v51 = vpop.permute.xlu0 %3509  ;;  %v3515_v34 = vpop.permute.xlu2 %3514 }
 0x97c   :  { %3394 = vmatpush.msrb.mxu0 %v3284_v40  ;;  %3354 = vmatpush.msrb.mxu2 %v3228_v37  ;;  %v3224_v40 = vld [vmem:[#allocation4 + $0x38] sm:$0xff] }
 0x97d   :  { %3377 = vmatpush.msrb.mxu3 %v3229_v20 }
 0x97e   :  { %3395 = vmatpush.msrb.mxu0 %v3275_v35  ;;  %3355 = vmatpush.msrb.mxu2 %v3219_v11 }
 0x97f   :  { %3378 = vmatpush.msrb.mxu3 %v3220_v60 }
 0x980   :  { %3396 = vmatpush.msrb.mxu0 %v3266_v30  ;;  %v3286_v30 = vld [vmem:[#allocation4 + $0x228] sm:$0xff] }
 0x981   :  { %3463 = vmatpush.msra.mxu3 %v3287_v22 }
 0x982   :  { %3397 = vmatpush.msrb.mxu0 %v3257_v57  ;;  %v3259_v57 = vld [vmem:[#allocation4 + $0x150] sm:$0xff] }
 0x983   :  { %4546 = vmatmul.msk.f32.gmra.mxu0 %vm1942_vm13, %v3171_v39  ;;  %3464 = vmatpush.msra.mxu3 %v3278_v53  ;;  %v3231_v39 = vld [vmem:[#allocation4 + $0x70] sm:$0xff]  ;;  %v3533_v33 = vpop.permute.xlu0 %3532  ;;  %v3556_v2 = vpop.permute.xlu2 %3555 }
 0x984   :  { %3398 = vmatpush.msrb.mxu0 %v3248_v47  ;;  %3423 = vmatpush.msra.mxu1 %v3231_v39  ;;  %v3223_v47 = vld [vmem:[#allocation4 + $0x30] sm:$0xff] }
 0x985   :  { %3465 = vmatpush.msra.mxu3 %v3269_v61 }
 0x986   :  { %3399 = vmatpush.msrb.mxu0 %v3239_v1  ;;  %3424 = vmatpush.msra.mxu1 %v3222_v29 }
 0x987   :  { %3466 = vmatpush.msra.mxu3 %v3260_v12 }
 0x988   :  { %3400 = vmatpush.msrb.mxu0 %v3230_v38 }
 0x989   :  { %3467 = vmatpush.msra.mxu3 %v3251_v36 }
 0x98a   :  { %3401 = vmatpush.msrb.mxu0 %v3221_v8 }
 0x98b   :  { %4547 = vmatmul.msk.f32.gmra.mxu0 %vm1942_vm13, %v3172_v55  ;;  %v3233_v55 = vld [vmem:[#allocation4 + $0x80] sm:$0xff]  ;;  %3468 = vmatpush.msra.mxu3 %v3242_v44  ;;  %v3561_v38 = vpop.permute.xlu0 %3560  ;;  %v3584_v45 = vpop.permute.xlu2 %3583 }
 0x98c   :  { %3486 = vmatpush.msra.mxu0 %v3288_v58 }
 0x98d   :  { %3469 = vmatpush.msra.mxu3 %v3233_v55 }
 0x98e   :  { %3487 = vmatpush.msra.mxu0 %v3279_v49  ;;  %v3599_v49 = vpop.permute.xlu1 %3598 }
 0x98f   :  { %3470 = vmatpush.msra.mxu3 %v3224_v40 }
 0x990   :  { %3488 = vmatpush.msra.mxu0 %v3270_v5 }
 0x992   :  { %3489 = vmatpush.msra.mxu0 %v3261_v21 }
 0x993   :  { %v3594_v22 = vpop.permute.xlu0 %3593  ;;  %v3617_v5 = vpop.permute.xlu2 %3616 }
 0x994   :  { %3490 = vmatpush.msra.mxu0 %v3252_v28 }
 0x996   :  { %3491 = vmatpush.msra.mxu0 %v3243_v50  ;;  %v3640_v36 = vpop.permute.xlu1 %3639 }
 0x998   :  { %3492 = vmatpush.msra.mxu0 %v3234_v48 }
 0x99a   :  { %3493 = vmatpush.msra.mxu0 %v3225_v0 }
 0x99b   :  { %v3622_v61 = vpop.permute.xlu0 %3621 }
 0x9a3   :  { %v3663_v48 = vpop.permute.xlu0 %3662 }
 0x9f8   :  { %v3199_v54 = vpop.f32.mrf.mxu0 }
 0xa00   :  { %v3202_v46 = vpop.f32.mrf.mxu0 }
 0xa01   :  { %v3210_v35 = vrot.slane %v3202_v46, 4 }
 0xa08   :  { %v3205_v31 = vpop.f32.mrf.mxu0 }
 0xa09   :  { %v3211_v6 = vrot.slane %v3205_v31, 4 }
 0xa0b   :  { %v3212_v43 = vsel %vm370_vm0, %v3210_v35, %v3211_v6  ;;  %v3216_v7 = vmax.f32 %v3202_v46, %v3211_v6 }
 0xa0c   :  { %v3215_v14 = vmax.f32 %v3199_v54, %v3212_v43 }
 0xa0e   :  { %4548 = vmatmul.msk.f32.vlgmr.msra.gmra.mxu2 %vm1660_vm8, %v3215_v14  ;;  %4550 = vmatmul.msk.f32.vlgmr.msrb.gmra.mxu1 %vm1660_vm8, %v3215_v14 }
 0xa0f   :  { %4554 = vmatmul.msk.f32.vlgmr.msrb.gmra.mxu3 %vm1660_vm8, %v3215_v14  ;;  %4556 = vmatmul.msk.f32.vlgmr.msrb.gmra.mxu0 %vm1660_vm8, %v3215_v14 }
 0xa10   :  { %3440 = vmatpush.msra.mxu2 %v3286_v30 }
 0xa12   :  { %3441 = vmatpush.msra.mxu2 %v3277_v59  ;;  %v3645_v59 = vpop.permute.xlu2 %3644 }
 0xa14   :  { %3442 = vmatpush.msra.mxu2 %v3268_v52 }
 0xa16   :  { %4549 = vmatmul.msk.f32.gmra.mxu2 %vm1660_vm8, %v3216_v7  ;;  %4551 = vmatmul.msk.f32.gmra.mxu1 %vm1660_vm8, %v3216_v7 }
 0xa17   :  { %4555 = vmatmul.msk.f32.gmra.mxu3 %vm1660_vm8, %v3216_v7  ;;  %4557 = vmatmul.msk.f32.gmra.mxu0 %vm1660_vm8, %v3216_v7 }
 0xa18   :  { %3443 = vmatpush.msra.mxu2 %v3259_v57 }
 0xa1a   :  { %3444 = vmatpush.msra.mxu2 %v3250_v4 }
 0xa1c   :  { %3445 = vmatpush.msra.mxu2 %v3241_v3 }
 0xa1e   :  { %4552 = vmatmul.msk.f32.vlgmr.msrb.gmra.mxu2 %vm1660_vm8, %v3215_v14  ;;  %4558 = vmatmul.msk.f32.vlgmr.msra.gmra.mxu1 %vm1660_vm8, %v3215_v14 }
 0xa1f   :  { %4562 = vmatmul.msk.f32.vlgmr.msra.gmra.mxu3 %vm1660_vm8, %v3215_v14  ;;  %4564 = vmatmul.msk.f32.vlgmr.msra.gmra.mxu0 %vm1660_vm8, %v3215_v14 }
 0xa20   :  { %3446 = vmatpush.msra.mxu2 %v3232_v9 }
 0xa22   :  { %3447 = vmatpush.msra.mxu2 %v3223_v47 }
 0xa26   :  { %4553 = vmatmul.msk.f32.gmra.mxu2 %vm1660_vm8, %v3216_v7  ;;  %4559 = vmatmul.msk.f32.gmra.mxu1 %vm1660_vm8, %v3216_v7 }
 0xa27   :  { %4563 = vmatmul.msk.f32.gmra.mxu3 %vm1660_vm8, %v3216_v7  ;;  %4565 = vmatmul.msk.f32.gmra.mxu0 %vm1660_vm8, %v3216_v7 }
 0xa2e   :  { %4560 = vmatmul.msk.f32.vlgmr.msra.gmra.mxu2 %vm1660_vm8, %v3215_v14 }
 0xa36   :  { %4561 = vmatmul.msk.f32.gmra.mxu2 %vm1660_vm8, %v3216_v7 }
 0xa8b   :  { %v3334_v62 = vpop.f32.mrf.mxu1 }
 0xa8c   :  { %v3403_v60 = vpop.f32.mrf.mxu0  ;;  %v3521_v25 = vrot.slane %v3334_v62, 5 }
 0xa8d   :  { %v3601_v50 = vmul.f32 %v3594_v22, %v3403_v60  ;;  %v3668_v22 = vpop.permute.xlu1 %3667 }
 0xa8e   :  { %v3526_v54 = vsel %vm1100_vm2, 0.0, %v3521_v25 }
 0xa8f   :  { %v3540_v11 = vmul.f32 %v3533_v33, %v3526_v54 }
 0xa91   :  { %v3312_v1 = vpop.f32.mrf.mxu2 }
 0xa92   :  { %v3380_v20 = vpop.f32.mrf.mxu3  ;;  %v3502_v12 = vrot.slane %v3312_v1, 4 }
 0xa93   :  { %v3337_v8 = vpop.f32.mrf.mxu1  ;;  %v3567_v28 = vrot.slane %v3380_v20, 7 }
 0xa94   :  { %v3406_v19 = vpop.f32.mrf.mxu0  ;;  %v3522_v63 = vrot.slane %v3337_v8, 5  ;;  %v3504_v37 = vsel %vm370_vm0, 0.0, %v3502_v12  ;;  %v3518_v29 = vmul.f32 %v3515_v34, %v3502_v12 }
 0xa95   :  { %v3572_v46 = vsel %vm1236_vm4, 0.0, %v3567_v28  ;;  %v3517_v43 = vmul.f32 %v3510_v51, %v3504_v37  ;;  %v3602_v14 = vmul.f32 %v3599_v49, %v3406_v19  ;;  %v3684_v37 = vpop.permute.xlu2 %3683 }
 0xa96   :  { %v3523_v31 = vsel %vm1100_vm2, %v3521_v25, %v3522_v63  ;;  %v3586_v9 = vmul.f32 %v3579_v24, %v3572_v46 }
 0xa97   :  { %v3541_v47 = vmul.f32 %v3538_v13, %v3523_v31 }
 0xa99   :  { %v3315_v17 = vpop.f32.mrf.mxu2  ;;  %v3694_v25 = vadd.f32 %v3541_v47, %v3518_v29 }
 0xa9a   :  { %v3383_v16 = vpop.f32.mrf.mxu3  ;;  %v4756_v17 = vmov 12.0  }
 0xa9b   :  { %v3426_v53 = vpop.f32.mrf.mxu1  ;;  %v3568_v39 = vrot.slane %v3383_v16, 7  ;;  %4642 = vrcp.f32 %v4756_v17 }
 0xa9c   :  { %v6574_v42 = vpop.f32.mrf.mxu0  ;;  %v3605_v35 = vrot.slane %v3426_v53, 1 }
 0xa9d   :  { %v3569_v52 = vsel %vm1236_vm4, %v3567_v28, %v3568_v39  ;;  %v3674_v12 = vrot.slane %v6574_v42, 4 }
 0xa9e   :  { %v3587_v60 = vmul.f32 %v3584_v45, %v3569_v52 }
 0xaa1   :  { %v3357_v58 = vpop.f32.mrf.mxu2 }
 0xaa2   :  { %v3472_v18 = vpop.f32.mrf.mxu3  ;;  %v3544_v21 = vrot.slane %v3357_v58, 6 }
 0xaa3   :  { %v3429_v15 = vpop.f32.mrf.mxu1  ;;  %v3651_v30 = vrot.slane %v3472_v18, 3 }
 0xaa4   :  { %v3606_v55 = vrot.slane %v3429_v15, 1  ;;  %v3549_v40 = vsel %vm1168_vm3, 0.0, %v3544_v21  ;;  %v3498_v3 = vpop.f32.mrf.mxu0 }
 0xaa5   :  { %v3563_v7 = vmul.f32 %v3556_v2, %v3549_v40  ;;  %v3675_v16 = vrot.slane %v3498_v3, 4 }
 0xaa6   :  { %v3607_v57 = vsel %vm1347_vm5, %v3605_v35, %v3606_v55  ;;  %v3610_v4 = vsel %vm1100_vm2, %v3606_v55, 0.0  ;;  %vm3710_vm5 = vcmask 519168  }
 0xaa7   :  { %v3624_v8 = vmul.f32 %v3617_v5, %v3607_v57  ;;  %v3625_v2 = vmul.f32 %v3622_v61, %v3610_v4  ;;  %v3695_v58 = vadd.f32 %v3586_v9, %v3563_v7  ;;  %v3676_v54 = vsel %vm370_vm0, %v3674_v12, %v3675_v16  ;;  %v3829_v16 = vld [vmem:[%s6956_s12 + $0x30] sm:$0xff] }
 0xaa9   :  { %v3360_v32 = vpop.f32.mrf.mxu2  ;;  %v3697_v45 = vadd.f32 %v3624_v8, %v3601_v50  ;;  %v3698_v5 = vadd.f32 %v3625_v2, %v3602_v14  ;;  %v3830_v2 = vld [vmem:[%s6956_s12 + $0x38] sm:$0xff] }
 0xaaa   :  { %v3545_v56 = vrot.slane %v3360_v32, 6  ;;  %v3475_v44 = vpop.f32.mrf.mxu3  ;;  %v3693_v32 = vadd.f32 %v3540_v11, %v3517_v43  ;;  %3843 = vmatpush.msrb.mxu1 %v3830_v2 }
 0xaab   :  { %v3652_v0 = vrot.slane %v3475_v44, 3 }
 0xaac   :  { %v3546_v6 = vsel %vm1168_vm3, %v3544_v21, %v3545_v56  ;;  %v3689_v21 = vpop.permute.xlu0 %3688  ;;  %v3701_v28 = vadd.f32 %v3695_v58, %v3693_v32  ;;  %v3828_v58 = vld [vmem:[%s6956_s12 + $0x28] sm:$0xff]  ;;  %3844 = vmatpush.msrb.mxu1 %v3829_v16 }
 0xaad   :  { %v3564_v33 = vmul.f32 %v3561_v38, %v3546_v6  ;;  %v3653_v34 = vsel %vm1483_vm7, %v3651_v30, %v3652_v0  ;;  %v3656_v62 = vsel %vm1236_vm4, %v3652_v0, 0.0  ;;  %v3692_v39 = vmul.f32 0.0, %v3689_v21 }
 0xaae   :  { %v3670_v19 = vmul.f32 %v3663_v48, %v3653_v34  ;;  %v3671_v53 = vmul.f32 %v3668_v22, %v3656_v62  ;;  %3845 = vmatpush.msrb.mxu1 %v3828_v58 }
 0xaaf   :  { %v3696_v38 = vadd.f32 %v3587_v60, %v3564_v33 }
 0xab1   :  { %v3449_v23 = vpop.f32.mrf.mxu2  ;;  %v3702_v63 = vadd.f32 %v3696_v38, %v3694_v25  ;;  %v3825_v38 = vld [vmem:[%s6956_s12 + $0x10] sm:$0xff] }
 0xab2   :  { %v3628_v51 = vrot.slane %v3449_v23, 2  ;;  %v4643_v23 = vpop.eup %4642 }
 0xab3   :  { %v3720_v11 = vmul.f32 12.0, %v4643_v23 }
 0xab5   :  { %v3721_v0 = vsub.f32 1.0, %v3720_v11 }
 0xab7   :  { %v3722_v35 = vmul.f32 %v4643_v23, %v3721_v0 }
 0xab9   :  { %v3452_v1 = vpop.f32.mrf.mxu2  ;;  %v3723_v14 = vadd.f32 %v4643_v23, %v3722_v35 }
 0xaba   :  { %v3629_v20 = vrot.slane %v3452_v1, 2 }
 0xabc   :  { %v3630_v24 = vsel %vm1415_vm6, %v3628_v51, %v3629_v20  ;;  %v3633_v13 = vsel %vm1168_vm3, %v3629_v20, 0.0  ;;  %vm3724_vm6 = vweird.f32 %v4643_v23 }
 0xabd   :  { %v3647_v49 = vmul.f32 %v3640_v36, %v3630_v24  ;;  %v3648_v18 = vmul.f32 %v3645_v59, %v3633_v13  ;;  %v3691_v36 = vmul.f32 %v3684_v37, %v3676_v54  ;;  %v3725_v52 = vsel %vm3724_vm6, %v4643_v23, %v3723_v14  ;;  %v3827_v24 = vld [vmem:[%s6956_s12 + $0x20] sm:$0xff]  ;;  %v3826_v13 = vld [vmem:[%s6956_s12 + $0x18] sm:$0xff] }
 0xabe   :  { %3846 = vmatpush.msrb.mxu1 %v3827_v24 }
 0xabf   :  { %v3699_v61 = vadd.f32 %v3670_v19, %v3647_v49  ;;  %v3700_v15 = vadd.f32 %v3671_v53, %v3648_v18  ;;  %v3824_v53 = vld [vmem:[%s6956_s12 + $0x8] sm:$0xff]  ;;  %v3823_v18 = vld [vmem:[%s6956_s12] sm:$0xff] }
 0xac0   :  { %3847 = vmatpush.msrb.mxu1 %v3826_v13 }
 0xac1   :  { %v3703_v56 = vadd.f32 %v3699_v61, %v3697_v45  ;;  %v3704_v44 = vadd.f32 %v3700_v15, %v3698_v5  ;;  %v4666_v5 = vld [vmem:[#allocation6] sm:$0xff] }
 0xac2   :  { %3848 = vmatpush.msrb.mxu1 %v3825_v38  ;;  %v3754_v61 = vperm.slane %v4666_v5, 2 }
 0xac3   :  { %v3705_v55 = vadd.f32 %v3703_v56, %v3701_v28  ;;  %v3706_v48 = vadd.f32 %v3704_v44, %v3702_v63  ;;  %v3757_v28 = vperm.slane %v4666_v5, 5  ;;  %v6659_v5 = vld [vmem:[#allocation6 + $0x8] sm:$0xff] }
 0xac4   :  { %3849 = vmatpush.msrb.mxu1 %v3824_v53 }
 0xac5   :  { %v3707_v42 = vadd.f32 %v3705_v55, %v3691_v36  ;;  %v3708_v29 = vadd.f32 %v3706_v48, %v3692_v39  ;;  %v6622_v39 = vsel %vm3762_vm11, 1.0, %v4755_v10  ;;  %v6625_v36 = vsel %vm3770_vm14, 1.0, %v4755_v10 }
 0xac6   :  { %3850 = vmatpush.msrb.mxu1 %v3823_v18 }
 0xac7   :  { %v3709_v50 = vsel %vm1660_vm8, %v3707_v42, 0.0  ;;  %v3711_v40 = vsel %vm3710_vm5, %v3708_v29, 0.0 }
 0xac8   :  { %v3712_v46 = vadd.f32 %v3711_v40, %v3709_v50 }
 0xaca   :  { %v3713_v31 = vrot.slane %v3712_v46, 4 }
 0xacc   :  { %v3714_v6 = vadd.f32 %v3713_v31, %v3712_v46 }
 0xace   :  { %v3715_v43 = vrot.slane %v3714_v6, 2 }
 0xad0   :  { %v3716_v30 = vadd.f32 %v3715_v43, %v3714_v6 }
 0xad2   :  { %v3717_v59 = vrot.slane %v3716_v30, 1 }
 0xad4   :  { %v3718_v7 = vadd.f32 %v3717_v59, %v3716_v30 }
 0xad6   :  { %v3726_v57 = vmul.f32 %v3725_v52, %v3718_v7 }
 0xad8   :  { %v3727_v4 = vsub.f32 %v3707_v42, %v3726_v57  ;;  %v3728_v3 = vsub.f32 %v3708_v29, %v3726_v57 }
 0xada   :  { %v3729_v9 = vmul.f32 %v3727_v4, %v3727_v4  ;;  %v3730_v47 = vmul.f32 %v3728_v3, %v3728_v3 }
 0xadc   :  { %v3731_v33 = vsel %vm1660_vm8, %v3729_v9, 0.0  ;;  %v3732_v34 = vsel %vm3710_vm5, %v3730_v47, 0.0 }
 0xadd   :  { %v3733_v1 = vadd.f32 %v3732_v34, %v3731_v33 }
 0xadf   :  { %v3734_v62 = vrot.slane %v3733_v1, 4 }
 0xae1   :  { %v3735_v51 = vadd.f32 %v3734_v62, %v3733_v1 }
 0xae3   :  { %v3736_v20 = vrot.slane %v3735_v51, 2 }
 0xae5   :  { %v3737_v17 = vadd.f32 %v3736_v20, %v3735_v51 }
 0xae7   :  { %v3738_v60 = vrot.slane %v3737_v17, 1 }
 0xae9   :  { %v3739_v8 = vadd.f32 %v3738_v60, %v3737_v17 }
 0xaeb   :  { %v3740_v22 = vmul.f32 %v3739_v8, %v3725_v52 }
 0xaed   :  { %v3741_v19 = vadd.f32 1e-05, %v3740_v22 }
 0xaef   :  { %4644 = vrsqrt.f32 %v3741_v19  ;;  %vm3748_vm12 = vweird.f32 %v3741_v19 }
 0xaf5   :  { %v4645_v49 = vpop.eup %4644 }
 0xaf6   :  { %v3743_v32 = vmul.f32 %v4645_v49, %v3741_v19  ;;  %vm3749_vm7 = vweird.f32 %v4645_v49 }
 0xaf7   :  { %vm3750_vm10 = vmor %vm3748_vm12, %vm3749_vm7 }
 0xaf8   :  { %v3744_v25 = vmul.f32 %v4645_v49, %v3743_v32 }
 0xafa   :  { %v3745_v12 = vmul.f32 0.5, %v3744_v25 }
 0xafc   :  { %v3746_v21 = vsub.f32 1.5, %v3745_v12  ;;  %v3858_v12 = vld [vmem:[%s6957_s13 + $0x10] sm:$0xff] }
 0xafd   :  { %3876 = vmatpush.msrb.mxu2 %v3858_v12  ;;  %v4012_v12 = vld [vmem:[%s6961_s17 + $0xf8] sm:$0xff] }
 0xafe   :  { %v3747_v45 = vmul.f32 %v4645_v49, %v3746_v21  ;;  %v3857_v21 = vld [vmem:[%s6957_s13 + $0x8] sm:$0xff] }
 0xaff   :  { %3877 = vmatpush.msrb.mxu2 %v3857_v21  ;;  %v4013_v21 = vld [vmem:[%s6961_s17 + $0x100] sm:$0xff] }
 0xb00   :  { %v3751_v15 = vsel %vm3750_vm10, %v4645_v49, %v3747_v45  ;;  %v3856_v45 = vld [vmem:[%s6957_s13] sm:$0xff] }
 0xb01   :  { %v3752_v23 = vmul.f32 %v3751_v15, %v3727_v4  ;;  %v3753_v54 = vmul.f32 %v3751_v15, %v3728_v3  ;;  %3878 = vmatpush.msrb.mxu2 %v3856_v45  ;;  %v4014_v45 = vld [vmem:[%s6961_s17 + $0x108] sm:$0xff] }
 0xb03   :  { %v3755_v63 = vmul.f32 %v3754_v61, %v3752_v23  ;;  %v3756_v56 = vmul.f32 %v3754_v61, %v3753_v54  ;;  %v3831_v61 = vperm.slane %v6659_v5, 0 }
 0xb05   :  { %v3758_v44 = vadd.f32 %v3757_v28, %v3755_v63  ;;  %v3759_v37 = vadd.f32 %v3757_v28, %v3756_v56  ;;  %v3859_v28 = vperm.slane %v6659_v5, 3 }
 0xb07   :  { %v6627_v55 = vmax.f32 %v3758_v44, 0.0  ;;  %v6629_v48 = vmax.f32 %v3759_v37, 0.0 }
 0xb09   :  { %v3779_v11 = vmul.f32 0.0, %v6629_v48  ;;  %v3778_v42 = vmul.f32 %v6622_v39, %v6627_v55  ;;  %v3789_v41 = vmul.f32 %v6625_v36, %v6627_v55  ;;  %v3790_v29 = vmul.f32 %v6403_v27, %v6629_v48 }
 0xb0b   :  { %v3780_v50 = vsel %vm1660_vm8, %v3778_v42, -inf  ;;  %v3781_v10 = vsel %vm3710_vm5, %v3779_v11, -inf  ;;  %v3791_v40 = vsel %vm1660_vm8, %v3789_v41, -inf  ;;  %v3792_v0 = vsel %vm3710_vm5, %v3790_v29, -inf }
 0xb0c   :  { %v3782_v46 = vmax.f32 %v3780_v50, %v3781_v10  ;;  %v3793_v31 = vmax.f32 %v3791_v40, %v3792_v0  ;;  %v3800_v35 = vsel %vm1660_vm8, %v3778_v42, 0.0  ;;  %v3801_v6 = vsel %vm3710_vm5, %v3779_v11, 0.0 }
 0xb0d   :  { %v3802_v43 = vadd.f32 %v3801_v6, %v3800_v35  ;;  %v3810_v14 = vsel %vm1660_vm8, %v3789_v41, 0.0  ;;  %v3811_v30 = vsel %vm3710_vm5, %v3790_v29, 0.0 }
 0xb0e   :  { %v3783_v59 = vrot.slane %v3782_v46, 4  ;;  %v3794_v52 = vrot.slane %v3793_v31, 4  ;;  %v3812_v7 = vadd.f32 %v3811_v30, %v3810_v14 }
 0xb0f   :  { %v3803_v57 = vrot.slane %v3802_v43, 4 }
 0xb10   :  { %v3784_v4 = vmax.f32 %v3782_v46, %v3783_v59  ;;  %v3795_v3 = vmax.f32 %v3793_v31, %v3794_v52  ;;  %v3813_v9 = vrot.slane %v3812_v7, 4 }
 0xb11   :  { %v3804_v47 = vadd.f32 %v3803_v57, %v3802_v43 }
 0xb12   :  { %v3785_v33 = vrot.slane %v3784_v4, 2  ;;  %v3796_v34 = vrot.slane %v3795_v3, 2  ;;  %v3814_v1 = vadd.f32 %v3813_v9, %v3812_v7 }
 0xb13   :  { %v3805_v62 = vrot.slane %v3804_v47, 2 }
 0xb14   :  { %v3786_v51 = vmax.f32 %v3784_v4, %v3785_v33  ;;  %v3797_v20 = vmax.f32 %v3795_v3, %v3796_v34  ;;  %v3815_v17 = vrot.slane %v3814_v1, 2 }
 0xb15   :  { %v3806_v60 = vadd.f32 %v3805_v62, %v3804_v47 }
 0xb16   :  { %v3787_v8 = vrot.slane %v3786_v51, 1  ;;  %v3798_v2 = vrot.slane %v3797_v20, 1  ;;  %v3816_v16 = vadd.f32 %v3815_v17, %v3814_v1 }
 0xb17   :  { %v3807_v22 = vrot.slane %v3806_v60, 1 }
 0xb18   :  { %v3788_v58 = vmax.f32 %v3786_v51, %v3787_v8  ;;  %v3799_v19 = vmax.f32 %v3797_v20, %v3798_v2  ;;  %v3817_v24 = vrot.slane %v3816_v16, 1 }
 0xb19   :  { %v3808_v13 = vadd.f32 %v3807_v22, %v3806_v60 }
 0xb1a   :  { %v3818_v38 = vadd.f32 %v3817_v24, %v3816_v16  ;;  %v3820_v53 = vsel %vm1236_vm4, %v3788_v58, %v3799_v19  ;;  %v3930_v58 = vld [vmem:[%s6959_s15] sm:$0xff]  ;;  %v4023_v19 = vld [vmem:[%s6961_s17 + $0x150] sm:$0xff]  ;;  %v4024_v24 = vld [vmem:[%s6961_s17 + $0x158] sm:$0xff] }
 0xb1b   :  { %v3809_v49 = vmul.f32 0.16666667, %v3808_v13  ;;  %v4025_v13 = vld [vmem:[%s6961_s17 + $0x160] sm:$0xff]  ;;  %4043 = vmatpush.msrb.mxu3 %v4023_v19  ;;  %4066 = vmatpush.msrb.mxu0 %v4024_v24  ;;  %v4235_v19 = vld [vmem:[%s6963_s19 + $0x8] sm:$0xf] }
 0xb1c   :  { %v3819_v18 = vmul.f32 0.16666667, %v3818_v38  ;;  %v4026_v38 = vld [vmem:[%s6961_s17 + $0x168] sm:$0xff]  ;;  %4089 = vmatpush.msra.mxu2 %v4025_v13  ;;  %v4234_v13 = vld [vmem:[%s6963_s19] sm:$0xff] }
 0xb1d   :  { %v3821_v32 = vsel %vm1168_vm3, %v3820_v53, %v3809_v49  ;;  %v4017_v53 = vld [vmem:[%s6961_s17 + $0x120] sm:$0xff]  ;;  %v4018_v49 = vld [vmem:[%s6961_s17 + $0x128] sm:$0xff] }
 0xb1e   :  { %v3822_v25 = vsel %vm1100_vm2, %v3821_v32, %v3819_v18  ;;  %v4019_v18 = vld [vmem:[%s6961_s17 + $0x130] sm:$0xff]  ;;  %v4020_v32 = vld [vmem:[%s6961_s17 + $0x138] sm:$0xff]  ;;  %4044 = vmatpush.msrb.mxu3 %v4017_v53  ;;  %4067 = vmatpush.msrb.mxu0 %v4018_v49  ;;  %v4232_v49 = vld [vmem:[%s6962_s18 + $0x8] sm:$0xff] }
 0xb1f   :  { %4585 = vmatmul.msk.f32.vlgmr.msrb.gmra.mxu1 %vm1660_vm8, %v3822_v25  ;;  %v4011_v25 = vld [vmem:[%s6961_s17 + $0xf0] sm:$0xff]  ;;  %4090 = vmatpush.msra.mxu2 %v4019_v18  ;;  %v4173_v18 = vld [vmem:[%s6967_s23] sm:$0xff] }
 0xb20   :  { %4045 = vmatpush.msrb.mxu3 %v4011_v25  ;;  %4068 = vmatpush.msrb.mxu0 %v4012_v12  ;;  %v4233_v53 = vld [vmem:[%s6962_s18 + $0x10] sm:$0xf] }
 0xb21   :  { %4091 = vmatpush.msra.mxu2 %v4013_v21  ;;  %v4179_v25 = vld [vmem:[%s6967_s23 + $0x30] sm:$0xf]  ;;  %v4181_v21 = vld [vmem:[%s6967_s23 + $0x40] sm:$0xf] }
 0xb9c   :  { %v3852_v15 = vpop.f32.mrf.mxu1 }
 0xb9d   :  { %v3853_v23 = vadd.f32 %v3852_v15, %v3831_v61  ;;  %v4005_v61 = vld [vmem:[%s6961_s17 + $0xc0] sm:$0xff]  ;;  %v4006_v15 = vld [vmem:[%s6961_s17 + $0xc8] sm:$0xff] }
 0xb9e   :  { %4046 = vmatpush.msrb.mxu3 %v4005_v61  ;;  %4069 = vmatpush.msrb.mxu0 %v4006_v15  ;;  %v4231_v61 = vld [vmem:[%s6962_s18] sm:$0xff]  ;;  %v4174_v15 = vld [vmem:[%s6967_s23 + $0x8] sm:$0xff] }
 0xb9f   :  { %v3855_v54 = vmax.f32 %v3853_v23, 0.0  ;;  %v4007_v23 = vld [vmem:[%s6961_s17 + $0xd0] sm:$0xff] }
 0xba0   :  { %4092 = vmatpush.msra.mxu2 %v4007_v23  ;;  %v4176_v23 = vld [vmem:[%s6967_s23 + $0x18] sm:$0xff] }
 0xba1   :  { %4586 = vmatmul.msk.f32.vlgmr.msrb.gmra.mxu2 %vm1942_vm13, %v3855_v54  ;;  %v4008_v54 = vld [vmem:[%s6961_s17 + $0xd8] sm:$0xff] }
 0xc24   :  { %v3880_v63 = vpop.f32.mrf.mxu2 }
 0xc25   :  { %v3881_v56 = vadd.f32 %v3880_v63, %v3859_v28  ;;  %v3999_v28 = vld [vmem:[%s6961_s17 + $0x90] sm:$0xff]  ;;  %v4000_v63 = vld [vmem:[%s6961_s17 + $0x98] sm:$0xff] }
 0xc26   :  { %4047 = vmatpush.msrb.mxu3 %v3999_v28  ;;  %4070 = vmatpush.msrb.mxu0 %v4000_v63 }
 0xc27   :  { %v3884_v44 = vrot.slane %v3881_v56, 2 }
 0xc29   :  { %v3886_v37 = vadd.f32 %v3884_v44, %v3881_v56  ;;  %v4001_v56 = vld [vmem:[%s6961_s17 + $0xa0] sm:$0xff]  ;;  %v4002_v44 = vld [vmem:[%s6961_s17 + $0xa8] sm:$0xff] }
 0xc2a   :  { %4093 = vmatpush.msra.mxu2 %v4001_v56  ;;  %v4180_v56 = vld [vmem:[%s6967_s23 + $0x38] sm:$0xf] }
 0xc2b   :  { %v4587_v11 = vmul.f32 -1.442695, %v3886_v37  ;;  %v3993_v37 = vld [vmem:[%s6961_s17 + $0x60] sm:$0xff] }
 0xc2c   :  { %4048 = vmatpush.msrb.mxu3 %v3993_v37  ;;  %v4182_v37 = vld [vmem:[%s6967_s23 + $0x48] sm:$0xf] }
 0xc2d   :  { %4646 = vpow2.f32 %v4587_v11  ;;  %v3994_v11 = vld [vmem:[%s6961_s17 + $0x68] sm:$0xff] }
 0xc2e   :  { %4071 = vmatpush.msrb.mxu0 %v3994_v11 }
 0xc33   :  { %v4647_v42 = vpop.eup %4646 }
 0xc34   :  { %v3890_v41 = vadd.f32 1.0, %v4647_v42  ;;  %v3995_v42 = vld [vmem:[%s6961_s17 + $0x70] sm:$0xff] }
 0xc35   :  { %4094 = vmatpush.msra.mxu2 %v3995_v42 }
 0xc36   :  { %4648 = vrcp.f32 %v3890_v41  ;;  %v3902_v40 = vand.u32 2147483648, %v3890_v41  ;;  %v3900_v46 = vand.u32 2147483647, %v3890_v41  ;;  %vm3896_vm3 = vweird.f32 %v3890_v41 }
 0xc38   :  { %v3903_v35 = vor.u32 1.1754944e-38, %v3902_v40  ;;  %vm3901_vm1 = vcmp.eq.f32.partialorder %v3900_v46, 8.507059e+37  ;;  %v3990_v40 = vld [vmem:[%s6961_s17 + $0x48] sm:$0xff] }
 0xc3c   :  { %v4649_v29 = vpop.eup %4648 }
 0xc3d   :  { %v3892_v50 = vmul.f32 %v4649_v29, %v3890_v41  ;;  %vm3897_vm2 = vweird.f32 %v4649_v29  ;;  %v3996_v41 = vld [vmem:[%s6961_s17 + $0x78] sm:$0xff] }
 0xc3e   :  { %vm3898_vm15 = vmor %vm3896_vm3, %vm3897_vm2 }
 0xc3f   :  { %v3893_v10 = vsub.f32 1.0, %v3892_v50  ;;  %v3988_v50 = vld [vmem:[%s6961_s17 + $0x38] sm:$0xff] }
 0xc40   :  { %4072 = vmatpush.msrb.mxu0 %v3988_v50 }
 0xc41   :  { %v3894_v0 = vmul.f32 %v4649_v29, %v3893_v10  ;;  %v3989_v10 = vld [vmem:[%s6961_s17 + $0x40] sm:$0xff] }
 0xc42   :  { %4095 = vmatpush.msra.mxu2 %v3989_v10 }
 0xc43   :  { %v3895_v31 = vadd.f32 %v4649_v29, %v3894_v0 }
 0xc45   :  { %v3899_v6 = vsel %vm3898_vm15, %v4649_v29, %v3895_v31  ;;  %v3987_v29 = vld [vmem:[%s6961_s17 + $0x30] sm:$0xff]  ;;  %v3981_v31 = vld [vmem:[%s6961_s17] sm:$0xff] }
 0xc46   :  { %v3904_v43 = vsel %vm3901_vm1, %v3903_v35, %v3899_v6  ;;  %4049 = vmatpush.msrb.mxu3 %v3987_v29  ;;  %v3982_v35 = vld [vmem:[%s6961_s17 + $0x8] sm:$0xff]  ;;  %v3983_v6 = vld [vmem:[%s6961_s17 + $0x10] sm:$0xff] }
 0xc47   :  { %v3906_v14 = vperm.slane %v3904_v43, 0  ;;  %v3909_v30 = vperm.slane %v3904_v43, 1  ;;  %4073 = vmatpush.msrb.mxu0 %v3982_v35  ;;  %v3984_v43 = vld [vmem:[%s6961_s17 + $0x18] sm:$0xff]  ;;  %4096 = vmatpush.msra.mxu2 %v3983_v6 }
 0xc48   :  { %4050 = vmatpush.msrb.mxu3 %v3981_v31 }
 0xc49   :  { %v3908_v59 = vmul.f32 0.0, %v3906_v14  ;;  %v3911_v52 = vmul.f32 %v6403_v27, %v3909_v30  ;;  %v3907_v7 = vmul.f32 %v6622_v39, %v3906_v14  ;;  %v3910_v57 = vmul.f32 %v6625_v36, %v3909_v30  ;;  %v4027_v14 = vld [vmem:[%s6961_s17 + $0x170] sm:$0xff]  ;;  %v4028_v30 = vld [vmem:[%s6961_s17 + $0x178] sm:$0xff]  ;;  %4602 = vmatpush.msk.msrb.mxu2 %vm370_vm0, %v4235_v19 }
 0xc4a   :  { %4135 = vmatpush.msra.mxu3 %v4027_v14  ;;  %4158 = vmatpush.msra.mxu0 %v4028_v30  ;;  %v4183_v14 = vld [vmem:[%s6967_s23 + $0x50] sm:$0xf] }
 0xc4b   :  { %v3913_v4 = vadd.f32 %v3911_v52, %v3908_v59  ;;  %v3912_v3 = vadd.f32 %v3910_v57, %v3907_v7  ;;  %v4021_v59 = vld [vmem:[%s6961_s17 + $0x140] sm:$0xff]  ;;  %v4022_v52 = vld [vmem:[%s6961_s17 + $0x148] sm:$0xff]  ;;  %v4015_v7 = vld [vmem:[%s6961_s17 + $0x110] sm:$0xff]  ;;  %4258 = vmatpush.msrb.mxu2 %v4234_v13 }
 0xc4c   :  { %v4016_v57 = vld [vmem:[%s6961_s17 + $0x118] sm:$0xff]  ;;  %4136 = vmatpush.msra.mxu3 %v4021_v59  ;;  %4159 = vmatpush.msra.mxu0 %v4022_v52 }
 0xc4d   :  { %v6668_v9 = vmul.f32 %v3913_v4, %v6629_v48  ;;  %v6671_v47 = vmul.f32 %v3912_v3, %v6627_v55 }
 0xc4e   :  { %4137 = vmatpush.msra.mxu3 %v4015_v7  ;;  %4160 = vmatpush.msra.mxu0 %v4016_v57 }
 0xc4f   :  { %v3925_v33 = vsel %vm3710_vm5, %v6668_v9, 0.0  ;;  %v3919_v34 = vsel %vm3710_vm5, %v6668_v9, -inf  ;;  %v3922_v1 = vsel %vm1660_vm8, %v6671_v47, 0.0  ;;  %v3916_v62 = vsel %vm1660_vm8, %v6671_v47, -inf }
 0xc50   :  { %3926 = vadd.xlane.f32.xlu2 %v3925_v33  ;;  %3920 = vmax.xlane.f32.xlu0 %v3919_v34  ;;  %v4009_v33 = vld [vmem:[%s6961_s17 + $0xe0] sm:$0xff]  ;;  %v4010_v34 = vld [vmem:[%s6961_s17 + $0xe8] sm:$0xff] }
 0xc51   :  { %3923 = vadd.xlane.f32.xlu1 %v3922_v1  ;;  %4138 = vmatpush.msra.mxu3 %v4009_v33  ;;  %v4004_v1 = vld [vmem:[%s6961_s17 + $0xb8] sm:$0xff] }
 0xc52   :  { %4161 = vmatpush.msra.mxu0 %v4010_v34 }
 0xc54   :  { %4162 = vmatpush.msra.mxu0 %v4004_v1 }
 0xc59   :  { %3917 = vmax.xlane.f32.xlu1 %v3916_v62  ;;  %v3997_v62 = vld [vmem:[%s6961_s17 + $0x80] sm:$0xff] }
 0xcc3   :  { %v3927_v48 = vpop.xlane.xlu2 %3926  ;;  %v3921_v2 = vpop.xlane.xlu0 %3920 }
 0xcc4   :  { %v3929_v55 = vmul.f32 %v3927_v48, %v5902_v26  ;;  %v3924_v51 = vpop.xlane.xlu1 %3923  ;;  %v3998_v48 = vld [vmem:[%s6961_s17 + $0x88] sm:$0xff] }
 0xcc5   :  { %v3928_v20 = vmul.f32 %v3924_v51, %v5902_v26  ;;  %v3931_v26 = vld [vmem:[%s6959_s15 + $0x8] sm:$0xf]  ;;  %v3992_v51 = vld [vmem:[%s6961_s17 + $0x58] sm:$0xff]  ;;  %4163 = vmatpush.msra.mxu0 %v3998_v48 }
 0xcc6   :  { %v3935_v17 = vrot.slane %v3929_v55, 4  ;;  %v3991_v55 = vld [vmem:[%s6961_s17 + $0x50] sm:$0xff] }
 0xcc7   :  { %v3934_v60 = vrot.slane %v3928_v20, 4  ;;  %v3985_v20 = vld [vmem:[%s6961_s17 + $0x20] sm:$0xff]  ;;  %4164 = vmatpush.msra.mxu0 %v3992_v51 }
 0xcc9   :  { %v3936_v8 = vsel %vm370_vm0, %v3934_v60, %v3935_v17  ;;  %v3939_v16 = vsel %vm370_vm0, %v3921_v2, %v3934_v60  ;;  %v3986_v17 = vld [vmem:[%s6961_s17 + $0x28] sm:$0xff] }
 0xcca   :  { %3959 = vmatpush.msra.mxu1 %v3936_v8  ;;  %4165 = vmatpush.msra.mxu0 %v3986_v17 }
 0xccc   :  { %3960 = vmatpush.msra.mxu1 %v3939_v16  ;;  %v3918_v22 = vpop.xlane.xlu1 %3917 }
 0xcce   :  { %3961 = vmatpush.msra.mxu1 %v3918_v22 }
 0xccf   :  { %4588 = vmatmul.msk.f32.vlgmr.msra.gmra.mxu1 %vm1942_vm13, %v3930_v58 }
 0xcd0   :  { %4112 = vmatpush.msrb.mxu1 %v4026_v38  ;;  %v4230_v38 = vld [vmem:[%s6966_s22] sm:$0x3] }
 0xcd2   :  { %4113 = vmatpush.msrb.mxu1 %v4020_v32  ;;  %v4175_v32 = vld [vmem:[%s6967_s23 + $0x10] sm:$0xff] }
 0xcd4   :  { %4114 = vmatpush.msrb.mxu1 %v4014_v45 }
 0xcd6   :  { %4115 = vmatpush.msrb.mxu1 %v4008_v54  ;;  %v4177_v54 = vld [vmem:[%s6967_s23 + $0x20] sm:$0xff] }
 0xcd7   :  { %4589 = vmatmul.msk.f32.gmra.mxu1 %vm1942_vm13, %v3931_v26  ;;  %vm4263_vm13 = vcmask 162816  }
 0xcd8   :  { %4116 = vmatpush.msrb.mxu1 %v4002_v44 }
 0xcda   :  { %4117 = vmatpush.msrb.mxu1 %v3996_v41  ;;  %v4178_v41 = vld [vmem:[%s6967_s23 + $0x28] sm:$0xff] }
 0xcdc   :  { %4118 = vmatpush.msrb.mxu1 %v3990_v40 }
 0xcde   :  { %4119 = vmatpush.msrb.mxu1 %v3984_v43  ;;  %v4184_v43 = vld [vmem:[%s6967_s23 + $0x58] sm:$0xf] }
 0xce0   :  { %4604 = vmatpush.msk.msra.mxu1 %vm370_vm0, %v4233_v53 }
 0xce2   :  { %4284 = vmatpush.msra.mxu1 %v4232_v49 }
 0xce4   :  { %4285 = vmatpush.msra.mxu1 %v4231_v61  ;;  %v4290_v61 = vperm.slane %v6659_v5, 5 }
 0xd4c   :  { %v3963_v0 = vpop.f32.mrf.mxu1 }
 0xd4d   :  { %3971 = vperm.xlu2 %4623, %v3963_v0  }
 0xd54   :  { %v3966_v46 = vpop.f32.mrf.mxu1 }
 0xd55   :  { %3976 = vperm.xlu0 %4621, %v3966_v46  }
 0xda7   :  { %v3972_v4 = vpop.permute.xlu2 %3971 }
 0xda8   :  { %v3979_v3 = vmul.f32 %v3972_v4, %v6671_v47  ;;  %v4003_v47 = vld [vmem:[%s6961_s17 + $0xb0] sm:$0xff] }
 0xda9   :  { %4139 = vmatpush.msra.mxu3 %v4003_v47 }
 0xdaa   :  { %4590 = vmatmul.msk.f32.vlgmr.msrb.gmra.mxu3 %vm1660_vm8, %v3979_v3  ;;  %4592 = vmatmul.msk.f32.vlgmr.msrb.gmra.mxu0 %vm1660_vm8, %v3979_v3 }
 0xdab   :  { %4594 = vmatmul.msk.f32.vlgmr.msra.gmra.mxu2 %vm1660_vm8, %v3979_v3  ;;  %4596 = vmatmul.msk.f32.vlgmr.msrb.gmra.mxu1 %vm1660_vm8, %v3979_v3 }
 0xdac   :  { %4140 = vmatpush.msra.mxu3 %v3997_v62 }
 0xdae   :  { %4141 = vmatpush.msra.mxu3 %v3991_v55 }
 0xdb0   :  { %4142 = vmatpush.msra.mxu3 %v3985_v20 }
 0xdc7   :  { %v3977_v60 = vpop.permute.xlu0 %3976 }
 0xdc8   :  { %v3980_v8 = vmul.f32 %v3977_v60, %v6668_v9 }
 0xdca   :  { %4591 = vmatmul.msk.f32.gmra.mxu3 %vm1660_vm8, %v3980_v8  ;;  %4593 = vmatmul.msk.f32.gmra.mxu0 %vm1660_vm8, %v3980_v8 }
 0xdcb   :  { %4595 = vmatmul.msk.f32.gmra.mxu2 %vm1660_vm8, %v3980_v8  ;;  %4597 = vmatmul.msk.f32.gmra.mxu1 %vm1660_vm8, %v3980_v8 }
 0xdd2   :  { %4598 = vmatmul.msk.f32.vlgmr.msra.gmra.mxu3 %vm1660_vm8, %v3979_v3  ;;  %4600 = vmatmul.msk.f32.vlgmr.msra.gmra.mxu0 %vm1660_vm8, %v3979_v3 }
 0xdda   :  { %4599 = vmatmul.msk.f32.gmra.mxu3 %vm1660_vm8, %v3980_v8  ;;  %4601 = vmatmul.msk.f32.gmra.mxu0 %vm1660_vm8, %v3980_v8  ;;  %vm4236_vm8 = vcmask 97280  }
 0xddb   :  { %4603 = vmatmul.msk.f32.vlgmr.msrb.gmra.mxu2 %vm4236_vm8, %v4230_v38 }
 0xe27   :  { %v4075_v2 = vpop.f32.mrf.mxu0 }
 0xe28   :  { %v4121_v26 = vpop.f32.mrf.mxu1  ;;  %v4186_v29 = vmul.f32 %v4174_v15, %v4075_v2 }
 0xe29   :  { %v4188_v50 = vmul.f32 %v4176_v23, %v4121_v26 }
 0xe2d   :  { %v4052_v16 = vpop.f32.mrf.mxu3 }
 0xe2e   :  { %v4098_v9 = vpop.f32.mrf.mxu2  ;;  %v4185_v28 = vmul.f32 %v4173_v18, %v4052_v16  ;;  %v4296_v18 = vld [vmem:[%s6964_s20 + $0x18] sm:$0xff] }
 0xe2f   :  { %v4187_v63 = vmul.f32 %v4175_v32, %v4098_v9  ;;  %4314 = vmatpush.msrb.mxu3 %v4296_v18  ;;  %v4295_v32 = vld [vmem:[%s6964_s20 + $0x10] sm:$0xff] }
 0xe30   :  { %v4197_v46 = vadd.f32 %v4186_v29, %v4185_v28  ;;  %v4327_v29 = vperm.slane %v6659_v5, 7 }
 0xe31   :  { %v4199_v31 = vadd.f32 %v4188_v50, %v4187_v63  ;;  %4315 = vmatpush.msrb.mxu3 %v4295_v32  ;;  %v4325_v63 = vld [vmem:[%s6965_s21 + $0x10] sm:$0xff] }
 0xe33   :  { %v4203_v3 = vadd.f32 %v4199_v31, %v4197_v46 }
 0xe47   :  { %v4078_v22 = vpop.f32.mrf.mxu0 }
 0xe48   :  { %v4124_v44 = vpop.f32.mrf.mxu1  ;;  %v4192_v40 = vmul.f32 %v4180_v56, %v4078_v22  ;;  %v4324_v56 = vld [vmem:[%s6965_s21 + $0x8] sm:$0xff] }
 0xe49   :  { %v4194_v0 = vmul.f32 %v4182_v37, %v4124_v44  ;;  %v4323_v44 = vld [vmem:[%s6965_s21] sm:$0xff]  ;;  %v4297_v37 = vperm.slane %v6659_v5, 6 }
 0xe4d   :  { %v4055_v58 = vpop.f32.mrf.mxu3 }
 0xe4e   :  { %v4101_v12 = vpop.f32.mrf.mxu2  ;;  %v4191_v11 = vmul.f32 %v4179_v25, %v4055_v58  ;;  %v4294_v25 = vld [vmem:[%s6964_s20 + $0x8] sm:$0xff] }
 0xe4f   :  { %v4167_v24 = vpop.f32.mrf.mxu0  ;;  %v4193_v42 = vmul.f32 %v4181_v21, %v4101_v12  ;;  %4316 = vmatpush.msrb.mxu3 %v4294_v25  ;;  %v4293_v12 = vld [vmem:[%s6964_s20] sm:$0xff]  ;;  %v4326_v21 = vld [vmem:[%s6965_s21 + $0x18] sm:$0xff] }
 0xe50   :  { %v4190_v35 = vmul.f32 %v4178_v41, %v4167_v24  ;;  %v4198_v30 = vadd.f32 %v4192_v40, %v4191_v11  ;;  %4343 = vmatpush.msrb.mxu0 %v4326_v21 }
 0xe51   :  { %v4200_v59 = vadd.f32 %v4194_v0, %v4193_v42  ;;  %4317 = vmatpush.msrb.mxu3 %v4293_v12 }
 0xe52   :  { %4344 = vmatpush.msrb.mxu0 %v4325_v63 }
 0xe53   :  { %v4204_v33 = vadd.f32 %v4200_v59, %v4198_v30 }
 0xe54   :  { %4345 = vmatpush.msrb.mxu0 %v4324_v56 }
 0xe55   :  { %v4144_v45 = vpop.f32.mrf.mxu3 }
 0xe56   :  { %v4189_v10 = vmul.f32 %v4177_v54, %v4144_v45  ;;  %4346 = vmatpush.msrb.mxu0 %v4323_v44 }
 0xe57   :  { %v4170_v6 = vpop.f32.mrf.mxu0 }
 0xe58   :  { %v4201_v52 = vadd.f32 %v4190_v35, %v4189_v10  ;;  %v4196_v57 = vmul.f32 %v4184_v43, %v4170_v6 }
 0xe5a   :  { %v4205_v47 = vadd.f32 %v4203_v3, %v4201_v52 }
 0xe5c   :  { %v4207_v55 = vmul.f32 %v6622_v39, %v4205_v47  ;;  %v4217_v51 = vmul.f32 %v6625_v36, %v4205_v47  ;;  %v4228_v39 = vperm.slane %v6659_v5, 4 }
 0xe5d   :  { %v4147_v7 = vpop.f32.mrf.mxu3 }
 0xe5e   :  { %v4195_v4 = vmul.f32 %v4183_v14, %v4147_v7  ;;  %v4260_v45 = vpop.f32.mrf.mxu2 }
 0xe60   :  { %v4202_v34 = vadd.f32 %v4196_v57, %v4195_v4 }
 0xe62   :  { %v4206_v1 = vadd.f32 %v4204_v33, %v4202_v34 }
 0xe64   :  { %v4208_v62 = vmul.f32 0.0, %v4206_v1  ;;  %v4218_v48 = vmul.f32 %v6403_v27, %v4206_v1 }
 0xe66   :  { %v4209_v20 = vsel %vm370_vm0, %v4208_v62, 0.0  ;;  %v4219_v17 = vsel %vm370_vm0, %v4218_v48, 0.0  ;;  %vm4298_vm0 = vcmask 261120  }
 0xe67   :  { %v4210_v60 = vadd.f32 %v4209_v20, %v4207_v55  ;;  %v4220_v8 = vadd.f32 %v4219_v17, %v4217_v51 }
 0xe69   :  { %v4211_v2 = vrot.slane %v4210_v60, 4  ;;  %v4221_v16 = vrot.slane %v4220_v8, 4 }
 0xe6b   :  { %v4212_v22 = vadd.f32 %v4211_v2, %v4210_v60  ;;  %v4222_v9 = vadd.f32 %v4221_v16, %v4220_v8 }
 0xe6d   :  { %v4213_v58 = vrot.slane %v4212_v22, 2  ;;  %v4223_v26 = vrot.slane %v4222_v9, 2 }
 0xe6f   :  { %v4214_v19 = vadd.f32 %v4213_v58, %v4212_v22  ;;  %v4224_v24 = vadd.f32 %v4223_v26, %v4222_v9 }
 0xe71   :  { %v4215_v13 = vrot.slane %v4214_v19, 1  ;;  %v4225_v27 = vrot.slane %v4224_v24, 1 }
 0xe73   :  { %v4216_v38 = vadd.f32 %v4215_v13, %v4214_v19  ;;  %v4226_v36 = vadd.f32 %v4225_v27, %v4224_v24 }
 0xe75   :  { %v4227_v53 = vsel %vm1236_vm4, %v4216_v38, %v4226_v36  ;;  %vm4352_vm4 = vcmask 1024  }
 0xe76   :  { %v4229_v49 = vadd.f32 %v4228_v39, %v4227_v53 }
 0xe78   :  { %4605 = vmatmul.msk.f32.vlgmr.msra.gmra.mxu1 %vm4263_vm13, %v4229_v49 }
 0xef5   :  { %v4287_v15 = vpop.f32.mrf.mxu1 }
 0xef6   :  { %v4288_v23 = vadd.f32 %v4287_v15, %v4260_v45 }
 0xef8   :  { %v4291_v54 = vadd.f32 %v4290_v61, %v4288_v23 }
 0xefa   :  { %v4292_v28 = vmax.f32 %v4291_v54, 0.0 }
 0xefc   :  { %4606 = vmatmul.msk.f32.vlgmr.msrb.gmra.mxu3 %vm4298_vm0, %v4292_v28 }
 0xf7f   :  { %v4319_v11 = vpop.f32.mrf.mxu3 }
 0xf80   :  { %v4320_v42 = vadd.f32 %v4319_v11, %v4297_v37 }
 0xf82   :  { %v4322_v41 = vmax.f32 %v4320_v42, 0.0 }
 0xf84   :  { %4607 = vmatmul.msk.f32.vlgmr.msrb.gmra.mxu0 %vm4298_vm0, %v4322_v41 }
0x1001   :  { %v4348_v50 = vpop.f32.mrf.mxu0 }
0x1002   :  { %v4349_v10 = vadd.f32 %v4348_v50, %v4327_v29 }
0x1004   :  { %4650 = vtanh.f32 %v4349_v10 }
0x100a   :  { %v4651_v40 = vpop.eup %4650 }
0x100b   :  { %4353 = vst.msk [vmem:[%s7096_s3] sm:$0x3] %vm4352_vm4, %v4651_v40 }
0x100c   :  { %4358 = vsyncpa [#allocation3], 1 }
0x100d   :  { %4359 = vsyncpa [#allocation5], 1 }

</bundles_post_ra>
